<compile_context>
chip_gen: v7x
topology: tpu7x:2x2x1
jax: 0.10.0
libtpu: 0.0.40
codegen_flags: <defaults>
</compile_context>

<pallas_src>
import functools

import jax
import jax.numpy as jnp
from jax import lax
from jax.experimental import pallas as pl
from jax.experimental.pallas import tpu as pltpu


def _round_up(x, m):
    return (x + m - 1) // m * m


def _lstm_classifier_kernel(num_layers, hidden_p, batch_real, *refs):
    """refs = x, (w_ih_t, w_hh_t, b) * L, gamma, beta, fc_w_t, fc_b, out, hseq, gates.

    Gate column blocks are laid out as [i | f | o | g], each block hidden_p lanes wide.
    """
    Hp = hidden_p
    x_ref = refs[0]
    idx = 1
    layers = []
    for _ in range(num_layers):
        layers.append((refs[idx], refs[idx + 1], refs[idx + 2]))
        idx += 3
    gamma_ref, beta_ref, fcw_ref, fcb_ref = refs[idx:idx + 4]
    out_ref = refs[idx + 4]
    hseq_ref = refs[idx + 5]      # VMEM scratch: intermediate-layer h sequence (f32)
    gates_ref = refs[idx + 6]     # VMEM scratch (T, Bp, 4*Hp) f32: hoisted pre-gates

    T = x_ref.shape[0]
    Bp = x_ref.shape[1]
    unroll = T if T <= 16 else 8

    h_last = None
    for layer, (wih_ref, whh_ref, b_ref) in enumerate(layers):
        in_ref = x_ref if layer == 0 else hseq_ref
        d_in = in_ref.shape[2]
        is_last = layer == num_layers - 1

        # Hoisted input projection: one big lane-aligned MXU matmul + one bias broadcast.
        xin = in_ref[...].reshape(T * Bp, d_in)
        pre = jnp.dot(xin.astype(wih_ref.dtype), wih_ref[...],
                      preferred_element_type=jnp.float32) + b_ref[...]
        gates_ref[...] = pre.reshape(T, Bp, 4 * Hp)

        whh_t = whh_ref[...]                                  # (Hp, 4Hp)

        def step(t, carry, whh_t=whh_t, is_last=is_last):
            h, c = carry
            g = gates_ref[t] + jnp.dot(h.astype(whh_t.dtype), whh_t,
                                       preferred_element_type=jnp.float32)   # (Bp, 4Hp) f32
            # Fused sigmoid over the contiguous [i | f | o] blocks (3*Hp lanes, 128-aligned),
            # tanh over the trailing g block.
            ifo = jax.nn.sigmoid(g[:, 0:3 * Hp])
            i = ifo[:, 0 * Hp:1 * Hp]
            f = ifo[:, 1 * Hp:2 * Hp]
            o = ifo[:, 2 * Hp:3 * Hp]
            gg = jnp.tanh(g[:, 3 * Hp:4 * Hp])
            c = f * c + i * gg
            h = o * jnp.tanh(c)
            if not is_last:
                hseq_ref[t] = h        # safe: this layer's pre-gates were built before the loop
            return h, c

        h0 = jnp.zeros((Bp, Hp), jnp.float32)
        c0 = jnp.zeros((Bp, Hp), jnp.float32)
        h_last, _ = lax.fori_loop(0, T, step, (h0, c0), unroll=unroll)

    # BatchNorm1d(h_n[-1]) in train-mode forward (batch stats, biased variance), computed
    # over the REAL batch rows only (padded rows are masked out of the statistics).
    row_ids = lax.broadcasted_iota(jnp.int32, (Bp, Hp), 0)
    row_mask = row_ids < batch_real
    inv_b = 1.0 / float(batch_real)
    h_m = jnp.where(row_mask, h_last, 0.0)
    mean = jnp.sum(h_m, axis=0, keepdims=True) * inv_b
    diff = jnp.where(row_mask, h_last - mean, 0.0)
    var = jnp.sum(diff * diff, axis=0, keepdims=True) * inv_b
    hn = (h_last - mean) * lax.rsqrt(var + 1e-5)
    hn = hn * gamma_ref[...] + beta_ref[...]

    # Final FC: lane-dense (Bp, 128) output slab -> unmasked vector stores.
    out = jnp.dot(hn, fcw_ref[...], preferred_element_type=jnp.float32) + fcb_ref[...]
    out_ref[...] = out.astype(out_ref.dtype)


def lstm_classifier_forward(x_btd, params, *, hidden_size, num_layers,
                            weight_dtype=jnp.bfloat16):
    assert num_layers >= 1
    B, T, D = x_btd.shape
    H = hidden_size
    Bp = _round_up(B, 8)
    Hp = _round_up(H, 128)
    Dp = _round_up(D, 128)

    # (B, T, D) -> time-major, zero-padded (T, Bp, Dp).
    x_tbd = jnp.transpose(x_btd, (1, 0, 2)).astype(jnp.float32)
    x_tbd = jnp.pad(x_tbd, ((0, 0), (0, Bp - B), (0, Dp - D)))

    # PyTorch gate order [i|f|g|o] -> kernel gate order [i|f|o|g] (sigmoid blocks contiguous).
    gate_perm = jnp.array([0, 1, 3, 2], jnp.int32)

    def pad_gate_blocks(w, d_in, d_in_p):
        # (d_in, 4H) -> (d_in_p, 4*Hp), each reordered gate block Hp lanes wide.
        w4 = w.reshape(d_in, 4, H)
        w4 = jnp.take(w4, gate_perm, axis=1)
        w4 = jnp.pad(w4, ((0, d_in_p - d_in), (0, 0), (0, Hp - H)))
        return w4.reshape(d_in_p, 4 * Hp)

    inputs = [x_tbd]
    for l in range(num_layers):
        d_in = D if l == 0 else H
        d_in_p = Dp if l == 0 else Hp
        w_ih = pad_gate_blocks(params[f"w_ih_t_{l}"], d_in, d_in_p).astype(weight_dtype)
        w_hh = pad_gate_blocks(params[f"w_hh_t_{l}"], H, Hp).astype(weight_dtype)
        b = pad_gate_blocks(params[f"b_{l}"], 1, 1).astype(jnp.float32)
        inputs += [w_ih, w_hh, b]

    gamma = jnp.pad(params["gamma"], ((0, 0), (0, Hp - H))).astype(jnp.float32)
    beta = jnp.pad(params["beta"], ((0, 0), (0, Hp - H))).astype(jnp.float32)
    fc_w = jnp.pad(params["fc_w_t"], ((0, Hp - H), (0, 127))).astype(jnp.float32)
    fc_b = jnp.pad(params["fc_b"], ((0, 0), (0, 127))).astype(jnp.float32)
    inputs += [gamma, beta, fc_w, fc_b]

    # Intermediate h-sequence scratch is only touched when num_layers > 1.
    hseq_shape = (T, Bp, Hp) if num_layers > 1 else (1, 8, 128)

    # VMEM footprint (grid-less call -> no double-buffering of inputs).
    wbytes = jnp.dtype(weight_dtype).itemsize
    vmem_bytes = 4 * T * Bp * (Dp + 4 * Hp)                   # x + pre-gate scratch
    vmem_bytes += 4 * hseq_shape[0] * hseq_shape[1] * hseq_shape[2]
    for l in range(num_layers):
        d_in_p = Dp if l == 0 else Hp
        vmem_bytes += wbytes * (d_in_p + Hp) * 4 * Hp + 4 * 4 * Hp
    vmem_bytes += 4 * (2 * Hp + Hp * 128 + 128 + Bp * 128)    # gamma/beta/fc_w/fc_b/out
    vmem_limit = int(min(max(2 * vmem_bytes + (8 << 20), 32 << 20), 64 << 20))

    kernel = functools.partial(_lstm_classifier_kernel, num_layers, Hp, B)
    out_p = pl.pallas_call(
        kernel,
        out_shape=jax.ShapeDtypeStruct((Bp, 128), jnp.float32),
        in_specs=[pl.BlockSpec(memory_space=pltpu.MemorySpace.VMEM)] * len(inputs),
        out_specs=pl.BlockSpec(memory_space=pltpu.MemorySpace.VMEM),
        scratch_shapes=[pltpu.VMEM(hseq_shape, jnp.float32),
                        pltpu.VMEM((T, Bp, 4 * Hp), jnp.float32)],
        compiler_params=pltpu.CompilerParams(vmem_limit_bytes=vmem_limit),
    )(*inputs)
    return out_p[:B, :1]


def init_params(key, input_size, hidden_size, num_layers):
    """Deterministic synthetic params matching nn.LSTM / nn.Linear init shapes (unpadded)."""
    k = 1.0 / float(hidden_size) ** 0.5
    keys = jax.random.split(key, 4 * num_layers + 2)
    ki = 0
    params = {}
    for l in range(num_layers):
        d = input_size if l == 0 else hidden_size
        w_ih = jax.random.uniform(keys[ki], (4 * hidden_size, d), jnp.float32, -k, k); ki += 1
        w_hh = jax.random.uniform(keys[ki], (4 * hidden_size, hidden_size), jnp.float32, -k, k); ki += 1
        b_ih = jax.random.uniform(keys[ki], (4 * hidden_size,), jnp.float32, -k, k); ki += 1
        b_hh = jax.random.uniform(keys[ki], (4 * hidden_size,), jnp.float32, -k, k); ki += 1
        params[f"w_ih_t_{l}"] = jnp.transpose(w_ih)                       # (D, 4H)
        params[f"w_hh_t_{l}"] = jnp.transpose(w_hh)                       # (H, 4H)
        params[f"b_{l}"] = (b_ih + b_hh).reshape(1, 4 * hidden_size)      # (1, 4H)
    params["gamma"] = jnp.ones((1, hidden_size), jnp.float32)
    params["beta"] = jnp.zeros((1, hidden_size), jnp.float32)
    fc_w = jax.random.uniform(keys[ki], (1, hidden_size), jnp.float32, -k, k); ki += 1
    fc_b = jax.random.uniform(keys[ki], (1,), jnp.float32, -k, k)
    params["fc_w_t"] = jnp.transpose(fc_w)                                # (H, 1)
    params["fc_b"] = fc_b.reshape(1, 1)                                   # (1, 1)
    return params


def reference_forward(x_btd, params, *, hidden_size, num_layers):
    """Pure-JAX reference mirroring the PyTorch forward (for correctness check)."""
    B, _, _ = x_btd.shape
    H = hidden_size
    seq = jnp.transpose(x_btd, (1, 0, 2)).astype(jnp.float32)
    h_last = jnp.zeros((B, H), jnp.float32)
    for l in range(num_layers):
        wih_t = params[f"w_ih_t_{l}"]
        whh_t = params[f"w_hh_t_{l}"]
        b = params[f"b_{l}"]

        def step(carry, xt, wih_t=wih_t, whh_t=whh_t, b=b):
            h, c = carry
            g = xt @ wih_t + h @ whh_t + b
            i = jax.nn.sigmoid(g[:, :H])
            f = jax.nn.sigmoid(g[:, H:2 * H])
            gg = jnp.tanh(g[:, 2 * H:3 * H])
            o = jax.nn.sigmoid(g[:, 3 * H:])
            c = f * c + i * gg
            h = o * jnp.tanh(c)
            return (h, c), h

        (h_last, _), seq = lax.scan(
            step, (jnp.zeros((B, H), jnp.float32), jnp.zeros((B, H), jnp.float32)), seq)
    mean = jnp.mean(h_last, axis=0, keepdims=True)
    var = jnp.mean((h_last - mean) ** 2, axis=0, keepdims=True)
    hn = (h_last - mean) / jnp.sqrt(var + 1e-5) * params["gamma"] + params["beta"]
    return hn @ params["fc_w_t"] + params["fc_b"]


if __name__ == "__main__":
    INPUT_SIZE, HIDDEN_SIZE, NUM_LAYERS = 16, 32, 2
    B, T = 4, 8

    key = jax.random.PRNGKey(0)
    kx, kp = jax.random.split(key)
    x = jax.random.normal(kx, (B, T, INPUT_SIZE), jnp.float32)
    params = init_params(kp, INPUT_SIZE, HIDDEN_SIZE, NUM_LAYERS)

    ref = jax.block_until_ready(
        reference_forward(x, params, hidden_size=HIDDEN_SIZE, num_layers=NUM_LAYERS))

    # Exact-path check (f32 weights): must match the PyTorch-style reference tightly.
    out_f32 = jax.block_until_ready(
        lstm_classifier_forward(x, params, hidden_size=HIDDEN_SIZE, num_layers=NUM_LAYERS,
                                weight_dtype=jnp.float32))
    assert out_f32.shape == (B, 1), out_f32.shape
    assert jnp.allclose(out_f32, ref, atol=1e-4, rtol=1e-4), (out_f32, ref)

    # Fast path (bf16 MXU weights, f32 accumulation/state): looser tolerance expected.
    out_bf16 = jax.block_until_ready(
        lstm_classifier_forward(x, params, hidden_size=HIDDEN_SIZE, num_layers=NUM_LAYERS))
    assert out_bf16.shape == (B, 1), out_bf16.shape
    assert jnp.allclose(out_bf16, ref, atol=5e-2, rtol=5e-2), (out_bf16, ref)

    # Single-layer configuration sanity check (exercises the minimal h-seq scratch path).
    params1 = init_params(kp, INPUT_SIZE, HIDDEN_SIZE, 1)
    ref1 = reference_forward(x, params1, hidden_size=HIDDEN_SIZE, num_layers=1)
    out1 = jax.block_until_ready(
        lstm_classifier_forward(x, params1, hidden_size=HIDDEN_SIZE, num_layers=1,
                                weight_dtype=jnp.float32))
    assert jnp.allclose(out1, ref1, atol=1e-4, rtol=1e-4), (out1, ref1)

    print("KERNEL_OK")
</pallas_src>

<mosaic_0001>
module attributes {stable_mosaic.version = 11 : i64} {
  func.func @_lstm_classifier_kernel(%arg0: memref<8x8x128xf32, #tpu.memory_space<vmem>>, %arg1: memref<128x512xf32, #tpu.memory_space<vmem>>, %arg2: memref<128x512xf32, #tpu.memory_space<vmem>>, %arg3: memref<1x512xf32, #tpu.memory_space<vmem>>, %arg4: memref<128x512xf32, #tpu.memory_space<vmem>>, %arg5: memref<128x512xf32, #tpu.memory_space<vmem>>, %arg6: memref<1x512xf32, #tpu.memory_space<vmem>>, %arg7: memref<1x128xf32, #tpu.memory_space<vmem>>, %arg8: memref<1x128xf32, #tpu.memory_space<vmem>>, %arg9: memref<128x128xf32, #tpu.memory_space<vmem>>, %arg10: memref<1x128xf32, #tpu.memory_space<vmem>>, %arg11: memref<8x128xf32, #tpu.memory_space<vmem>>, %arg12: memref<8x8x128xf32, #tpu.memory_space<vmem>>, %arg13: memref<8x8x512xf32, #tpu.memory_space<vmem>>) attributes {dimension_semantics = [], scalar_prefetch = 0 : i64, scratch_operands = 2 : i64, tpu.core_type = #tpu.core_type<tc>} {
    %c0 = arith.constant 0 : index
    %c0_0 = arith.constant 0 : index
    %c0_1 = arith.constant 0 : index
    %0 = vector.load %arg0[%c0, %c0_0, %c0_1] : memref<8x8x128xf32, #tpu.memory_space<vmem>>, vector<8x8x128xf32>
    %1 = vector.shape_cast %0 : vector<8x8x128xf32> to vector<64x128xf32>
    %c0_2 = arith.constant 0 : index
    %c0_3 = arith.constant 0 : index
    %2 = vector.load %arg1[%c0_2, %c0_3] : memref<128x512xf32, #tpu.memory_space<vmem>>, vector<128x512xf32>
    %cst = arith.constant dense<0.000000e+00> : vector<64x512xf32>
    %3 = tpu.matmul %1, %2, %cst {dimension_numbers = #tpu.dot_dimension_numbers<[1], [0], [0], [1], [0, 0, 1, 1], [], []>} : vector<64x128xf32>, vector<128x512xf32>, vector<64x512xf32> -> vector<64x512xf32>
    %c0_4 = arith.constant 0 : index
    %c0_5 = arith.constant 0 : index
    %4 = vector.load %arg3[%c0_4, %c0_5] : memref<1x512xf32, #tpu.memory_space<vmem>>, vector<1x512xf32>
    %5 = vector.broadcast %4 : vector<1x512xf32> to vector<64x512xf32>
    %6 = arith.addf %3, %5 : vector<64x512xf32>
    %7 = vector.shape_cast %6 : vector<64x512xf32> to vector<8x8x512xf32>
    %c0_6 = arith.constant 0 : index
    %c0_7 = arith.constant 0 : index
    %c0_8 = arith.constant 0 : index
    %8 = vector.load %arg13[%c0_6, %c0_7, %c0_8] : memref<8x8x512xf32, #tpu.memory_space<vmem>>, vector<8x8x512xf32>
    tpu.vector_store %arg13[%c0_6, %c0_7, %c0_8], %7 {strides = array<i32>} : memref<8x8x512xf32, #tpu.memory_space<vmem>>, vector<8x8x512xf32>,
    %c0_9 = arith.constant 0 : index
    %c0_10 = arith.constant 0 : index
    %9 = vector.load %arg2[%c0_9, %c0_10] : memref<128x512xf32, #tpu.memory_space<vmem>>, vector<128x512xf32>
    %cst_11 = arith.constant 0.000000e+00 : f32
    %10 = vector.broadcast %cst_11 : f32 to vector<8x128xf32>
    %cst_12 = arith.constant 0.000000e+00 : f32
    %11 = vector.broadcast %cst_12 : f32 to vector<8x128xf32>
    %c0_i32 = arith.constant 0 : i32
    %12 = arith.index_cast %c0_i32 : i32 to index
    %c0_13 = arith.constant 0 : index
    %c0_14 = arith.constant 0 : index
    %13 = vector.load %arg13[%12, %c0_13, %c0_14] : memref<8x8x512xf32, #tpu.memory_space<vmem>>, vector<1x8x512xf32>
    %14 = vector.shape_cast %13 : vector<1x8x512xf32> to vector<8x512xf32>
    %cst_15 = arith.constant dense<0.000000e+00> : vector<8x512xf32>
    %15 = tpu.matmul %10, %9, %cst_15 {dimension_numbers = #tpu.dot_dimension_numbers<[1], [0], [0], [1], [0, 0, 1, 1], [], []>} : vector<8x128xf32>, vector<128x512xf32>, vector<8x512xf32> -> vector<8x512xf32>
    %16 = arith.addf %14, %15 : vector<8x512xf32>
    %17 = vector.extract_strided_slice %16 {offsets = [0, 0], sizes = [8, 384], strides = [1, 1]} : vector<8x512xf32> to vector<8x384xf32>
    %18 = arith.negf %17 : vector<8x384xf32>
    %19 = math.exp %18 : vector<8x384xf32>
    %cst_16 = arith.constant 1.000000e+00 : f32
    %20 = vector.broadcast %cst_16 : f32 to vector<8x384xf32>
    %21 = arith.addf %20, %19 : vector<8x384xf32>
    %22 = arith.divf %20, %21 : vector<8x384xf32>
    %23 = vector.extract_strided_slice %22 {offsets = [0, 0], sizes = [8, 128], strides = [1, 1]} : vector<8x384xf32> to vector<8x128xf32>
    %24 = vector.extract_strided_slice %22 {offsets = [0, 128], sizes = [8, 128], strides = [1, 1]} : vector<8x384xf32> to vector<8x128xf32>
    %25 = vector.extract_strided_slice %22 {offsets = [0, 256], sizes = [8, 128], strides = [1, 1]} : vector<8x384xf32> to vector<8x128xf32>
    %26 = vector.extract_strided_slice %16 {offsets = [0, 384], sizes = [8, 128], strides = [1, 1]} : vector<8x512xf32> to vector<8x128xf32>
    %27 = math.tanh %26 : vector<8x128xf32>
    %28 = arith.mulf %24, %11 : vector<8x128xf32>
    %29 = arith.mulf %23, %27 : vector<8x128xf32>
    %30 = arith.addf %28, %29 : vector<8x128xf32>
    %31 = math.tanh %30 : vector<8x128xf32>
    %32 = arith.mulf %25, %31 : vector<8x128xf32>
    %33 = arith.index_cast %c0_i32 : i32 to index
    %c0_17 = arith.constant 0 : index
    %c0_18 = arith.constant 0 : index
    %34 = vector.load %arg12[%33, %c0_17, %c0_18] : memref<8x8x128xf32, #tpu.memory_space<vmem>>, vector<1x8x128xf32>
    %35 = vector.shape_cast %34 : vector<1x8x128xf32> to vector<8x128xf32>
    %36 = vector.shape_cast %32 : vector<8x128xf32> to vector<1x8x128xf32>
    tpu.vector_store %arg12[%33, %c0_17, %c0_18], %36 {strides = array<i32>} : memref<8x8x128xf32, #tpu.memory_space<vmem>>, vector<1x8x128xf32>,
    %c1_i32 = arith.constant 1 : i32
    %37 = arith.index_cast %c1_i32 : i32 to index
    %c0_19 = arith.constant 0 : index
    %c0_20 = arith.constant 0 : index
    %38 = vector.load %arg13[%37, %c0_19, %c0_20] : memref<8x8x512xf32, #tpu.memory_space<vmem>>, vector<1x8x512xf32>
    %39 = vector.shape_cast %38 : vector<1x8x512xf32> to vector<8x512xf32>
    %cst_21 = arith.constant dense<0.000000e+00> : vector<8x512xf32>
    %40 = tpu.matmul %32, %9, %cst_21 {dimension_numbers = #tpu.dot_dimension_numbers<[1], [0], [0], [1], [0, 0, 1, 1], [], []>} : vector<8x128xf32>, vector<128x512xf32>, vector<8x512xf32> -> vector<8x512xf32>
    %41 = arith.addf %39, %40 : vector<8x512xf32>
    %42 = vector.extract_strided_slice %41 {offsets = [0, 0], sizes = [8, 384], strides = [1, 1]} : vector<8x512xf32> to vector<8x384xf32>
    %43 = arith.negf %42 : vector<8x384xf32>
    %44 = math.exp %43 : vector<8x384xf32>
    %cst_22 = arith.constant 1.000000e+00 : f32
    %45 = vector.broadcast %cst_22 : f32 to vector<8x384xf32>
    %46 = arith.addf %45, %44 : vector<8x384xf32>
    %47 = arith.divf %45, %46 : vector<8x384xf32>
    %48 = vector.extract_strided_slice %47 {offsets = [0, 0], sizes = [8, 128], strides = [1, 1]} : vector<8x384xf32> to vector<8x128xf32>
    %49 = vector.extract_strided_slice %47 {offsets = [0, 128], sizes = [8, 128], strides = [1, 1]} : vector<8x384xf32> to vector<8x128xf32>
    %50 = vector.extract_strided_slice %47 {offsets = [0, 256], sizes = [8, 128], strides = [1, 1]} : vector<8x384xf32> to vector<8x128xf32>
    %51 = vector.extract_strided_slice %41 {offsets = [0, 384], sizes = [8, 128], strides = [1, 1]} : vector<8x512xf32> to vector<8x128xf32>
    %52 = math.tanh %51 : vector<8x128xf32>
    %53 = arith.mulf %49, %30 : vector<8x128xf32>
    %54 = arith.mulf %48, %52 : vector<8x128xf32>
    %55 = arith.addf %53, %54 : vector<8x128xf32>
    %56 = math.tanh %55 : vector<8x128xf32>
    %57 = arith.mulf %50, %56 : vector<8x128xf32>
    %58 = arith.index_cast %c1_i32 : i32 to index
    %c0_23 = arith.constant 0 : index
    %c0_24 = arith.constant 0 : index
    %59 = vector.load %arg12[%58, %c0_23, %c0_24] : memref<8x8x128xf32, #tpu.memory_space<vmem>>, vector<1x8x128xf32>
    %60 = vector.shape_cast %59 : vector<1x8x128xf32> to vector<8x128xf32>
    %61 = vector.shape_cast %57 : vector<8x128xf32> to vector<1x8x128xf32>
    tpu.vector_store %arg12[%58, %c0_23, %c0_24], %61 {strides = array<i32>} : memref<8x8x128xf32, #tpu.memory_space<vmem>>, vector<1x8x128xf32>,
    %c2_i32 = arith.constant 2 : i32
    %62 = arith.index_cast %c2_i32 : i32 to index
    %c0_25 = arith.constant 0 : index
    %c0_26 = arith.constant 0 : index
    %63 = vector.load %arg13[%62, %c0_25, %c0_26] : memref<8x8x512xf32, #tpu.memory_space<vmem>>, vector<1x8x512xf32>
    %64 = vector.shape_cast %63 : vector<1x8x512xf32> to vector<8x512xf32>
    %cst_27 = arith.constant dense<0.000000e+00> : vector<8x512xf32>
    %65 = tpu.matmul %57, %9, %cst_27 {dimension_numbers = #tpu.dot_dimension_numbers<[1], [0], [0], [1], [0, 0, 1, 1], [], []>} : vector<8x128xf32>, vector<128x512xf32>, vector<8x512xf32> -> vector<8x512xf32>
    %66 = arith.addf %64, %65 : vector<8x512xf32>
    %67 = vector.extract_strided_slice %66 {offsets = [0, 0], sizes = [8, 384], strides = [1, 1]} : vector<8x512xf32> to vector<8x384xf32>
    %68 = arith.negf %67 : vector<8x384xf32>
    %69 = math.exp %68 : vector<8x384xf32>
    %cst_28 = arith.constant 1.000000e+00 : f32
    %70 = vector.broadcast %cst_28 : f32 to vector<8x384xf32>
    %71 = arith.addf %70, %69 : vector<8x384xf32>
    %72 = arith.divf %70, %71 : vector<8x384xf32>
    %73 = vector.extract_strided_slice %72 {offsets = [0, 0], sizes = [8, 128], strides = [1, 1]} : vector<8x384xf32> to vector<8x128xf32>
    %74 = vector.extract_strided_slice %72 {offsets = [0, 128], sizes = [8, 128], strides = [1, 1]} : vector<8x384xf32> to vector<8x128xf32>
    %75 = vector.extract_strided_slice %72 {offsets = [0, 256], sizes = [8, 128], strides = [1, 1]} : vector<8x384xf32> to vector<8x128xf32>
    %76 = vector.extract_strided_slice %66 {offsets = [0, 384], sizes = [8, 128], strides = [1, 1]} : vector<8x512xf32> to vector<8x128xf32>
    %77 = math.tanh %76 : vector<8x128xf32>
    %78 = arith.mulf %74, %55 : vector<8x128xf32>
    %79 = arith.mulf %73, %77 : vector<8x128xf32>
    %80 = arith.addf %78, %79 : vector<8x128xf32>
    %81 = math.tanh %80 : vector<8x128xf32>
    %82 = arith.mulf %75, %81 : vector<8x128xf32>
    %83 = arith.index_cast %c2_i32 : i32 to index
    %c0_29 = arith.constant 0 : index
    %c0_30 = arith.constant 0 : index
    %84 = vector.load %arg12[%83, %c0_29, %c0_30] : memref<8x8x128xf32, #tpu.memory_space<vmem>>, vector<1x8x128xf32>
    %85 = vector.shape_cast %84 : vector<1x8x128xf32> to vector<8x128xf32>
    %86 = vector.shape_cast %82 : vector<8x128xf32> to vector<1x8x128xf32>
    tpu.vector_store %arg12[%83, %c0_29, %c0_30], %86 {strides = array<i32>} : memref<8x8x128xf32, #tpu.memory_space<vmem>>, vector<1x8x128xf32>,
    %c3_i32 = arith.constant 3 : i32
    %87 = arith.index_cast %c3_i32 : i32 to index
    %c0_31 = arith.constant 0 : index
    %c0_32 = arith.constant 0 : index
    %88 = vector.load %arg13[%87, %c0_31, %c0_32] : memref<8x8x512xf32, #tpu.memory_space<vmem>>, vector<1x8x512xf32>
    %89 = vector.shape_cast %88 : vector<1x8x512xf32> to vector<8x512xf32>
    %cst_33 = arith.constant dense<0.000000e+00> : vector<8x512xf32>
    %90 = tpu.matmul %82, %9, %cst_33 {dimension_numbers = #tpu.dot_dimension_numbers<[1], [0], [0], [1], [0, 0, 1, 1], [], []>} : vector<8x128xf32>, vector<128x512xf32>, vector<8x512xf32> -> vector<8x512xf32>
    %91 = arith.addf %89, %90 : vector<8x512xf32>
    %92 = vector.extract_strided_slice %91 {offsets = [0, 0], sizes = [8, 384], strides = [1, 1]} : vector<8x512xf32> to vector<8x384xf32>
    %93 = arith.negf %92 : vector<8x384xf32>
    %94 = math.exp %93 : vector<8x384xf32>
    %cst_34 = arith.constant 1.000000e+00 : f32
    %95 = vector.broadcast %cst_34 : f32 to vector<8x384xf32>
    %96 = arith.addf %95, %94 : vector<8x384xf32>
    %97 = arith.divf %95, %96 : vector<8x384xf32>
    %98 = vector.extract_strided_slice %97 {offsets = [0, 0], sizes = [8, 128], strides = [1, 1]} : vector<8x384xf32> to vector<8x128xf32>
    %99 = vector.extract_strided_slice %97 {offsets = [0, 128], sizes = [8, 128], strides = [1, 1]} : vector<8x384xf32> to vector<8x128xf32>
    %100 = vector.extract_strided_slice %97 {offsets = [0, 256], sizes = [8, 128], strides = [1, 1]} : vector<8x384xf32> to vector<8x128xf32>
    %101 = vector.extract_strided_slice %91 {offsets = [0, 384], sizes = [8, 128], strides = [1, 1]} : vector<8x512xf32> to vector<8x128xf32>
    %102 = math.tanh %101 : vector<8x128xf32>
    %103 = arith.mulf %99, %80 : vector<8x128xf32>
    %104 = arith.mulf %98, %102 : vector<8x128xf32>
    %105 = arith.addf %103, %104 : vector<8x128xf32>
    %106 = math.tanh %105 : vector<8x128xf32>
    %107 = arith.mulf %100, %106 : vector<8x128xf32>
    %108 = arith.index_cast %c3_i32 : i32 to index
    %c0_35 = arith.constant 0 : index
    %c0_36 = arith.constant 0 : index
    %109 = vector.load %arg12[%108, %c0_35, %c0_36] : memref<8x8x128xf32, #tpu.memory_space<vmem>>, vector<1x8x128xf32>
    %110 = vector.shape_cast %109 : vector<1x8x128xf32> to vector<8x128xf32>
    %111 = vector.shape_cast %107 : vector<8x128xf32> to vector<1x8x128xf32>
    tpu.vector_store %arg12[%108, %c0_35, %c0_36], %111 {strides = array<i32>} : memref<8x8x128xf32, #tpu.memory_space<vmem>>, vector<1x8x128xf32>,
    %c4_i32 = arith.constant 4 : i32
    %112 = arith.index_cast %c4_i32 : i32 to index
    %c0_37 = arith.constant 0 : index
    %c0_38 = arith.constant 0 : index
    %113 = vector.load %arg13[%112, %c0_37, %c0_38] : memref<8x8x512xf32, #tpu.memory_space<vmem>>, vector<1x8x512xf32>
    %114 = vector.shape_cast %113 : vector<1x8x512xf32> to vector<8x512xf32>
    %cst_39 = arith.constant dense<0.000000e+00> : vector<8x512xf32>
    %115 = tpu.matmul %107, %9, %cst_39 {dimension_numbers = #tpu.dot_dimension_numbers<[1], [0], [0], [1], [0, 0, 1, 1], [], []>} : vector<8x128xf32>, vector<128x512xf32>, vector<8x512xf32> -> vector<8x512xf32>
    %116 = arith.addf %114, %115 : vector<8x512xf32>
    %117 = vector.extract_strided_slice %116 {offsets = [0, 0], sizes = [8, 384], strides = [1, 1]} : vector<8x512xf32> to vector<8x384xf32>
    %118 = arith.negf %117 : vector<8x384xf32>
    %119 = math.exp %118 : vector<8x384xf32>
    %cst_40 = arith.constant 1.000000e+00 : f32
    %120 = vector.broadcast %cst_40 : f32 to vector<8x384xf32>
    %121 = arith.addf %120, %119 : vector<8x384xf32>
    %122 = arith.divf %120, %121 : vector<8x384xf32>
    %123 = vector.extract_strided_slice %122 {offsets = [0, 0], sizes = [8, 128], strides = [1, 1]} : vector<8x384xf32> to vector<8x128xf32>
    %124 = vector.extract_strided_slice %122 {offsets = [0, 128], sizes = [8, 128], strides = [1, 1]} : vector<8x384xf32> to vector<8x128xf32>
    %125 = vector.extract_strided_slice %122 {offsets = [0, 256], sizes = [8, 128], strides = [1, 1]} : vector<8x384xf32> to vector<8x128xf32>
    %126 = vector.extract_strided_slice %116 {offsets = [0, 384], sizes = [8, 128], strides = [1, 1]} : vector<8x512xf32> to vector<8x128xf32>
    %127 = math.tanh %126 : vector<8x128xf32>
    %128 = arith.mulf %124, %105 : vector<8x128xf32>
    %129 = arith.mulf %123, %127 : vector<8x128xf32>
    %130 = arith.addf %128, %129 : vector<8x128xf32>
    %131 = math.tanh %130 : vector<8x128xf32>
    %132 = arith.mulf %125, %131 : vector<8x128xf32>
    %133 = arith.index_cast %c4_i32 : i32 to index
    %c0_41 = arith.constant 0 : index
    %c0_42 = arith.constant 0 : index
    %134 = vector.load %arg12[%133, %c0_41, %c0_42] : memref<8x8x128xf32, #tpu.memory_space<vmem>>, vector<1x8x128xf32>
    %135 = vector.shape_cast %134 : vector<1x8x128xf32> to vector<8x128xf32>
    %136 = vector.shape_cast %132 : vector<8x128xf32> to vector<1x8x128xf32>
    tpu.vector_store %arg12[%133, %c0_41, %c0_42], %136 {strides = array<i32>} : memref<8x8x128xf32, #tpu.memory_space<vmem>>, vector<1x8x128xf32>,
    %c5_i32 = arith.constant 5 : i32
    %137 = arith.index_cast %c5_i32 : i32 to index
    %c0_43 = arith.constant 0 : index
    %c0_44 = arith.constant 0 : index
    %138 = vector.load %arg13[%137, %c0_43, %c0_44] : memref<8x8x512xf32, #tpu.memory_space<vmem>>, vector<1x8x512xf32>
    %139 = vector.shape_cast %138 : vector<1x8x512xf32> to vector<8x512xf32>
    %cst_45 = arith.constant dense<0.000000e+00> : vector<8x512xf32>
    %140 = tpu.matmul %132, %9, %cst_45 {dimension_numbers = #tpu.dot_dimension_numbers<[1], [0], [0], [1], [0, 0, 1, 1], [], []>} : vector<8x128xf32>, vector<128x512xf32>, vector<8x512xf32> -> vector<8x512xf32>
    %141 = arith.addf %139, %140 : vector<8x512xf32>
    %142 = vector.extract_strided_slice %141 {offsets = [0, 0], sizes = [8, 384], strides = [1, 1]} : vector<8x512xf32> to vector<8x384xf32>
    %143 = arith.negf %142 : vector<8x384xf32>
    %144 = math.exp %143 : vector<8x384xf32>
    %cst_46 = arith.constant 1.000000e+00 : f32
    %145 = vector.broadcast %cst_46 : f32 to vector<8x384xf32>
    %146 = arith.addf %145, %144 : vector<8x384xf32>
    %147 = arith.divf %145, %146 : vector<8x384xf32>
    %148 = vector.extract_strided_slice %147 {offsets = [0, 0], sizes = [8, 128], strides = [1, 1]} : vector<8x384xf32> to vector<8x128xf32>
    %149 = vector.extract_strided_slice %147 {offsets = [0, 128], sizes = [8, 128], strides = [1, 1]} : vector<8x384xf32> to vector<8x128xf32>
    %150 = vector.extract_strided_slice %147 {offsets = [0, 256], sizes = [8, 128], strides = [1, 1]} : vector<8x384xf32> to vector<8x128xf32>
    %151 = vector.extract_strided_slice %141 {offsets = [0, 384], sizes = [8, 128], strides = [1, 1]} : vector<8x512xf32> to vector<8x128xf32>
    %152 = math.tanh %151 : vector<8x128xf32>
    %153 = arith.mulf %149, %130 : vector<8x128xf32>
    %154 = arith.mulf %148, %152 : vector<8x128xf32>
    %155 = arith.addf %153, %154 : vector<8x128xf32>
    %156 = math.tanh %155 : vector<8x128xf32>
    %157 = arith.mulf %150, %156 : vector<8x128xf32>
    %158 = arith.index_cast %c5_i32 : i32 to index
    %c0_47 = arith.constant 0 : index
    %c0_48 = arith.constant 0 : index
    %159 = vector.load %arg12[%158, %c0_47, %c0_48] : memref<8x8x128xf32, #tpu.memory_space<vmem>>, vector<1x8x128xf32>
    %160 = vector.shape_cast %159 : vector<1x8x128xf32> to vector<8x128xf32>
    %161 = vector.shape_cast %157 : vector<8x128xf32> to vector<1x8x128xf32>
    tpu.vector_store %arg12[%158, %c0_47, %c0_48], %161 {strides = array<i32>} : memref<8x8x128xf32, #tpu.memory_space<vmem>>, vector<1x8x128xf32>,
    %c6_i32 = arith.constant 6 : i32
    %162 = arith.index_cast %c6_i32 : i32 to index
    %c0_49 = arith.constant 0 : index
    %c0_50 = arith.constant 0 : index
    %163 = vector.load %arg13[%162, %c0_49, %c0_50] : memref<8x8x512xf32, #tpu.memory_space<vmem>>, vector<1x8x512xf32>
    %164 = vector.shape_cast %163 : vector<1x8x512xf32> to vector<8x512xf32>
    %cst_51 = arith.constant dense<0.000000e+00> : vector<8x512xf32>
    %165 = tpu.matmul %157, %9, %cst_51 {dimension_numbers = #tpu.dot_dimension_numbers<[1], [0], [0], [1], [0, 0, 1, 1], [], []>} : vector<8x128xf32>, vector<128x512xf32>, vector<8x512xf32> -> vector<8x512xf32>
    %166 = arith.addf %164, %165 : vector<8x512xf32>
    %167 = vector.extract_strided_slice %166 {offsets = [0, 0], sizes = [8, 384], strides = [1, 1]} : vector<8x512xf32> to vector<8x384xf32>
    %168 = arith.negf %167 : vector<8x384xf32>
    %169 = math.exp %168 : vector<8x384xf32>
    %cst_52 = arith.constant 1.000000e+00 : f32
    %170 = vector.broadcast %cst_52 : f32 to vector<8x384xf32>
    %171 = arith.addf %170, %169 : vector<8x384xf32>
    %172 = arith.divf %170, %171 : vector<8x384xf32>
    %173 = vector.extract_strided_slice %172 {offsets = [0, 0], sizes = [8, 128], strides = [1, 1]} : vector<8x384xf32> to vector<8x128xf32>
    %174 = vector.extract_strided_slice %172 {offsets = [0, 128], sizes = [8, 128], strides = [1, 1]} : vector<8x384xf32> to vector<8x128xf32>
    %175 = vector.extract_strided_slice %172 {offsets = [0, 256], sizes = [8, 128], strides = [1, 1]} : vector<8x384xf32> to vector<8x128xf32>
    %176 = vector.extract_strided_slice %166 {offsets = [0, 384], sizes = [8, 128], strides = [1, 1]} : vector<8x512xf32> to vector<8x128xf32>
    %177 = math.tanh %176 : vector<8x128xf32>
    %178 = arith.mulf %174, %155 : vector<8x128xf32>
    %179 = arith.mulf %173, %177 : vector<8x128xf32>
    %180 = arith.addf %178, %179 : vector<8x128xf32>
    %181 = math.tanh %180 : vector<8x128xf32>
    %182 = arith.mulf %175, %181 : vector<8x128xf32>
    %183 = arith.index_cast %c6_i32 : i32 to index
    %c0_53 = arith.constant 0 : index
    %c0_54 = arith.constant 0 : index
    %184 = vector.load %arg12[%183, %c0_53, %c0_54] : memref<8x8x128xf32, #tpu.memory_space<vmem>>, vector<1x8x128xf32>
    %185 = vector.shape_cast %184 : vector<1x8x128xf32> to vector<8x128xf32>
    %186 = vector.shape_cast %182 : vector<8x128xf32> to vector<1x8x128xf32>
    tpu.vector_store %arg12[%183, %c0_53, %c0_54], %186 {strides = array<i32>} : memref<8x8x128xf32, #tpu.memory_space<vmem>>, vector<1x8x128xf32>,
    %c7_i32 = arith.constant 7 : i32
    %187 = arith.index_cast %c7_i32 : i32 to index
    %c0_55 = arith.constant 0 : index
    %c0_56 = arith.constant 0 : index
    %188 = vector.load %arg13[%187, %c0_55, %c0_56] : memref<8x8x512xf32, #tpu.memory_space<vmem>>, vector<1x8x512xf32>
    %189 = vector.shape_cast %188 : vector<1x8x512xf32> to vector<8x512xf32>
    %cst_57 = arith.constant dense<0.000000e+00> : vector<8x512xf32>
    %190 = tpu.matmul %182, %9, %cst_57 {dimension_numbers = #tpu.dot_dimension_numbers<[1], [0], [0], [1], [0, 0, 1, 1], [], []>} : vector<8x128xf32>, vector<128x512xf32>, vector<8x512xf32> -> vector<8x512xf32>
    %191 = arith.addf %189, %190 : vector<8x512xf32>
    %192 = vector.extract_strided_slice %191 {offsets = [0, 0], sizes = [8, 384], strides = [1, 1]} : vector<8x512xf32> to vector<8x384xf32>
    %193 = arith.negf %192 : vector<8x384xf32>
    %194 = math.exp %193 : vector<8x384xf32>
    %cst_58 = arith.constant 1.000000e+00 : f32
    %195 = vector.broadcast %cst_58 : f32 to vector<8x384xf32>
    %196 = arith.addf %195, %194 : vector<8x384xf32>
    %197 = arith.divf %195, %196 : vector<8x384xf32>
    %198 = vector.extract_strided_slice %197 {offsets = [0, 0], sizes = [8, 128], strides = [1, 1]} : vector<8x384xf32> to vector<8x128xf32>
    %199 = vector.extract_strided_slice %197 {offsets = [0, 128], sizes = [8, 128], strides = [1, 1]} : vector<8x384xf32> to vector<8x128xf32>
    %200 = vector.extract_strided_slice %197 {offsets = [0, 256], sizes = [8, 128], strides = [1, 1]} : vector<8x384xf32> to vector<8x128xf32>
    %201 = vector.extract_strided_slice %191 {offsets = [0, 384], sizes = [8, 128], strides = [1, 1]} : vector<8x512xf32> to vector<8x128xf32>
    %202 = math.tanh %201 : vector<8x128xf32>
    %203 = arith.mulf %199, %180 : vector<8x128xf32>
    %204 = arith.mulf %198, %202 : vector<8x128xf32>
    %205 = arith.addf %203, %204 : vector<8x128xf32>
    %206 = math.tanh %205 : vector<8x128xf32>
    %207 = arith.mulf %200, %206 : vector<8x128xf32>
    %208 = arith.index_cast %c7_i32 : i32 to index
    %c0_59 = arith.constant 0 : index
    %c0_60 = arith.constant 0 : index
    %209 = vector.load %arg12[%208, %c0_59, %c0_60] : memref<8x8x128xf32, #tpu.memory_space<vmem>>, vector<1x8x128xf32>
    %210 = vector.shape_cast %209 : vector<1x8x128xf32> to vector<8x128xf32>
    %211 = vector.shape_cast %207 : vector<8x128xf32> to vector<1x8x128xf32>
    tpu.vector_store %arg12[%208, %c0_59, %c0_60], %211 {strides = array<i32>} : memref<8x8x128xf32, #tpu.memory_space<vmem>>, vector<1x8x128xf32>,
    %c8_i32 = arith.constant 8 : i32
    %c0_61 = arith.constant 0 : index
    %c0_62 = arith.constant 0 : index
    %c0_63 = arith.constant 0 : index
    %212 = vector.load %arg12[%c0_61, %c0_62, %c0_63] : memref<8x8x128xf32, #tpu.memory_space<vmem>>, vector<8x8x128xf32>
    %213 = vector.shape_cast %212 : vector<8x8x128xf32> to vector<64x128xf32>
    %c0_64 = arith.constant 0 : index
    %c0_65 = arith.constant 0 : index
    %214 = vector.load %arg4[%c0_64, %c0_65] : memref<128x512xf32, #tpu.memory_space<vmem>>, vector<128x512xf32>
    %cst_66 = arith.constant dense<0.000000e+00> : vector<64x512xf32>
    %215 = tpu.matmul %213, %214, %cst_66 {dimension_numbers = #tpu.dot_dimension_numbers<[1], [0], [0], [1], [0, 0, 1, 1], [], []>} : vector<64x128xf32>, vector<128x512xf32>, vector<64x512xf32> -> vector<64x512xf32>
    %c0_67 = arith.constant 0 : index
    %c0_68 = arith.constant 0 : index
    %216 = vector.load %arg6[%c0_67, %c0_68] : memref<1x512xf32, #tpu.memory_space<vmem>>, vector<1x512xf32>
    %217 = vector.broadcast %216 : vector<1x512xf32> to vector<64x512xf32>
    %218 = arith.addf %215, %217 : vector<64x512xf32>
    %219 = vector.shape_cast %218 : vector<64x512xf32> to vector<8x8x512xf32>
    %c0_69 = arith.constant 0 : index
    %c0_70 = arith.constant 0 : index
    %c0_71 = arith.constant 0 : index
    %220 = vector.load %arg13[%c0_69, %c0_70, %c0_71] : memref<8x8x512xf32, #tpu.memory_space<vmem>>, vector<8x8x512xf32>
    tpu.vector_store %arg13[%c0_69, %c0_70, %c0_71], %219 {strides = array<i32>} : memref<8x8x512xf32, #tpu.memory_space<vmem>>, vector<8x8x512xf32>,
    %c0_72 = arith.constant 0 : index
    %c0_73 = arith.constant 0 : index
    %221 = vector.load %arg5[%c0_72, %c0_73] : memref<128x512xf32, #tpu.memory_space<vmem>>, vector<128x512xf32>
    %cst_74 = arith.constant 0.000000e+00 : f32
    %222 = vector.broadcast %cst_74 : f32 to vector<8x128xf32>
    %cst_75 = arith.constant 0.000000e+00 : f32
    %223 = vector.broadcast %cst_75 : f32 to vector<8x128xf32>
    %c0_i32_76 = arith.constant 0 : i32
    %224 = arith.index_cast %c0_i32_76 : i32 to index
    %c0_77 = arith.constant 0 : index
    %c0_78 = arith.constant 0 : index
    %225 = vector.load %arg13[%224, %c0_77, %c0_78] : memref<8x8x512xf32, #tpu.memory_space<vmem>>, vector<1x8x512xf32>
    %226 = vector.shape_cast %225 : vector<1x8x512xf32> to vector<8x512xf32>
    %cst_79 = arith.constant dense<0.000000e+00> : vector<8x512xf32>
    %227 = tpu.matmul %222, %221, %cst_79 {dimension_numbers = #tpu.dot_dimension_numbers<[1], [0], [0], [1], [0, 0, 1, 1], [], []>} : vector<8x128xf32>, vector<128x512xf32>, vector<8x512xf32> -> vector<8x512xf32>
    %228 = arith.addf %226, %227 : vector<8x512xf32>
    %229 = vector.extract_strided_slice %228 {offsets = [0, 0], sizes = [8, 384], strides = [1, 1]} : vector<8x512xf32> to vector<8x384xf32>
    %230 = arith.negf %229 : vector<8x384xf32>
    %231 = math.exp %230 : vector<8x384xf32>
    %cst_80 = arith.constant 1.000000e+00 : f32
    %232 = vector.broadcast %cst_80 : f32 to vector<8x384xf32>
    %233 = arith.addf %232, %231 : vector<8x384xf32>
    %234 = arith.divf %232, %233 : vector<8x384xf32>
    %235 = vector.extract_strided_slice %234 {offsets = [0, 0], sizes = [8, 128], strides = [1, 1]} : vector<8x384xf32> to vector<8x128xf32>
    %236 = vector.extract_strided_slice %234 {offsets = [0, 128], sizes = [8, 128], strides = [1, 1]} : vector<8x384xf32> to vector<8x128xf32>
    %237 = vector.extract_strided_slice %234 {offsets = [0, 256], sizes = [8, 128], strides = [1, 1]} : vector<8x384xf32> to vector<8x128xf32>
    %238 = vector.extract_strided_slice %228 {offsets = [0, 384], sizes = [8, 128], strides = [1, 1]} : vector<8x512xf32> to vector<8x128xf32>
    %239 = math.tanh %238 : vector<8x128xf32>
    %240 = arith.mulf %236, %223 : vector<8x128xf32>
    %241 = arith.mulf %235, %239 : vector<8x128xf32>
    %242 = arith.addf %240, %241 : vector<8x128xf32>
    %243 = math.tanh %242 : vector<8x128xf32>
    %244 = arith.mulf %237, %243 : vector<8x128xf32>
    %c1_i32_81 = arith.constant 1 : i32
    %245 = arith.index_cast %c1_i32_81 : i32 to index
    %c0_82 = arith.constant 0 : index
    %c0_83 = arith.constant 0 : index
    %246 = vector.load %arg13[%245, %c0_82, %c0_83] : memref<8x8x512xf32, #tpu.memory_space<vmem>>, vector<1x8x512xf32>
    %247 = vector.shape_cast %246 : vector<1x8x512xf32> to vector<8x512xf32>
    %cst_84 = arith.constant dense<0.000000e+00> : vector<8x512xf32>
    %248 = tpu.matmul %244, %221, %cst_84 {dimension_numbers = #tpu.dot_dimension_numbers<[1], [0], [0], [1], [0, 0, 1, 1], [], []>} : vector<8x128xf32>, vector<128x512xf32>, vector<8x512xf32> -> vector<8x512xf32>
    %249 = arith.addf %247, %248 : vector<8x512xf32>
    %250 = vector.extract_strided_slice %249 {offsets = [0, 0], sizes = [8, 384], strides = [1, 1]} : vector<8x512xf32> to vector<8x384xf32>
    %251 = arith.negf %250 : vector<8x384xf32>
    %252 = math.exp %251 : vector<8x384xf32>
    %cst_85 = arith.constant 1.000000e+00 : f32
    %253 = vector.broadcast %cst_85 : f32 to vector<8x384xf32>
    %254 = arith.addf %253, %252 : vector<8x384xf32>
    %255 = arith.divf %253, %254 : vector<8x384xf32>
    %256 = vector.extract_strided_slice %255 {offsets = [0, 0], sizes = [8, 128], strides = [1, 1]} : vector<8x384xf32> to vector<8x128xf32>
    %257 = vector.extract_strided_slice %255 {offsets = [0, 128], sizes = [8, 128], strides = [1, 1]} : vector<8x384xf32> to vector<8x128xf32>
    %258 = vector.extract_strided_slice %255 {offsets = [0, 256], sizes = [8, 128], strides = [1, 1]} : vector<8x384xf32> to vector<8x128xf32>
    %259 = vector.extract_strided_slice %249 {offsets = [0, 384], sizes = [8, 128], strides = [1, 1]} : vector<8x512xf32> to vector<8x128xf32>
    %260 = math.tanh %259 : vector<8x128xf32>
    %261 = arith.mulf %257, %242 : vector<8x128xf32>
    %262 = arith.mulf %256, %260 : vector<8x128xf32>
    %263 = arith.addf %261, %262 : vector<8x128xf32>
    %264 = math.tanh %263 : vector<8x128xf32>
    %265 = arith.mulf %258, %264 : vector<8x128xf32>
    %c2_i32_86 = arith.constant 2 : i32
    %266 = arith.index_cast %c2_i32_86 : i32 to index
    %c0_87 = arith.constant 0 : index
    %c0_88 = arith.constant 0 : index
    %267 = vector.load %arg13[%266, %c0_87, %c0_88] : memref<8x8x512xf32, #tpu.memory_space<vmem>>, vector<1x8x512xf32>
    %268 = vector.shape_cast %267 : vector<1x8x512xf32> to vector<8x512xf32>
    %cst_89 = arith.constant dense<0.000000e+00> : vector<8x512xf32>
    %269 = tpu.matmul %265, %221, %cst_89 {dimension_numbers = #tpu.dot_dimension_numbers<[1], [0], [0], [1], [0, 0, 1, 1], [], []>} : vector<8x128xf32>, vector<128x512xf32>, vector<8x512xf32> -> vector<8x512xf32>
    %270 = arith.addf %268, %269 : vector<8x512xf32>
    %271 = vector.extract_strided_slice %270 {offsets = [0, 0], sizes = [8, 384], strides = [1, 1]} : vector<8x512xf32> to vector<8x384xf32>
    %272 = arith.negf %271 : vector<8x384xf32>
    %273 = math.exp %272 : vector<8x384xf32>
    %cst_90 = arith.constant 1.000000e+00 : f32
    %274 = vector.broadcast %cst_90 : f32 to vector<8x384xf32>
    %275 = arith.addf %274, %273 : vector<8x384xf32>
    %276 = arith.divf %274, %275 : vector<8x384xf32>
    %277 = vector.extract_strided_slice %276 {offsets = [0, 0], sizes = [8, 128], strides = [1, 1]} : vector<8x384xf32> to vector<8x128xf32>
    %278 = vector.extract_strided_slice %276 {offsets = [0, 128], sizes = [8, 128], strides = [1, 1]} : vector<8x384xf32> to vector<8x128xf32>
    %279 = vector.extract_strided_slice %276 {offsets = [0, 256], sizes = [8, 128], strides = [1, 1]} : vector<8x384xf32> to vector<8x128xf32>
    %280 = vector.extract_strided_slice %270 {offsets = [0, 384], sizes = [8, 128], strides = [1, 1]} : vector<8x512xf32> to vector<8x128xf32>
    %281 = math.tanh %280 : vector<8x128xf32>
    %282 = arith.mulf %278, %263 : vector<8x128xf32>
    %283 = arith.mulf %277, %281 : vector<8x128xf32>
    %284 = arith.addf %282, %283 : vector<8x128xf32>
    %285 = math.tanh %284 : vector<8x128xf32>
    %286 = arith.mulf %279, %285 : vector<8x128xf32>
    %c3_i32_91 = arith.constant 3 : i32
    %287 = arith.index_cast %c3_i32_91 : i32 to index
    %c0_92 = arith.constant 0 : index
    %c0_93 = arith.constant 0 : index
    %288 = vector.load %arg13[%287, %c0_92, %c0_93] : memref<8x8x512xf32, #tpu.memory_space<vmem>>, vector<1x8x512xf32>
    %289 = vector.shape_cast %288 : vector<1x8x512xf32> to vector<8x512xf32>
    %cst_94 = arith.constant dense<0.000000e+00> : vector<8x512xf32>
    %290 = tpu.matmul %286, %221, %cst_94 {dimension_numbers = #tpu.dot_dimension_numbers<[1], [0], [0], [1], [0, 0, 1, 1], [], []>} : vector<8x128xf32>, vector<128x512xf32>, vector<8x512xf32> -> vector<8x512xf32>
    %291 = arith.addf %289, %290 : vector<8x512xf32>
    %292 = vector.extract_strided_slice %291 {offsets = [0, 0], sizes = [8, 384], strides = [1, 1]} : vector<8x512xf32> to vector<8x384xf32>
    %293 = arith.negf %292 : vector<8x384xf32>
    %294 = math.exp %293 : vector<8x384xf32>
    %cst_95 = arith.constant 1.000000e+00 : f32
    %295 = vector.broadcast %cst_95 : f32 to vector<8x384xf32>
    %296 = arith.addf %295, %294 : vector<8x384xf32>
    %297 = arith.divf %295, %296 : vector<8x384xf32>
    %298 = vector.extract_strided_slice %297 {offsets = [0, 0], sizes = [8, 128], strides = [1, 1]} : vector<8x384xf32> to vector<8x128xf32>
    %299 = vector.extract_strided_slice %297 {offsets = [0, 128], sizes = [8, 128], strides = [1, 1]} : vector<8x384xf32> to vector<8x128xf32>
    %300 = vector.extract_strided_slice %297 {offsets = [0, 256], sizes = [8, 128], strides = [1, 1]} : vector<8x384xf32> to vector<8x128xf32>
    %301 = vector.extract_strided_slice %291 {offsets = [0, 384], sizes = [8, 128], strides = [1, 1]} : vector<8x512xf32> to vector<8x128xf32>
    %302 = math.tanh %301 : vector<8x128xf32>
    %303 = arith.mulf %299, %284 : vector<8x128xf32>
    %304 = arith.mulf %298, %302 : vector<8x128xf32>
    %305 = arith.addf %303, %304 : vector<8x128xf32>
    %306 = math.tanh %305 : vector<8x128xf32>
    %307 = arith.mulf %300, %306 : vector<8x128xf32>
    %c4_i32_96 = arith.constant 4 : i32
    %308 = arith.index_cast %c4_i32_96 : i32 to index
    %c0_97 = arith.constant 0 : index
    %c0_98 = arith.constant 0 : index
    %309 = vector.load %arg13[%308, %c0_97, %c0_98] : memref<8x8x512xf32, #tpu.memory_space<vmem>>, vector<1x8x512xf32>
    %310 = vector.shape_cast %309 : vector<1x8x512xf32> to vector<8x512xf32>
    %cst_99 = arith.constant dense<0.000000e+00> : vector<8x512xf32>
    %311 = tpu.matmul %307, %221, %cst_99 {dimension_numbers = #tpu.dot_dimension_numbers<[1], [0], [0], [1], [0, 0, 1, 1], [], []>} : vector<8x128xf32>, vector<128x512xf32>, vector<8x512xf32> -> vector<8x512xf32>
    %312 = arith.addf %310, %311 : vector<8x512xf32>
    %313 = vector.extract_strided_slice %312 {offsets = [0, 0], sizes = [8, 384], strides = [1, 1]} : vector<8x512xf32> to vector<8x384xf32>
    %314 = arith.negf %313 : vector<8x384xf32>
    %315 = math.exp %314 : vector<8x384xf32>
    %cst_100 = arith.constant 1.000000e+00 : f32
    %316 = vector.broadcast %cst_100 : f32 to vector<8x384xf32>
    %317 = arith.addf %316, %315 : vector<8x384xf32>
    %318 = arith.divf %316, %317 : vector<8x384xf32>
    %319 = vector.extract_strided_slice %318 {offsets = [0, 0], sizes = [8, 128], strides = [1, 1]} : vector<8x384xf32> to vector<8x128xf32>
    %320 = vector.extract_strided_slice %318 {offsets = [0, 128], sizes = [8, 128], strides = [1, 1]} : vector<8x384xf32> to vector<8x128xf32>
    %321 = vector.extract_strided_slice %318 {offsets = [0, 256], sizes = [8, 128], strides = [1, 1]} : vector<8x384xf32> to vector<8x128xf32>
    %322 = vector.extract_strided_slice %312 {offsets = [0, 384], sizes = [8, 128], strides = [1, 1]} : vector<8x512xf32> to vector<8x128xf32>
    %323 = math.tanh %322 : vector<8x128xf32>
    %324 = arith.mulf %320, %305 : vector<8x128xf32>
    %325 = arith.mulf %319, %323 : vector<8x128xf32>
    %326 = arith.addf %324, %325 : vector<8x128xf32>
    %327 = math.tanh %326 : vector<8x128xf32>
    %328 = arith.mulf %321, %327 : vector<8x128xf32>
    %c5_i32_101 = arith.constant 5 : i32
    %329 = arith.index_cast %c5_i32_101 : i32 to index
    %c0_102 = arith.constant 0 : index
    %c0_103 = arith.constant 0 : index
    %330 = vector.load %arg13[%329, %c0_102, %c0_103] : memref<8x8x512xf32, #tpu.memory_space<vmem>>, vector<1x8x512xf32>
    %331 = vector.shape_cast %330 : vector<1x8x512xf32> to vector<8x512xf32>
    %cst_104 = arith.constant dense<0.000000e+00> : vector<8x512xf32>
    %332 = tpu.matmul %328, %221, %cst_104 {dimension_numbers = #tpu.dot_dimension_numbers<[1], [0], [0], [1], [0, 0, 1, 1], [], []>} : vector<8x128xf32>, vector<128x512xf32>, vector<8x512xf32> -> vector<8x512xf32>
    %333 = arith.addf %331, %332 : vector<8x512xf32>
    %334 = vector.extract_strided_slice %333 {offsets = [0, 0], sizes = [8, 384], strides = [1, 1]} : vector<8x512xf32> to vector<8x384xf32>
    %335 = arith.negf %334 : vector<8x384xf32>
    %336 = math.exp %335 : vector<8x384xf32>
    %cst_105 = arith.constant 1.000000e+00 : f32
    %337 = vector.broadcast %cst_105 : f32 to vector<8x384xf32>
    %338 = arith.addf %337, %336 : vector<8x384xf32>
    %339 = arith.divf %337, %338 : vector<8x384xf32>
    %340 = vector.extract_strided_slice %339 {offsets = [0, 0], sizes = [8, 128], strides = [1, 1]} : vector<8x384xf32> to vector<8x128xf32>
    %341 = vector.extract_strided_slice %339 {offsets = [0, 128], sizes = [8, 128], strides = [1, 1]} : vector<8x384xf32> to vector<8x128xf32>
    %342 = vector.extract_strided_slice %339 {offsets = [0, 256], sizes = [8, 128], strides = [1, 1]} : vector<8x384xf32> to vector<8x128xf32>
    %343 = vector.extract_strided_slice %333 {offsets = [0, 384], sizes = [8, 128], strides = [1, 1]} : vector<8x512xf32> to vector<8x128xf32>
    %344 = math.tanh %343 : vector<8x128xf32>
    %345 = arith.mulf %341, %326 : vector<8x128xf32>
    %346 = arith.mulf %340, %344 : vector<8x128xf32>
    %347 = arith.addf %345, %346 : vector<8x128xf32>
    %348 = math.tanh %347 : vector<8x128xf32>
    %349 = arith.mulf %342, %348 : vector<8x128xf32>
    %c6_i32_106 = arith.constant 6 : i32
    %350 = arith.index_cast %c6_i32_106 : i32 to index
    %c0_107 = arith.constant 0 : index
    %c0_108 = arith.constant 0 : index
    %351 = vector.load %arg13[%350, %c0_107, %c0_108] : memref<8x8x512xf32, #tpu.memory_space<vmem>>, vector<1x8x512xf32>
    %352 = vector.shape_cast %351 : vector<1x8x512xf32> to vector<8x512xf32>
    %cst_109 = arith.constant dense<0.000000e+00> : vector<8x512xf32>
    %353 = tpu.matmul %349, %221, %cst_109 {dimension_numbers = #tpu.dot_dimension_numbers<[1], [0], [0], [1], [0, 0, 1, 1], [], []>} : vector<8x128xf32>, vector<128x512xf32>, vector<8x512xf32> -> vector<8x512xf32>
    %354 = arith.addf %352, %353 : vector<8x512xf32>
    %355 = vector.extract_strided_slice %354 {offsets = [0, 0], sizes = [8, 384], strides = [1, 1]} : vector<8x512xf32> to vector<8x384xf32>
    %356 = arith.negf %355 : vector<8x384xf32>
    %357 = math.exp %356 : vector<8x384xf32>
    %cst_110 = arith.constant 1.000000e+00 : f32
    %358 = vector.broadcast %cst_110 : f32 to vector<8x384xf32>
    %359 = arith.addf %358, %357 : vector<8x384xf32>
    %360 = arith.divf %358, %359 : vector<8x384xf32>
    %361 = vector.extract_strided_slice %360 {offsets = [0, 0], sizes = [8, 128], strides = [1, 1]} : vector<8x384xf32> to vector<8x128xf32>
    %362 = vector.extract_strided_slice %360 {offsets = [0, 128], sizes = [8, 128], strides = [1, 1]} : vector<8x384xf32> to vector<8x128xf32>
    %363 = vector.extract_strided_slice %360 {offsets = [0, 256], sizes = [8, 128], strides = [1, 1]} : vector<8x384xf32> to vector<8x128xf32>
    %364 = vector.extract_strided_slice %354 {offsets = [0, 384], sizes = [8, 128], strides = [1, 1]} : vector<8x512xf32> to vector<8x128xf32>
    %365 = math.tanh %364 : vector<8x128xf32>
    %366 = arith.mulf %362, %347 : vector<8x128xf32>
    %367 = arith.mulf %361, %365 : vector<8x128xf32>
    %368 = arith.addf %366, %367 : vector<8x128xf32>
    %369 = math.tanh %368 : vector<8x128xf32>
    %370 = arith.mulf %363, %369 : vector<8x128xf32>
    %c7_i32_111 = arith.constant 7 : i32
    %371 = arith.index_cast %c7_i32_111 : i32 to index
    %c0_112 = arith.constant 0 : index
    %c0_113 = arith.constant 0 : index
    %372 = vector.load %arg13[%371, %c0_112, %c0_113] : memref<8x8x512xf32, #tpu.memory_space<vmem>>, vector<1x8x512xf32>
    %373 = vector.shape_cast %372 : vector<1x8x512xf32> to vector<8x512xf32>
    %cst_114 = arith.constant dense<0.000000e+00> : vector<8x512xf32>
    %374 = tpu.matmul %370, %221, %cst_114 {dimension_numbers = #tpu.dot_dimension_numbers<[1], [0], [0], [1], [0, 0, 1, 1], [], []>} : vector<8x128xf32>, vector<128x512xf32>, vector<8x512xf32> -> vector<8x512xf32>
    %375 = arith.addf %373, %374 : vector<8x512xf32>
    %376 = vector.extract_strided_slice %375 {offsets = [0, 0], sizes = [8, 384], strides = [1, 1]} : vector<8x512xf32> to vector<8x384xf32>
    %377 = arith.negf %376 : vector<8x384xf32>
    %378 = math.exp %377 : vector<8x384xf32>
    %cst_115 = arith.constant 1.000000e+00 : f32
    %379 = vector.broadcast %cst_115 : f32 to vector<8x384xf32>
    %380 = arith.addf %379, %378 : vector<8x384xf32>
    %381 = arith.divf %379, %380 : vector<8x384xf32>
    %382 = vector.extract_strided_slice %381 {offsets = [0, 0], sizes = [8, 128], strides = [1, 1]} : vector<8x384xf32> to vector<8x128xf32>
    %383 = vector.extract_strided_slice %381 {offsets = [0, 128], sizes = [8, 128], strides = [1, 1]} : vector<8x384xf32> to vector<8x128xf32>
    %384 = vector.extract_strided_slice %381 {offsets = [0, 256], sizes = [8, 128], strides = [1, 1]} : vector<8x384xf32> to vector<8x128xf32>
    %385 = vector.extract_strided_slice %375 {offsets = [0, 384], sizes = [8, 128], strides = [1, 1]} : vector<8x512xf32> to vector<8x128xf32>
    %386 = math.tanh %385 : vector<8x128xf32>
    %387 = arith.mulf %383, %368 : vector<8x128xf32>
    %388 = arith.mulf %382, %386 : vector<8x128xf32>
    %389 = arith.addf %387, %388 : vector<8x128xf32>
    %390 = math.tanh %389 : vector<8x128xf32>
    %391 = arith.mulf %384, %390 : vector<8x128xf32>
    %c8_i32_116 = arith.constant 8 : i32
    %392 = tpu.iota {dimensions = array<i32: 0>} : vector<8x128xi32>
    %c4_i32_117 = arith.constant 4 : i32
    %393 = vector.broadcast %c4_i32_117 : i32 to vector<8x128xi32>
    %394 = arith.cmpi slt, %392, %393 : vector<8x128xi32>
    %cst_118 = arith.constant 0.000000e+00 : f32
    %395 = vector.broadcast %cst_118 : f32 to vector<8x128xf32>
    %396 = arith.select %394, %391, %395 : vector<8x128xi1>, vector<8x128xf32>
    %cst_119 = arith.constant dense<0.000000e+00> : vector<128xf32>
    %397 = vector.multi_reduction <add>, %396, %cst_119 [0] : vector<8x128xf32> to vector<128xf32>
    %398 = vector.shape_cast %397 : vector<128xf32> to vector<1x128xf32>
    %cst_120 = arith.constant 2.500000e-01 : f32
    %399 = vector.broadcast %cst_120 : f32 to vector<1x128xf32>
    %400 = arith.mulf %398, %399 : vector<1x128xf32>
    %401 = vector.broadcast %400 : vector<1x128xf32> to vector<8x128xf32>
    %402 = arith.subf %391, %401 : vector<8x128xf32>
    %cst_121 = arith.constant 0.000000e+00 : f32
    %403 = vector.broadcast %cst_121 : f32 to vector<8x128xf32>
    %404 = arith.select %394, %402, %403 : vector<8x128xi1>, vector<8x128xf32>
    %405 = arith.mulf %404, %404 : vector<8x128xf32>
    %cst_122 = arith.constant dense<0.000000e+00> : vector<128xf32>
    %406 = vector.multi_reduction <add>, %405, %cst_122 [0] : vector<8x128xf32> to vector<128xf32>
    %407 = vector.shape_cast %406 : vector<128xf32> to vector<1x128xf32>
    %cst_123 = arith.constant 2.500000e-01 : f32
    %408 = vector.broadcast %cst_123 : f32 to vector<1x128xf32>
    %409 = arith.mulf %407, %408 : vector<1x128xf32>
    %410 = vector.broadcast %400 : vector<1x128xf32> to vector<8x128xf32>
    %411 = arith.subf %391, %410 : vector<8x128xf32>
    %cst_124 = arith.constant 9.99999974E-6 : f32
    %412 = vector.broadcast %cst_124 : f32 to vector<1x128xf32>
    %413 = arith.addf %409, %412 : vector<1x128xf32>
    %414 = math.rsqrt %413 : vector<1x128xf32>
    %415 = vector.broadcast %414 : vector<1x128xf32> to vector<8x128xf32>
    %416 = arith.mulf %411, %415 : vector<8x128xf32>
    %c0_125 = arith.constant 0 : index
    %c0_126 = arith.constant 0 : index
    %417 = vector.load %arg7[%c0_125, %c0_126] : memref<1x128xf32, #tpu.memory_space<vmem>>, vector<1x128xf32>
    %418 = vector.broadcast %417 : vector<1x128xf32> to vector<8x128xf32>
    %419 = arith.mulf %416, %418 : vector<8x128xf32>
    %c0_127 = arith.constant 0 : index
    %c0_128 = arith.constant 0 : index
    %420 = vector.load %arg8[%c0_127, %c0_128] : memref<1x128xf32, #tpu.memory_space<vmem>>, vector<1x128xf32>
    %421 = vector.broadcast %420 : vector<1x128xf32> to vector<8x128xf32>
    %422 = arith.addf %419, %421 : vector<8x128xf32>
    %c0_129 = arith.constant 0 : index
    %c0_130 = arith.constant 0 : index
    %423 = vector.load %arg9[%c0_129, %c0_130] : memref<128x128xf32, #tpu.memory_space<vmem>>, vector<128x128xf32>
    %cst_131 = arith.constant dense<0.000000e+00> : vector<8x128xf32>
    %424 = tpu.matmul %422, %423, %cst_131 {dimension_numbers = #tpu.dot_dimension_numbers<[1], [0], [0], [1], [0, 0, 1, 1], [], []>} : vector<8x128xf32>, vector<128x128xf32>, vector<8x128xf32> -> vector<8x128xf32>
    %c0_132 = arith.constant 0 : index
    %c0_133 = arith.constant 0 : index
    %425 = vector.load %arg10[%c0_132, %c0_133] : memref<1x128xf32, #tpu.memory_space<vmem>>, vector<1x128xf32>
    %426 = vector.broadcast %425 : vector<1x128xf32> to vector<8x128xf32>
    %427 = arith.addf %424, %426 : vector<8x128xf32>
    %c0_134 = arith.constant 0 : index
    %c0_135 = arith.constant 0 : index
    %428 = vector.load %arg11[%c0_134, %c0_135] : memref<8x128xf32, #tpu.memory_space<vmem>>, vector<8x128xf32>
    tpu.vector_store %arg11[%c0_134, %c0_135], %427 {strides = array<i32>} : memref<8x128xf32, #tpu.memory_space<vmem>>, vector<8x128xf32>,
    return
  }
}

</mosaic_0001>

<bundles_post_ra>
// kernel: tpu_custom_call.1
= control target key start
LH: loop header
LB: loop body
LE: loop exit
PB: predicated region body
PF: predicated region fallthrough
CT: control target
= control target key end

     0   :  { %16 = vsyncpa [#allocation5], 0  ;;  %s6855_s0 = inlined_call_operand.hbm [shape: f32[8,8,128], index: 0, kind: input, shape index: {}]   ;;  %s6856_s1 = inlined_call_operand.hbm [shape: f32[128,512], index: 1, kind: input, shape index: {}]   ;;  %s6857_s2 = inlined_call_operand.hbm [shape: f32[128,512], index: 2, kind: input, shape index: {}]   ;;  %s6858_s3 = inlined_call_operand.vmem [shape: f32[1,512], index: 3, kind: input, shape index: {}]   ;;  %s6859_s4 = inlined_call_operand.hbm [shape: f32[128,512], index: 4, kind: input, shape index: {}]   ;;  %s6860_s5 = inlined_call_operand.hbm [shape: f32[128,512], index: 5, kind: input, shape index: {}]   ;;  %s6861_s6 = inlined_call_operand.vmem [shape: f32[1,512], index: 6, kind: input, shape index: {}]   ;;  %s6862_s7 = inlined_call_operand.vmem [shape: f32[1,128], index: 7, kind: input, shape index: {}]   ;;  %s6863_s8 = inlined_call_operand.vmem [shape: f32[1,128], index: 8, kind: input, shape index: {}]   ;;  %s6864_s9 = inlined_call_operand.hbm [shape: f32[128,128], index: 9, kind: input, shape index: {}]   ;;  %s6865_s10 = inlined_call_operand.vmem [shape: f32[1,128], index: 10, kind: input, shape index: {}]   ;;  %s6866_s11 = inlined_call_operand.hbm [shape: f32[8,128], index: 11, kind: output, shape index: {}]  }
   0x1   :  { %17 = vsyncpa [#allocation8], 0 }
   0x2   :  { %18 = vsyncpa [#allocation11], 0 }
   0x3   :  { %19 = vsyncpa [#allocation14], 0 }
   0x4   :  { %20 = vsyncpa [#allocation6], 0  ;;  %s5754_s17 = smov [#allocation7]   ;;  %s5590_s21 = scalar_lea.hbm %s6856_s1, 8192 }
   0x5   :  { %s38_s18 = sshll.u32 %s5754_s17, 4  ;;  %p5591_p0 = scmp.ne.s32.totalorder %s6856_s1, %s5590_s21  ;;  %s39_s18 = int_to_ptr.vmem [resolvable:$true] %s38_s18 }
   0x6   :  { %p5594_p1 = scmp.lt.u32.totalorder %s5590_s21, %s6856_s1 }
   0x8   :  { %p5596_p2 = pnand %p5594_p1, %p5591_p0 }
   0xa   :  { %5599 = shalt.err (!%p5596_p2)
}
   0xb   :  { %s5600_s26 = scalar_lea.vmem %s39_s18, 8192  ;;  %p5605_p4 = scmp.lt.s32.totalorder %s39_s18, %s39_s18 }
   0xc   :  { %p5601_p3 = scmp.ne.s32.totalorder %s39_s18, %s5600_s26  ;;  %p5606_p5 = scmp.lt.s32.totalorder %s5600_s26, %s5600_s26 }
   0xe   :  { %p5607_p6 = por %p5606_p5, %p5605_p4 }
  0x10   :  { %p5608_p7 = pnand %p5607_p6, %p5601_p3 }
  0x12   :  { %5611 = shalt.err (!%p5608_p7)
}
  0x13   :  { %s5755_s27 = smov 512   ;;  %s5756_s28 = smov 32  }
  0x14   :  { %44 = dma.hbm_to_vmem [thread:$0]  %s6856_s1, 8192, %s39_s18, [#allocation8], %s5755_s27, %s5755_s27, %s5756_s28  }
  0x15   :  { %s5757_s12 = smov [#allocation10]   ;;  %s5758_s14 = smov [#allocation4]  }
  0x16   :  { %s64_s13 = sshll.u32 %s5757_s12, 4  ;;  %s26_s15 = sshll.u32 %s5758_s14, 4  ;;  %s65_s13 = int_to_ptr.vmem [resolvable:$true] %s64_s13  ;;  %s27_s15 = int_to_ptr.vmem [resolvable:$true] %s26_s15 }
  0x17   :  { %s5612_s19 = scalar_lea.hbm %s6859_s4, 8192 }
  0x18   :  { %p5613_p8 = scmp.ne.s32.totalorder %s6859_s4, %s5612_s19  ;;  %p5616_p9 = scmp.lt.u32.totalorder %s5612_s19, %s6859_s4 }
  0x1a   :  { %p5618_p10 = pnand %p5616_p9, %p5613_p8 }
  0x1c   :  { %5621 = shalt.err (!%p5618_p10)
}
  0x1d   :  { %s5622_s1 = scalar_lea.vmem %s65_s13, 8192  ;;  %p5627_p12 = scmp.lt.s32.totalorder %s65_s13, %s65_s13 }
  0x1e   :  { %p5623_p11 = scmp.ne.s32.totalorder %s65_s13, %s5622_s1  ;;  %p5628_p13 = scmp.lt.s32.totalorder %s5622_s1, %s5622_s1 }
  0x20   :  { %p5629_p0 = por %p5628_p13, %p5627_p12 }
  0x22   :  { %p5630_p1 = pnand %p5629_p0, %p5623_p11 }
  0x24   :  { %5633 = shalt.err (!%p5630_p1)
}
  0x25   :  { %70 = dma.hbm_to_vmem [thread:$0]  %s6859_s4, 8192, %s65_s13, [#allocation11], %s5755_s27, %s5755_s27, %s5756_s28  }
  0x26   :  { %s5634_s29 = scalar_lea.hbm %s6855_s0, 1024 }
  0x27   :  { %p5635_p2 = scmp.ne.s32.totalorder %s6855_s0, %s5634_s29  ;;  %p5638_p3 = scmp.lt.u32.totalorder %s5634_s29, %s6855_s0 }
  0x29   :  { %p5640_p4 = pnand %p5638_p3, %p5635_p2 }
  0x2b   :  { %5643 = shalt.err (!%p5640_p4)
}
  0x2c   :  { %s5644_s17 = scalar_lea.vmem %s27_s15, 1024  ;;  %p5649_p6 = scmp.lt.s32.totalorder %s27_s15, %s27_s15 }
  0x2d   :  { %p5645_p5 = scmp.ne.s32.totalorder %s27_s15, %s5644_s17  ;;  %p5650_p7 = scmp.lt.s32.totalorder %s5644_s17, %s5644_s17 }
  0x2f   :  { %p5651_p8 = por %p5650_p7, %p5649_p6 }
  0x31   :  { %p5652_p9 = pnand %p5651_p8, %p5645_p5 }
  0x33   :  { %5655 = shalt.err (!%p5652_p9)
}
  0x34   :  { %s5759_s4 = smov 128   ;;  %s5760_s13 = smov 8  }
  0x35   :  { %32 = dma.hbm_to_vmem [thread:$0]  %s6855_s0, 1024, %s27_s15, [#allocation5], %s5759_s4, %s5759_s4, %s5760_s13  }
  0x36   :  { %s5761_s21 = smov [#allocation9]   ;;  %s5762_s23 = smov [#allocation12]  }
  0x37   :  { %s50_s22 = sshll.u32 %s5761_s21, 4  ;;  %s76_s1 = sshll.u32 %s5762_s23, 4  ;;  %s51_s22 = int_to_ptr.vmem [resolvable:$true] %s50_s22  ;;  %s77_s1 = int_to_ptr.vmem [resolvable:$true] %s76_s1 }
  0x38   :  { %s5656_s25 = scalar_lea.hbm %s6857_s2, 8192 }
  0x39   :  { %p5657_p10 = scmp.ne.s32.totalorder %s6857_s2, %s5656_s25  ;;  %p5660_p11 = scmp.lt.u32.totalorder %s5656_s25, %s6857_s2 }
  0x3b   :  { %p5662_p12 = pnand %p5660_p11, %p5657_p10 }
  0x3d   :  { %5665 = shalt.err (!%p5662_p12)
}
  0x3e   :  { %s5666_s0 = scalar_lea.vmem %s51_s22, 8192  ;;  %p5671_p0 = scmp.lt.s32.totalorder %s51_s22, %s51_s22 }
  0x3f   :  { %p5667_p13 = scmp.ne.s32.totalorder %s51_s22, %s5666_s0  ;;  %p5672_p1 = scmp.lt.s32.totalorder %s5666_s0, %s5666_s0 }
  0x41   :  { %p5673_p2 = por %p5672_p1, %p5671_p0 }
  0x43   :  { %p5674_p3 = pnand %p5673_p2, %p5667_p13 }
  0x45   :  { %5677 = shalt.err (!%p5674_p3)
}
  0x46   :  { %56 = dma.hbm_to_vmem [thread:$0]  %s6857_s2, 8192, %s51_s22, [#allocation8], %s5755_s27, %s5755_s27, %s5756_s28  }
  0x47   :  { %s5678_s19 = scalar_lea.hbm %s6860_s5, 8192 }
  0x48   :  { %p5679_p4 = scmp.ne.s32.totalorder %s6860_s5, %s5678_s19  ;;  %p5682_p5 = scmp.lt.u32.totalorder %s5678_s19, %s6860_s5 }
  0x4a   :  { %p5684_p6 = pnand %p5682_p5, %p5679_p4 }
  0x4c   :  { %5687 = shalt.err (!%p5684_p6)
}
  0x4d   :  { %s5688_s24 = scalar_lea.vmem %s77_s1, 8192  ;;  %p5693_p8 = scmp.lt.s32.totalorder %s77_s1, %s77_s1 }
  0x4e   :  { %p5689_p7 = scmp.ne.s32.totalorder %s77_s1, %s5688_s24  ;;  %p5694_p9 = scmp.lt.s32.totalorder %s5688_s24, %s5688_s24 }
  0x50   :  { %p5695_p10 = por %p5694_p9, %p5693_p8 }
  0x52   :  { %p5696_p11 = pnand %p5695_p10, %p5689_p7 }
  0x54   :  { %5699 = shalt.err (!%p5696_p11)
}
  0x55   :  { %82 = dma.hbm_to_vmem [thread:$0]  %s6860_s5, 8192, %s77_s1, [#allocation11], %s5755_s27, %s5755_s27, %s5756_s28  }
  0x56   :  { %s5763_s25 = smov [#allocation13]   ;;  %s5700_s12 = scalar_lea.hbm %s6864_s9, 2048 }
  0x57   :  { %s94_s26 = sshll.u32 %s5763_s25, 4  ;;  %p5701_p12 = scmp.ne.s32.totalorder %s6864_s9, %s5700_s12  ;;  %s95_s26 = int_to_ptr.vmem [resolvable:$true] %s94_s26 }
  0x58   :  { %p5704_p13 = scmp.lt.u32.totalorder %s5700_s12, %s6864_s9 }
  0x5a   :  { %p5706_p0 = pnand %p5704_p13, %p5701_p12 }
  0x5c   :  { %5709 = shalt.err (!%p5706_p0)
}
  0x5d   :  { %s5710_s17 = scalar_lea.vmem %s95_s26, 2048  ;;  %p5715_p2 = scmp.lt.s32.totalorder %s95_s26, %s95_s26 }
  0x5e   :  { %p5711_p1 = scmp.ne.s32.totalorder %s95_s26, %s5710_s17  ;;  %p5716_p3 = scmp.lt.s32.totalorder %s5710_s17, %s5710_s17 }
  0x60   :  { %p5717_p4 = por %p5716_p3, %p5715_p2 }
  0x62   :  { %p5718_p5 = pnand %p5717_p4, %p5711_p1 }
  0x64   :  { %5721 = shalt.err (!%p5718_p5)
}
  0x65   :  { %100 = dma.hbm_to_vmem [thread:$0]  %s6864_s9, 2048, %s95_s26, [#allocation14], %s5759_s4, %s5759_s4, %s5760_s13  }
  0x66   :  { %5744 = dma.done.wait [#allocation5], 1024  }
  0x67   :  { %5745 = vsyncadd [#allocation5], 4294966272 }
  0x68   :  { %5746 = dma.done.wait [#allocation8], 16384  }
  0x69   :  { %5747 = vsyncadd [#allocation8], 4294950912 }
  0x6a   :  { %5748 = dma.done.wait [#allocation11], 16384  }
  0x6b   :  { %5749 = vsyncadd [#allocation11], 4294950912 }
  0x6c   :  { %5750 = dma.done.wait [#allocation14], 2048  }
  0x6d   :  { %5751 = vsyncadd [#allocation14], 4294965248  ;;  %v5764_v0 = vmov 0.0   ;;  %v130_v1 = vld [vmem:[#allocation7 + $0x8] sm:$0xff]  ;;  %v132_v3 = vld [vmem:[#allocation7 + $0x18] sm:$0xff]  ;;  %vm5766_vm0 = vmmov 0  }
  0x6e   :  { %279 = vmatprep.mubr.f32.mxu0 %v5764_v0  ;;  %392 = vmatprep.mubr.f32.mxu1 %v5764_v0  ;;  %v134_v2 = vld [vmem:[#allocation7 + $0x28] sm:$0xff]  ;;  %v136_v5 = vld [vmem:[#allocation7 + $0x38] sm:$0xff]  ;;  %v129_v6 = vld [vmem:[#allocation7] sm:$0xff]  ;;  %s5767_s23 = smov [#allocation15]  }
  0x6f   :  { %v4014_v4 = vpack.c.bf16 %v134_v2, %v130_v1  ;;  %v133_v7 = vld [vmem:[#allocation7 + $0x20] sm:$0xff]  ;;  %v4046_v8 = vpack.c.bf16 %v136_v5, %v132_v3  ;;  %v131_v10 = vld [vmem:[#allocation7 + $0x10] sm:$0xff]  ;;  %v138_v12 = vld [vmem:[#allocation7 + $0x48] sm:$0xff]  ;;  %s3899_s18 = sshll.u32 %s5767_s23, 4  ;;  %s3900_s18 = int_to_ptr.vmem [resolvable:$true] %s3899_s18 }
  0x70   :  { %v4016_v9 = vpack.c.bf16 %v133_v7, %v129_v6  ;;  %v135_v11 = vld [vmem:[#allocation7 + $0x30] sm:$0xff]  ;;  %v142_v14 = vld [vmem:[#allocation7 + $0x68] sm:$0xff]  ;;  %v140_v15 = vld [vmem:[#allocation7 + $0x58] sm:$0xff]  ;;  %p5727_p7 = scmp.lt.s32.totalorder %s3900_s18, %s3900_s18 }
  0x71   :  { %4015 = vmatprep.subr.bf16.mxu0 %v4014_v4  ;;  %v4048_v13 = vpack.c.bf16 %v135_v11, %v131_v10  ;;  %v144_v16 = vld [vmem:[#allocation7 + $0x78] sm:$0xff]  ;;  %4047 = vmatprep.subr.bf16.mxu1 %v4046_v8  ;;  %v4018_v17 = vpack.c.bf16 %v142_v14, %v138_v12  ;;  %v137_v19 = vld [vmem:[#allocation7 + $0x40] sm:$0xff]  ;;  %v139_v21 = vld [vmem:[#allocation7 + $0x50] sm:$0xff] }
  0x72   :  { %4017 = vmatpush1.bf16.msra.mxu0 %v4016_v9  ;;  %v4050_v18 = vpack.c.bf16 %v144_v16, %v140_v15  ;;  %v141_v20 = vld [vmem:[#allocation7 + $0x60] sm:$0xff]  ;;  %v143_v23 = vld [vmem:[#allocation7 + $0x70] sm:$0xff]  ;;  %v146_v24 = vld [vmem:[#allocation7 + $0x88] sm:$0xff] }
  0x73   :  { %4049 = vmatpush1.bf16.msra.mxu1 %v4048_v13  ;;  %v4020_v22 = vpack.c.bf16 %v141_v20, %v137_v19  ;;  %v150_v25 = vld [vmem:[#allocation7 + $0xa8] sm:$0xff]  ;;  %4019 = vmatprep.subr.bf16.mxu0 %v4018_v17  ;;  %v4052_v26 = vpack.c.bf16 %v143_v23, %v139_v21  ;;  %v148_v28 = vld [vmem:[#allocation7 + $0x98] sm:$0xff]  ;;  %v145_v30 = vld [vmem:[#allocation7 + $0x80] sm:$0xff] }
  0x74   :  { %4051 = vmatprep.subr.bf16.mxu1 %v4050_v18  ;;  %v4022_v27 = vpack.c.bf16 %v150_v25, %v146_v24  ;;  %v152_v29 = vld [vmem:[#allocation7 + $0xb8] sm:$0xff]  ;;  %v149_v32 = vld [vmem:[#allocation7 + $0xa0] sm:$0xff]  ;;  %v147_v33 = vld [vmem:[#allocation7 + $0x90] sm:$0xff] }
  0x75   :  { %v4054_v31 = vpack.c.bf16 %v152_v29, %v148_v28  ;;  %v151_v34 = vld [vmem:[#allocation7 + $0xb0] sm:$0xff]  ;;  %v4024_v35 = vpack.c.bf16 %v149_v32, %v145_v30  ;;  %v154_v36 = vld [vmem:[#allocation7 + $0xc8] sm:$0xff]  ;;  %v156_v38 = vld [vmem:[#allocation7 + $0xd8] sm:$0xff] }
  0x76   :  { %4021 = vmatpush1.bf16.msra.mxu0 %v4020_v22  ;;  %v158_v37 = vld [vmem:[#allocation7 + $0xe8] sm:$0xff]  ;;  %v4056_v39 = vpack.c.bf16 %v151_v34, %v147_v33  ;;  %v160_v41 = vld [vmem:[#allocation7 + $0xf8] sm:$0xff]  ;;  %v153_v42 = vld [vmem:[#allocation7 + $0xc0] sm:$0xff] }
  0x77   :  { %4053 = vmatpush1.bf16.msra.mxu1 %v4052_v26  ;;  %4023 = vmatprep.subr.bf16.mxu0 %v4022_v27  ;;  %v4026_v40 = vpack.c.bf16 %v158_v37, %v154_v36  ;;  %v157_v43 = vld [vmem:[#allocation7 + $0xe0] sm:$0xff]  ;;  %v4058_v44 = vpack.c.bf16 %v160_v41, %v156_v38  ;;  %v155_v45 = vld [vmem:[#allocation7 + $0xd0] sm:$0xff]  ;;  %v162_v47 = vld [vmem:[#allocation7 + $0x108] sm:$0xff] }
  0x78   :  { %4055 = vmatprep.subr.bf16.mxu1 %v4054_v31  ;;  %v159_v46 = vld [vmem:[#allocation7 + $0xf0] sm:$0xff]  ;;  %v166_v48 = vld [vmem:[#allocation7 + $0x128] sm:$0xff]  ;;  %v164_v49 = vld [vmem:[#allocation7 + $0x118] sm:$0xff]  ;;  %v4028_v51 = vpack.c.bf16 %v157_v43, %v153_v42 }
  0x79   :  { %v168_v50 = vld [vmem:[#allocation7 + $0x138] sm:$0xff]  ;;  %v4060_v52 = vpack.c.bf16 %v159_v46, %v155_v45  ;;  %v4030_v53 = vpack.c.bf16 %v166_v48, %v162_v47  ;;  %v161_v54 = vld [vmem:[#allocation7 + $0x100] sm:$0xff]  ;;  %v163_v56 = vld [vmem:[#allocation7 + $0x110] sm:$0xff] }
  0x7a   :  { %4025 = vmatpush1.bf16.msra.mxu0 %v4024_v35  ;;  %v165_v55 = vld [vmem:[#allocation7 + $0x120] sm:$0xff]  ;;  %v4062_v57 = vpack.c.bf16 %v168_v50, %v164_v49  ;;  %v167_v58 = vld [vmem:[#allocation7 + $0x130] sm:$0xff]  ;;  %v170_v59 = vld [vmem:[#allocation7 + $0x148] sm:$0xff] }
  0x7b   :  { %4057 = vmatpush1.bf16.msra.mxu1 %v4056_v39  ;;  %4027 = vmatprep.subr.bf16.mxu0 %v4026_v40  ;;  %v174_v60 = vld [vmem:[#allocation7 + $0x168] sm:$0xff]  ;;  %v172_v61 = vld [vmem:[#allocation7 + $0x158] sm:$0xff]  ;;  %v4032_v63 = vpack.c.bf16 %v165_v55, %v161_v54  ;;  %v4064_v1 = vpack.c.bf16 %v167_v58, %v163_v56  ;;  %v169_v3 = vld [vmem:[#allocation7 + $0x140] sm:$0xff] }
  0x7c   :  { %4059 = vmatprep.subr.bf16.mxu1 %v4058_v44  ;;  %v176_v62 = vld [vmem:[#allocation7 + $0x178] sm:$0xff]  ;;  %v4034_v2 = vpack.c.bf16 %v174_v60, %v170_v59  ;;  %v173_v4 = vld [vmem:[#allocation7 + $0x160] sm:$0xff]  ;;  %v171_v5 = vld [vmem:[#allocation7 + $0x150] sm:$0xff] }
  0x7d   :  { %v4066_v6 = vpack.c.bf16 %v176_v62, %v172_v61  ;;  %v175_v7 = vld [vmem:[#allocation7 + $0x170] sm:$0xff]  ;;  %v178_v8 = vld [vmem:[#allocation7 + $0x188] sm:$0xff]  ;;  %v180_v10 = vld [vmem:[#allocation7 + $0x198] sm:$0xff]  ;;  %v4036_v12 = vpack.c.bf16 %v173_v4, %v169_v3 }
  0x7e   :  { %4029 = vmatpush1.bf16.msra.mxu0 %v4028_v51  ;;  %v182_v9 = vld [vmem:[#allocation7 + $0x1a8] sm:$0xff]  ;;  %v184_v11 = vld [vmem:[#allocation7 + $0x1b8] sm:$0xff]  ;;  %v4068_v13 = vpack.c.bf16 %v175_v7, %v171_v5  ;;  %v177_v15 = vld [vmem:[#allocation7 + $0x180] sm:$0xff] }
  0x7f   :  { %4061 = vmatpush1.bf16.msra.mxu1 %v4060_v52  ;;  %4031 = vmatprep.subr.bf16.mxu0 %v4030_v53  ;;  %v4038_v14 = vpack.c.bf16 %v182_v9, %v178_v8  ;;  %v181_v16 = vld [vmem:[#allocation7 + $0x1a0] sm:$0xff]  ;;  %v179_v17 = vld [vmem:[#allocation7 + $0x190] sm:$0xff]  ;;  %v4070_v18 = vpack.c.bf16 %v184_v11, %v180_v10  ;;  %v186_v20 = vld [vmem:[#allocation7 + $0x1c8] sm:$0xff] }
  0x80   :  { %4063 = vmatprep.subr.bf16.mxu1 %v4062_v57  ;;  %v183_v19 = vld [vmem:[#allocation7 + $0x1b0] sm:$0xff]  ;;  %v190_v21 = vld [vmem:[#allocation7 + $0x1e8] sm:$0xff]  ;;  %v188_v22 = vld [vmem:[#allocation7 + $0x1d8] sm:$0xff]  ;;  %v4040_v24 = vpack.c.bf16 %v181_v16, %v177_v15 }
  0x81   :  { %v192_v23 = vld [vmem:[#allocation7 + $0x1f8] sm:$0xff]  ;;  %v4072_v25 = vpack.c.bf16 %v183_v19, %v179_v17  ;;  %v4042_v26 = vpack.c.bf16 %v190_v21, %v186_v20  ;;  %v185_v27 = vld [vmem:[#allocation7 + $0x1c0] sm:$0xff]  ;;  %v187_v29 = vld [vmem:[#allocation7 + $0x1d0] sm:$0xff] }
  0x82   :  { %4033 = vmatpush1.bf16.msra.mxu0 %v4032_v63  ;;  %v189_v28 = vld [vmem:[#allocation7 + $0x1e0] sm:$0xff]  ;;  %v4074_v30 = vpack.c.bf16 %v192_v23, %v188_v22  ;;  %v191_v31 = vld [vmem:[#allocation7 + $0x1f0] sm:$0xff]  ;;  %v474_v32 = vld [vmem:[#allocation9 + $0x8] sm:$0xff] }
  0x83   :  { %4065 = vmatpush1.bf16.msra.mxu1 %v4064_v1  ;;  %4035 = vmatprep.subr.bf16.mxu0 %v4034_v2  ;;  %v478_v33 = vld [vmem:[#allocation9 + $0x28] sm:$0xff]  ;;  %v476_v34 = vld [vmem:[#allocation9 + $0x18] sm:$0xff]  ;;  %v4044_v36 = vpack.c.bf16 %v189_v28, %v185_v27  ;;  %v4076_v37 = vpack.c.bf16 %v191_v31, %v187_v29  ;;  %v473_v39 = vld [vmem:[#allocation9] sm:$0xff] }
  0x84   :  { %4067 = vmatprep.subr.bf16.mxu1 %v4066_v6  ;;  %v480_v35 = vld [vmem:[#allocation9 + $0x38] sm:$0xff]  ;;  %v5920_v38 = vpack.c.bf16 %v478_v33, %v474_v32  ;;  %v477_v40 = vld [vmem:[#allocation9 + $0x20] sm:$0xff]  ;;  %v475_v42 = vld [vmem:[#allocation9 + $0x10] sm:$0xff] }
  0x85   :  { %v5922_v41 = vpack.c.bf16 %v480_v35, %v476_v34  ;;  %v479_v43 = vld [vmem:[#allocation9 + $0x30] sm:$0xff]  ;;  %v482_v44 = vld [vmem:[#allocation9 + $0x48] sm:$0xff]  ;;  %v121_v46 = vld [vmem:[#allocation4] sm:$0xff]  ;;  %v5924_v47 = vpack.c.bf16 %v477_v40, %v473_v39 }
  0x86   :  { %4037 = vmatpush1.bf16.msra.mxu0 %v4036_v12  ;;  %v486_v45 = vld [vmem:[#allocation9 + $0x68] sm:$0xff]  ;;  %v484_v48 = vld [vmem:[#allocation9 + $0x58] sm:$0xff]  ;;  %v5927_v50 = vpack.c.bf16 %v479_v43, %v475_v42  ;;  %v481_v51 = vld [vmem:[#allocation9 + $0x40] sm:$0xff] }
  0x87   :  { %4069 = vmatpush1.bf16.msra.mxu1 %v4068_v13  ;;  %4039 = vmatprep.subr.bf16.mxu0 %v4038_v14  ;;  %v488_v49 = vld [vmem:[#allocation9 + $0x78] sm:$0xff]  ;;  %v485_v52 = vld [vmem:[#allocation9 + $0x60] sm:$0xff]  ;;  %v5930_v53 = vpack.c.bf16 %v486_v45, %v482_v44  ;;  %v483_v54 = vld [vmem:[#allocation9 + $0x50] sm:$0xff] }
  0x88   :  { %4071 = vmatprep.subr.bf16.mxu1 %v4070_v18  ;;  %v487_v55 = vld [vmem:[#allocation9 + $0x70] sm:$0xff]  ;;  %v5932_v56 = vpack.c.bf16 %v488_v49, %v484_v48  ;;  %v490_v57 = vld [vmem:[#allocation9 + $0x88] sm:$0xff]  ;;  %v5935_v60 = vpack.c.bf16 %v485_v52, %v481_v51  ;;  %v492_v61 = vld [vmem:[#allocation9 + $0x98] sm:$0xff] }
  0x89   :  { %v494_v58 = vld [vmem:[#allocation9 + $0xa8] sm:$0xff]  ;;  %v496_v62 = vld [vmem:[#allocation9 + $0xb8] sm:$0xff]  ;;  %v5939_v63 = vpack.c.bf16 %v487_v55, %v483_v54  ;;  %v489_v1 = vld [vmem:[#allocation9 + $0x80] sm:$0xff] }
  0x8a   :  { %4041 = vmatpush1.bf16.msra.mxu0 %v4040_v24  ;;  %v122_v59 = vld [vmem:[#allocation4 + $0x8] sm:$0xff]  ;;  %v493_v2 = vld [vmem:[#allocation9 + $0xa0] sm:$0xff]  ;;  %v5943_v3 = vpack.c.bf16 %v494_v58, %v490_v57  ;;  %v491_v4 = vld [vmem:[#allocation9 + $0x90] sm:$0xff]  ;;  %v5946_v6 = vpack.c.bf16 %v496_v62, %v492_v61 }
  0x8b   :  { %4073 = vmatpush1.bf16.msra.mxu1 %v4072_v25  ;;  %4043 = vmatprep.subr.bf16.mxu0 %v4042_v26  ;;  %v495_v5 = vld [vmem:[#allocation9 + $0xb0] sm:$0xff]  ;;  %v498_v7 = vld [vmem:[#allocation9 + $0xc8] sm:$0xff]  ;;  %v5949_v10 = vpack.c.bf16 %v493_v2, %v489_v1  ;;  %v500_v11 = vld [vmem:[#allocation9 + $0xd8] sm:$0xff] }
  0x8c   :  { %4075 = vmatprep.subr.bf16.mxu1 %v4074_v30  ;;  %v502_v8 = vld [vmem:[#allocation9 + $0xe8] sm:$0xff]  ;;  %v123_v9 = vld [vmem:[#allocation4 + $0x10] sm:$0xff]  ;;  %v504_v12 = vld [vmem:[#allocation9 + $0xf8] sm:$0xff]  ;;  %v5953_v13 = vpack.c.bf16 %v495_v5, %v491_v4 }
  0x8d   :  { %v497_v14 = vld [vmem:[#allocation9 + $0xc0] sm:$0xff]  ;;  %v5957_v16 = vpack.c.bf16 %v502_v8, %v498_v7  ;;  %v499_v17 = vld [vmem:[#allocation9 + $0xd0] sm:$0xff]  ;;  %v5960_v19 = vpack.c.bf16 %v504_v12, %v500_v11  ;;  %v506_v20 = vld [vmem:[#allocation9 + $0x108] sm:$0xff] }
  0x8e   :  { %4045 = vmatpush1.bf16.msra.mxu0 %v4044_v36  ;;  %v501_v15 = vld [vmem:[#allocation9 + $0xe0] sm:$0xff]  ;;  %v503_v18 = vld [vmem:[#allocation9 + $0xf0] sm:$0xff]  ;;  %v510_v21 = vld [vmem:[#allocation9 + $0x128] sm:$0xff] }
  0x8f   :  { %4077 = vmatpush1.bf16.msra.mxu1 %v4076_v37  ;;  %4079 = vmatprep.subr.bf16.mxu0 %v5920_v38  ;;  %v124_v22 = vld [vmem:[#allocation4 + $0x18] sm:$0xff]  ;;  %v5963_v23 = vpack.c.bf16 %v501_v15, %v497_v14  ;;  %v5967_v26 = vpack.c.bf16 %v503_v18, %v499_v17  ;;  %v505_v27 = vld [vmem:[#allocation9 + $0x100] sm:$0xff]  ;;  %v5971_v29 = vpack.c.bf16 %v510_v21, %v506_v20  ;;  %v507_v30 = vld [vmem:[#allocation9 + $0x110] sm:$0xff] }
  0x90   :  { %4111 = vmatprep.subr.bf16.mxu1 %v5922_v41  ;;  %v508_v24 = vld [vmem:[#allocation9 + $0x118] sm:$0xff]  ;;  %v509_v28 = vld [vmem:[#allocation9 + $0x120] sm:$0xff]  ;;  %v511_v31 = vld [vmem:[#allocation9 + $0x130] sm:$0xff] }
  0x91   :  { %280 = vmatmul.mubr.f32.vlgmr.msra.gmra.mrb[0].mxu0 %v121_v46  ;;  %v512_v25 = vld [vmem:[#allocation9 + $0x138] sm:$0xff]  ;;  %v514_v33 = vld [vmem:[#allocation9 + $0x148] sm:$0xff]  ;;  %v125_v35 = vld [vmem:[#allocation4 + $0x20] sm:$0xff]  ;;  %v5977_v36 = vpack.c.bf16 %v509_v28, %v505_v27  ;;  %v5981_v40 = vpack.c.bf16 %v511_v31, %v507_v30  ;;  %v195_v28 = vlaneseq }
  0x92   :  { %393 = vmatmul.mubr.f32.vlgmr.msra.gmra.mrb[0].mxu1 %v121_v46  ;;  %4081 = vmatpush1.bf16.msra.mxu0 %v5924_v47  ;;  %v5974_v32 = vpack.c.bf16 %v512_v25, %v508_v24  ;;  %v518_v34 = vld [vmem:[#allocation9 + $0x168] sm:$0xff]  ;;  %v516_v37 = vld [vmem:[#allocation9 + $0x158] sm:$0xff]  ;;  %v513_v42 = vld [vmem:[#allocation9 + $0x140] sm:$0xff] }
  0x93   :  { %4113 = vmatpush1.bf16.msra.mxu1 %v5927_v50  ;;  %285 = vmatprep.mubr.f32.mxu0 %v5764_v0  ;;  %v520_v39 = vld [vmem:[#allocation9 + $0x178] sm:$0xff]  ;;  %v517_v43 = vld [vmem:[#allocation9 + $0x160] sm:$0xff]  ;;  %v5985_v44 = vpack.c.bf16 %v518_v34, %v514_v33  ;;  %v515_v45 = vld [vmem:[#allocation9 + $0x150] sm:$0xff]  ;;  %v6070_v30 = vshrl.u32 %v195_v28, 7 }
  0x94   :  { %398 = vmatprep.mubr.f32.mxu1 %v5764_v0  ;;  %4083 = vmatprep.subr.bf16.mxu0 %v5930_v53  ;;  %v519_v46 = vld [vmem:[#allocation9 + $0x170] sm:$0xff]  ;;  %v5988_v48 = vpack.c.bf16 %v520_v39, %v516_v37  ;;  %v522_v49 = vld [vmem:[#allocation9 + $0x188] sm:$0xff]  ;;  %v5991_v54 = vpack.c.bf16 %v517_v43, %v513_v42  ;;  %v524_v55 = vld [vmem:[#allocation9 + $0x198] sm:$0xff] }
  0x95   :  { %286 = vmatmul.mubr.f32.gmra.mrb[2].mxu0 %v122_v59  ;;  %4115 = vmatprep.subr.bf16.mxu1 %v5932_v56  ;;  %v526_v51 = vld [vmem:[#allocation9 + $0x1a8] sm:$0xff]  ;;  %v528_v57 = vld [vmem:[#allocation9 + $0x1b8] sm:$0xff]  ;;  %v5995_v58 = vpack.c.bf16 %v519_v46, %v515_v45  ;;  %v525_v61 = vld [vmem:[#allocation9 + $0x1a0] sm:$0xff]  ;;  %v197_v31 = vsub.s32 0, %v6070_v30  ;;  %v201_v34 = vsub.s32 1, %v6070_v30  ;;  %v205_v42 = vsub.s32 2, %v6070_v30 }
  0x96   :  { %399 = vmatmul.mubr.f32.gmra.mrb[2].mxu1 %v122_v59  ;;  %4085 = vmatpush1.bf16.msra.mxu0 %v5935_v60  ;;  %v126_v52 = vld [vmem:[#allocation4 + $0x28] sm:$0xff]  ;;  %v521_v59 = vld [vmem:[#allocation9 + $0x180] sm:$0xff]  ;;  %v5999_v62 = vpack.c.bf16 %v526_v51, %v522_v49  ;;  %v523_v1 = vld [vmem:[#allocation9 + $0x190] sm:$0xff]  ;;  %v6002_v4 = vpack.c.bf16 %v528_v57, %v524_v55  ;;  %vm3761_vm1 = vcmp.lt.s32.totalorder %v6070_v30, 4 }
  0x97   :  { %4117 = vmatpush1.bf16.msra.mxu1 %v5939_v63  ;;  %291 = vmatprep.mubr.f32.mxu0 %v5764_v0  ;;  %v527_v2 = vld [vmem:[#allocation9 + $0x1b0] sm:$0xff]  ;;  %v530_v5 = vld [vmem:[#allocation9 + $0x1c8] sm:$0xff]  ;;  %v532_v11 = vld [vmem:[#allocation9 + $0x1d8] sm:$0xff] }
  0x98   :  { %404 = vmatprep.mubr.f32.mxu1 %v5764_v0  ;;  %4087 = vmatprep.subr.bf16.mxu0 %v5943_v3  ;;  %v534_v7 = vld [vmem:[#allocation9 + $0x1e8] sm:$0xff]  ;;  %v127_v8 = vld [vmem:[#allocation4 + $0x30] sm:$0xff]  ;;  %v536_v12 = vld [vmem:[#allocation9 + $0x1f8] sm:$0xff]  ;;  %v6009_v14 = vpack.c.bf16 %v527_v2, %v523_v1 }
  0x99   :  { %292 = vmatmul.mubr.f32.gmra.mrb[4].mxu0 %v123_v9  ;;  %4119 = vmatprep.subr.bf16.mxu1 %v5946_v6  ;;  %v529_v15 = vld [vmem:[#allocation9 + $0x1c0] sm:$0xff]  ;;  %v6013_v18 = vpack.c.bf16 %v534_v7, %v530_v5  ;;  %v531_v20 = vld [vmem:[#allocation9 + $0x1d0] sm:$0xff]  ;;  %v128_v24 = vld [vmem:[#allocation4 + $0x38] sm:$0xff] }
  0x9a   :  { %405 = vmatmul.mubr.f32.gmra.mrb[4].mxu1 %v123_v9  ;;  %4089 = vmatpush1.bf16.msra.mxu0 %v5949_v10  ;;  %v6005_v9 = vpack.c.bf16 %v525_v61, %v521_v59  ;;  %v533_v17 = vld [vmem:[#allocation9 + $0x1e0] sm:$0xff]  ;;  %v535_v21 = vld [vmem:[#allocation9 + $0x1f0] sm:$0xff]  ;;  %v209_v59 = vsub.s32 3, %v6070_v30 }
  0x9b   :  { %4121 = vmatpush1.bf16.msra.mxu1 %v5953_v13  ;;  %297 = vmatprep.mubr.f32.mxu0 %v5764_v0  ;;  %v6019_v25 = vpack.c.bf16 %v533_v17, %v529_v15  ;;  %v6023_v27 = vpack.c.bf16 %v535_v21, %v531_v20  ;;  %v193_v33 = vld [vmem:[%s6858_s3] sm:$0xf] }
  0x9c   :  { %410 = vmatprep.mubr.f32.mxu1 %v5764_v0  ;;  %4091 = vmatprep.subr.bf16.mxu0 %v5957_v16  ;;  %v6083_v37 = vrot.slane %v193_v33, %v201_v34  ;;  %v6090_v55 = vrot.slane %v193_v33, %v205_v42  ;;  %v6096_v1 = vrot.slane %v193_v33, %v209_v59 }
  0x9d   :  { %298 = vmatmul.mubr.f32.gmra.mrb[6].mxu0 %v124_v22  ;;  %4123 = vmatprep.subr.bf16.mxu1 %v5960_v19 }
  0x9e   :  { %411 = vmatmul.mubr.f32.gmra.mrb[6].mxu1 %v124_v22  ;;  %4093 = vmatpush1.bf16.msra.mxu0 %v5963_v23  ;;  %v6016_v22 = vpack.c.bf16 %v536_v12, %v532_v11 }
  0x9f   :  { %4125 = vmatpush1.bf16.msra.mxu1 %v5967_v26  ;;  %303 = vmatprep.mubr.f32.mxu0 %v5764_v0 }
  0xa0   :  { %416 = vmatprep.mubr.f32.mxu1 %v5764_v0  ;;  %4095 = vmatprep.subr.bf16.mxu0 %v5971_v29 }
  0xa1   :  { %304 = vmatmul.mubr.f32.gmra.mrb[8].mxu0 %v125_v35  ;;  %4127 = vmatprep.subr.bf16.mxu1 %v5974_v32 }
  0xa2   :  { %417 = vmatmul.mubr.f32.gmra.mrb[8].mxu1 %v125_v35  ;;  %4097 = vmatpush1.bf16.msra.mxu0 %v5977_v36  ;;  %v6079_v35 = vrot.slane %v193_v33, %v197_v31 }
  0xa3   :  { %4129 = vmatpush1.bf16.msra.mxu1 %v5981_v40  ;;  %309 = vmatprep.mubr.f32.mxu0 %v5764_v0 }
  0xa4   :  { %422 = vmatprep.mubr.f32.mxu1 %v5764_v0  ;;  %4099 = vmatprep.subr.bf16.mxu0 %v5985_v44 }
  0xa5   :  { %310 = vmatmul.mubr.f32.gmra.mrb[10].mxu0 %v126_v52  ;;  %4131 = vmatprep.subr.bf16.mxu1 %v5988_v48 }
  0xa6   :  { %423 = vmatmul.mubr.f32.gmra.mrb[10].mxu1 %v126_v52  ;;  %4101 = vmatpush1.bf16.msra.mxu0 %v5991_v54 }
  0xa7   :  { %4133 = vmatpush1.bf16.msra.mxu1 %v5995_v58  ;;  %315 = vmatprep.mubr.f32.mxu0 %v5764_v0 }
  0xa8   :  { %428 = vmatprep.mubr.f32.mxu1 %v5764_v0  ;;  %4103 = vmatprep.subr.bf16.mxu0 %v5999_v62 }
  0xa9   :  { %316 = vmatmul.mubr.f32.gmra.mrb[12].mxu0 %v127_v8  ;;  %4135 = vmatprep.subr.bf16.mxu1 %v6002_v4 }
  0xaa   :  { %429 = vmatmul.mubr.f32.gmra.mrb[12].mxu1 %v127_v8  ;;  %4105 = vmatpush1.bf16.msra.mxu0 %v6005_v9 }
  0xab   :  { %4137 = vmatpush1.bf16.msra.mxu1 %v6009_v14  ;;  %321 = vmatprep.mubr.f32.mxu0 %v5764_v0 }
  0xac   :  { %434 = vmatprep.mubr.f32.mxu1 %v5764_v0  ;;  %4107 = vmatprep.subr.bf16.mxu0 %v6013_v18 }
  0xad   :  { %322 = vmatmul.mubr.f32.gmra.mrb[14].mxu0 %v128_v24  ;;  %4139 = vmatprep.subr.bf16.mxu1 %v6016_v22 }
  0xae   :  { %435 = vmatmul.mubr.f32.gmra.mrb[14].mxu1 %v128_v24  ;;  %4109 = vmatpush1.bf16.msra.mxu0 %v6019_v25 }
  0xaf   :  { %4141 = vmatpush1.bf16.msra.mxu1 %v6023_v27  ;;  %605 = vmatprep.mubr.f32.mxu0 %v5764_v0 }
  0xb0   :  { %676 = vmatprep.mubr.f32.mxu1 %v5764_v0  ;;  %4143 = vmatprep.subr.bf16.mxu0 %v5920_v38 }
  0xb1   :  { %606 = vmatmul.mubr.f32.vlgmr.msra.gmra.mrb[0].mxu0 %v5764_v0  ;;  %4175 = vmatprep.subr.bf16.mxu1 %v5922_v41 }
  0xb2   :  { %677 = vmatmul.mubr.f32.vlgmr.msra.gmra.mrb[0].mxu1 %v5764_v0  ;;  %4145 = vmatpush1.bf16.msra.mxu0 %v5924_v47 }
  0xb3   :  { %4177 = vmatpush1.bf16.msra.mxu1 %v5927_v50  ;;  %4147 = vmatprep.subr.bf16.mxu0 %v5930_v53 }
  0xb4   :  { %4179 = vmatprep.subr.bf16.mxu1 %v5932_v56  ;;  %781 = vmatprep.mubr.f32.mxu0 %v5764_v0 }
  0xb5   :  { %852 = vmatprep.mubr.f32.mxu1 %v5764_v0 }
  0xb6   :  { %4149 = vmatpush1.bf16.msra.mxu0 %v5935_v60 }
  0xb7   :  { %4181 = vmatpush1.bf16.msra.mxu1 %v5939_v63  ;;  %4151 = vmatprep.subr.bf16.mxu0 %v5943_v3 }
  0xb8   :  { %4183 = vmatprep.subr.bf16.mxu1 %v5946_v6 }
  0xba   :  { %4153 = vmatpush1.bf16.msra.mxu0 %v5949_v10 }
  0xbb   :  { %4185 = vmatpush1.bf16.msra.mxu1 %v5953_v13  ;;  %4155 = vmatprep.subr.bf16.mxu0 %v5957_v16 }
  0xbc   :  { %4187 = vmatprep.subr.bf16.mxu1 %v5960_v19 }
  0xbe   :  { %4157 = vmatpush1.bf16.msra.mxu0 %v5963_v23 }
  0xbf   :  { %4189 = vmatpush1.bf16.msra.mxu1 %v5967_v26  ;;  %4159 = vmatprep.subr.bf16.mxu0 %v5971_v29 }
  0xc0   :  { %4191 = vmatprep.subr.bf16.mxu1 %v5974_v32 }
  0xc2   :  { %4161 = vmatpush1.bf16.msra.mxu0 %v5977_v36 }
  0xc3   :  { %4193 = vmatpush1.bf16.msra.mxu1 %v5981_v40  ;;  %4163 = vmatprep.subr.bf16.mxu0 %v5985_v44 }
  0xc4   :  { %4195 = vmatprep.subr.bf16.mxu1 %v5988_v48 }
  0xc6   :  { %4165 = vmatpush1.bf16.msra.mxu0 %v5991_v54 }
  0xc7   :  { %4197 = vmatpush1.bf16.msra.mxu1 %v5995_v58  ;;  %4167 = vmatprep.subr.bf16.mxu0 %v5999_v62 }
  0xc8   :  { %4199 = vmatprep.subr.bf16.mxu1 %v6002_v4 }
  0xca   :  { %4169 = vmatpush1.bf16.msra.mxu0 %v6005_v9 }
  0xcb   :  { %4201 = vmatpush1.bf16.msra.mxu1 %v6009_v14  ;;  %4171 = vmatprep.subr.bf16.mxu0 %v6013_v18 }
  0xcc   :  { %4203 = vmatprep.subr.bf16.mxu1 %v6016_v22 }
  0xce   :  { %4173 = vmatpush1.bf16.msra.mxu0 %v6019_v25 }
  0xcf   :  { %4205 = vmatpush1.bf16.msra.mxu1 %v6023_v27  ;;  %4207 = vmatprep.subr.bf16.mxu0 %v5920_v38 }
  0xd0   :  { %4239 = vmatprep.subr.bf16.mxu1 %v5922_v41 }
 0x184   :  { %v607_v39 = vpop.f32.mrb[0].mxu0 }
 0x185   :  { %v5190_v43 = vadd.f32 %v607_v39, %v6079_v35  ;;  %v678_v45 = vpop.f32.mrb[0].mxu1  ;;  %v609_v46 = vpop.f32.mrb[1].mxu0 }
 0x186   :  { %v5191_v49 = vadd.f32 %v609_v46, %v6083_v37  ;;  %v680_v51 = vpop.f32.mrb[1].mxu1  ;;  %v5206_v61 = vadd.f32 %v678_v45, %v6090_v55 }
 0x187   :  { %v3911_v52 = vmul.f32 -1.442695, %v5190_v43  ;;  %v5207_v5 = vadd.f32 %v680_v51, %v6096_v1 }
 0x188   :  { %v3912_v57 = vmul.f32 -1.442695, %v5191_v49  ;;  %v3913_v2 = vmul.f32 -1.442695, %v5206_v61 }
 0x189   :  { %5332 = vpow2.f32 %v3911_v52 }
 0x18a   :  { %5334 = vpow2.f32 %v3912_v57 }
 0x18b   :  { %5336 = vpow2.f32 %v3913_v2 }
 0x18c   :  { %5338 = vtanh.f32 %v5207_v5 }
 0x193   :  { %v5333_v7 = vpop.eup %5332 }
 0x194   :  { %v696_v8 = vadd.f32 1.0, %v5333_v7  ;;  %v5335_v11 = vpop.eup %5334 }
 0x195   :  { %v697_v12 = vadd.f32 1.0, %v5335_v11  ;;  %v5337_v15 = vpop.eup %5336 }
 0x196   :  { %5340 = vrcp.f32 %v696_v8  ;;  %v5339_v17 = vpop.eup %5338  ;;  %v698_v28 = vadd.f32 1.0, %v5337_v15 }
 0x197   :  { %5342 = vrcp.f32 %v697_v12 }
 0x198   :  { %5344 = vrcp.f32 %v698_v28 }
 0x1a0   :  { %v5341_v20 = vpop.eup %5340 }
 0x1a1   :  { %v707_v21 = vmul.f32 %v5341_v20, %v5339_v17  ;;  %v5343_v24 = vpop.eup %5342 }
 0x1a2   :  { %v706_v39 = vmul.f32 0.0, %v5343_v24  ;;  %v5345_v43 = vpop.eup %5344 }
 0x1a4   :  { %v6099_v33 = vadd.f32 %v707_v21, %v706_v39 }
 0x1a6   :  { %5346 = vtanh.f32 %v6099_v33 }
 0x1b0   :  { %v5347_v45 = vpop.eup %5346 }
 0x1b1   :  { %v6102_v46 = vmul.f32 %v5347_v45, %v5345_v43 }
 0x1b3   :  { %782 = vmatmul.mubr.f32.vlgmr.msra.gmra.mrb[2].mxu0 %v6102_v46  ;;  %853 = vmatmul.mubr.f32.vlgmr.msra.gmra.mrb[2].mxu1 %v6102_v46 }
 0x1b4   :  { %4209 = vmatpush1.bf16.msra.mxu0 %v5924_v47  ;;  %4241 = vmatpush1.bf16.msra.mxu1 %v5927_v50 }
 0x1b5   :  { %4211 = vmatprep.subr.bf16.mxu0 %v5930_v53  ;;  %4243 = vmatprep.subr.bf16.mxu1 %v5932_v56 }
 0x1b6   :  { %958 = vmatprep.mubr.f32.mxu0 %v5764_v0  ;;  %1029 = vmatprep.mubr.f32.mxu1 %v5764_v0 }
 0x1b8   :  { %4213 = vmatpush1.bf16.msra.mxu0 %v5935_v60  ;;  %4245 = vmatpush1.bf16.msra.mxu1 %v5939_v63 }
 0x1b9   :  { %4215 = vmatprep.subr.bf16.mxu0 %v5943_v3  ;;  %4247 = vmatprep.subr.bf16.mxu1 %v5946_v6 }
 0x1bc   :  { %4217 = vmatpush1.bf16.msra.mxu0 %v5949_v10  ;;  %4249 = vmatpush1.bf16.msra.mxu1 %v5953_v13 }
 0x1bd   :  { %4219 = vmatprep.subr.bf16.mxu0 %v5957_v16  ;;  %4251 = vmatprep.subr.bf16.mxu1 %v5960_v19 }
 0x1c0   :  { %4221 = vmatpush1.bf16.msra.mxu0 %v5963_v23  ;;  %4253 = vmatpush1.bf16.msra.mxu1 %v5967_v26 }
 0x1c1   :  { %4223 = vmatprep.subr.bf16.mxu0 %v5971_v29  ;;  %4255 = vmatprep.subr.bf16.mxu1 %v5974_v32 }
 0x1c4   :  { %4225 = vmatpush1.bf16.msra.mxu0 %v5977_v36  ;;  %4257 = vmatpush1.bf16.msra.mxu1 %v5981_v40 }
 0x1c5   :  { %4227 = vmatprep.subr.bf16.mxu0 %v5985_v44  ;;  %4259 = vmatprep.subr.bf16.mxu1 %v5988_v48 }
 0x1c8   :  { %4229 = vmatpush1.bf16.msra.mxu0 %v5991_v54  ;;  %4261 = vmatpush1.bf16.msra.mxu1 %v5995_v58 }
 0x1c9   :  { %4231 = vmatprep.subr.bf16.mxu0 %v5999_v62  ;;  %4263 = vmatprep.subr.bf16.mxu1 %v6002_v4 }
 0x1cc   :  { %4233 = vmatpush1.bf16.msra.mxu0 %v6005_v9  ;;  %4265 = vmatpush1.bf16.msra.mxu1 %v6009_v14 }
 0x1cd   :  { %4235 = vmatprep.subr.bf16.mxu0 %v6013_v18  ;;  %4267 = vmatprep.subr.bf16.mxu1 %v6016_v22 }
 0x1d0   :  { %4237 = vmatpush1.bf16.msra.mxu0 %v6019_v25  ;;  %4269 = vmatpush1.bf16.msra.mxu1 %v6023_v27 }
 0x1d1   :  { %4271 = vmatprep.subr.bf16.mxu0 %v5920_v38  ;;  %4303 = vmatprep.subr.bf16.mxu1 %v5922_v41 }
 0x286   :  { %v783_v49 = vpop.f32.mrb[2].mxu0  ;;  %v854_v51 = vpop.f32.mrb[2].mxu1 }
 0x287   :  { %v5192_v52 = vadd.f32 %v783_v49, %v6079_v35  ;;  %v785_v57 = vpop.f32.mrb[3].mxu0  ;;  %v856_v61 = vpop.f32.mrb[3].mxu1  ;;  %v5208_v8 = vadd.f32 %v854_v51, %v6090_v55 }
 0x288   :  { %v5193_v2 = vadd.f32 %v785_v57, %v6083_v37  ;;  %v5209_v11 = vadd.f32 %v856_v61, %v6096_v1 }
 0x289   :  { %v3914_v5 = vmul.f32 -1.442695, %v5192_v52  ;;  %v3916_v12 = vmul.f32 -1.442695, %v5208_v8 }
 0x28a   :  { %v3915_v7 = vmul.f32 -1.442695, %v5193_v2 }
 0x28b   :  { %5348 = vpow2.f32 %v3914_v5 }
 0x28c   :  { %5350 = vpow2.f32 %v3915_v7 }
 0x28d   :  { %5352 = vtanh.f32 %v5209_v11 }
 0x28e   :  { %5354 = vpow2.f32 %v3916_v12 }
 0x295   :  { %v5349_v15 = vpop.eup %5348 }
 0x296   :  { %v872_v17 = vadd.f32 1.0, %v5349_v15  ;;  %v5351_v20 = vpop.eup %5350 }
 0x297   :  { %v873_v21 = vadd.f32 1.0, %v5351_v20  ;;  %v5353_v24 = vpop.eup %5352 }
 0x298   :  { %5356 = vrcp.f32 %v872_v17  ;;  %v5355_v28 = vpop.eup %5354 }
 0x299   :  { %5358 = vrcp.f32 %v873_v21  ;;  %v874_v49 = vadd.f32 1.0, %v5355_v28 }
 0x29b   :  { %5360 = vrcp.f32 %v874_v49 }
 0x2a2   :  { %v5357_v39 = vpop.eup %5356 }
 0x2a3   :  { %v883_v43 = vmul.f32 %v5357_v39, %v5353_v24  ;;  %v5359_v45 = vpop.eup %5358 }
 0x2a4   :  { %v882_v52 = vmul.f32 %v5359_v45, %v6099_v33 }
 0x2a5   :  { %v5361_v57 = vpop.eup %5360 }
 0x2a6   :  { %v6145_v51 = vadd.f32 %v883_v43, %v882_v52 }
 0x2a8   :  { %5362 = vtanh.f32 %v6145_v51 }
 0x2b2   :  { %v5363_v61 = vpop.eup %5362 }
 0x2b3   :  { %v6148_v2 = vmul.f32 %v5363_v61, %v5361_v57 }
 0x2b5   :  { %959 = vmatmul.mubr.f32.vlgmr.msra.gmra.mrb[4].mxu0 %v6148_v2  ;;  %1030 = vmatmul.mubr.f32.vlgmr.msra.gmra.mrb[4].mxu1 %v6148_v2 }
 0x2b6   :  { %4273 = vmatpush1.bf16.msra.mxu0 %v5924_v47  ;;  %4305 = vmatpush1.bf16.msra.mxu1 %v5927_v50 }
 0x2b7   :  { %4275 = vmatprep.subr.bf16.mxu0 %v5930_v53  ;;  %4307 = vmatprep.subr.bf16.mxu1 %v5932_v56 }
 0x2b8   :  { %1135 = vmatprep.mubr.f32.mxu0 %v5764_v0  ;;  %1206 = vmatprep.mubr.f32.mxu1 %v5764_v0 }
 0x2ba   :  { %4277 = vmatpush1.bf16.msra.mxu0 %v5935_v60  ;;  %4309 = vmatpush1.bf16.msra.mxu1 %v5939_v63 }
 0x2bb   :  { %4279 = vmatprep.subr.bf16.mxu0 %v5943_v3  ;;  %4311 = vmatprep.subr.bf16.mxu1 %v5946_v6 }
 0x2be   :  { %4281 = vmatpush1.bf16.msra.mxu0 %v5949_v10  ;;  %4313 = vmatpush1.bf16.msra.mxu1 %v5953_v13 }
 0x2bf   :  { %4283 = vmatprep.subr.bf16.mxu0 %v5957_v16  ;;  %4315 = vmatprep.subr.bf16.mxu1 %v5960_v19 }
 0x2c2   :  { %4285 = vmatpush1.bf16.msra.mxu0 %v5963_v23  ;;  %4317 = vmatpush1.bf16.msra.mxu1 %v5967_v26 }
 0x2c3   :  { %4287 = vmatprep.subr.bf16.mxu0 %v5971_v29  ;;  %4319 = vmatprep.subr.bf16.mxu1 %v5974_v32 }
 0x2c6   :  { %4289 = vmatpush1.bf16.msra.mxu0 %v5977_v36  ;;  %4321 = vmatpush1.bf16.msra.mxu1 %v5981_v40 }
 0x2c7   :  { %4291 = vmatprep.subr.bf16.mxu0 %v5985_v44  ;;  %4323 = vmatprep.subr.bf16.mxu1 %v5988_v48 }
 0x2ca   :  { %4293 = vmatpush1.bf16.msra.mxu0 %v5991_v54  ;;  %4325 = vmatpush1.bf16.msra.mxu1 %v5995_v58 }
 0x2cb   :  { %4295 = vmatprep.subr.bf16.mxu0 %v5999_v62  ;;  %4327 = vmatprep.subr.bf16.mxu1 %v6002_v4 }
 0x2ce   :  { %4297 = vmatpush1.bf16.msra.mxu0 %v6005_v9  ;;  %4329 = vmatpush1.bf16.msra.mxu1 %v6009_v14 }
 0x2cf   :  { %4299 = vmatprep.subr.bf16.mxu0 %v6013_v18  ;;  %4331 = vmatprep.subr.bf16.mxu1 %v6016_v22 }
 0x2d2   :  { %4301 = vmatpush1.bf16.msra.mxu0 %v6019_v25  ;;  %4333 = vmatpush1.bf16.msra.mxu1 %v6023_v27 }
 0x2d3   :  { %4335 = vmatprep.subr.bf16.mxu0 %v5920_v38  ;;  %4367 = vmatprep.subr.bf16.mxu1 %v5922_v41 }
 0x388   :  { %v960_v33 = vpop.f32.mrb[4].mxu0  ;;  %v1031_v5 = vpop.f32.mrb[4].mxu1 }
 0x389   :  { %v5194_v7 = vadd.f32 %v960_v33, %v6079_v35  ;;  %v962_v8 = vpop.f32.mrb[5].mxu0  ;;  %v1033_v11 = vpop.f32.mrb[5].mxu1  ;;  %v5210_v20 = vadd.f32 %v1031_v5, %v6090_v55 }
 0x38a   :  { %v5195_v12 = vadd.f32 %v962_v8, %v6083_v37  ;;  %v5211_v21 = vadd.f32 %v1033_v11, %v6096_v1 }
 0x38b   :  { %v3917_v15 = vmul.f32 -1.442695, %v5194_v7  ;;  %v3919_v24 = vmul.f32 -1.442695, %v5210_v20 }
 0x38c   :  { %v3918_v17 = vmul.f32 -1.442695, %v5195_v12 }
 0x38d   :  { %5364 = vpow2.f32 %v3917_v15 }
 0x38e   :  { %5366 = vpow2.f32 %v3918_v17 }
 0x38f   :  { %5368 = vtanh.f32 %v5211_v21 }
 0x390   :  { %5370 = vpow2.f32 %v3919_v24 }
 0x397   :  { %v5365_v28 = vpop.eup %5364 }
 0x398   :  { %v1049_v39 = vadd.f32 1.0, %v5365_v28  ;;  %v5367_v43 = vpop.eup %5366 }
 0x399   :  { %v1050_v45 = vadd.f32 1.0, %v5367_v43  ;;  %v5369_v49 = vpop.eup %5368 }
 0x39a   :  { %5372 = vrcp.f32 %v1049_v39  ;;  %v5371_v52 = vpop.eup %5370 }
 0x39b   :  { %5374 = vrcp.f32 %v1050_v45  ;;  %v1051_v7 = vadd.f32 1.0, %v5371_v52 }
 0x39d   :  { %5376 = vrcp.f32 %v1051_v7 }
 0x3a4   :  { %v5373_v57 = vpop.eup %5372 }
 0x3a5   :  { %v1060_v61 = vmul.f32 %v5373_v57, %v5369_v49  ;;  %v5375_v33 = vpop.eup %5374 }
 0x3a6   :  { %v1059_v8 = vmul.f32 %v5375_v33, %v6145_v51 }
 0x3a7   :  { %v5377_v11 = vpop.eup %5376 }
 0x3a8   :  { %v6191_v5 = vadd.f32 %v1060_v61, %v1059_v8 }
 0x3aa   :  { %5378 = vtanh.f32 %v6191_v5 }
 0x3b4   :  { %v5379_v12 = vpop.eup %5378 }
 0x3b5   :  { %v6194_v15 = vmul.f32 %v5379_v12, %v5377_v11 }
 0x3b7   :  { %1136 = vmatmul.mubr.f32.vlgmr.msra.gmra.mrb[6].mxu0 %v6194_v15  ;;  %1207 = vmatmul.mubr.f32.vlgmr.msra.gmra.mrb[6].mxu1 %v6194_v15 }
 0x3b8   :  { %4337 = vmatpush1.bf16.msra.mxu0 %v5924_v47  ;;  %4369 = vmatpush1.bf16.msra.mxu1 %v5927_v50 }
 0x3b9   :  { %4339 = vmatprep.subr.bf16.mxu0 %v5930_v53  ;;  %4371 = vmatprep.subr.bf16.mxu1 %v5932_v56 }
 0x3ba   :  { %1312 = vmatprep.mubr.f32.mxu0 %v5764_v0  ;;  %1383 = vmatprep.mubr.f32.mxu1 %v5764_v0 }
 0x3bc   :  { %4341 = vmatpush1.bf16.msra.mxu0 %v5935_v60  ;;  %4373 = vmatpush1.bf16.msra.mxu1 %v5939_v63 }
 0x3bd   :  { %4343 = vmatprep.subr.bf16.mxu0 %v5943_v3  ;;  %4375 = vmatprep.subr.bf16.mxu1 %v5946_v6 }
 0x3c0   :  { %4345 = vmatpush1.bf16.msra.mxu0 %v5949_v10  ;;  %4377 = vmatpush1.bf16.msra.mxu1 %v5953_v13 }
 0x3c1   :  { %4347 = vmatprep.subr.bf16.mxu0 %v5957_v16  ;;  %4379 = vmatprep.subr.bf16.mxu1 %v5960_v19 }
 0x3c4   :  { %4349 = vmatpush1.bf16.msra.mxu0 %v5963_v23  ;;  %4381 = vmatpush1.bf16.msra.mxu1 %v5967_v26 }
 0x3c5   :  { %4351 = vmatprep.subr.bf16.mxu0 %v5971_v29  ;;  %4383 = vmatprep.subr.bf16.mxu1 %v5974_v32 }
 0x3c8   :  { %4353 = vmatpush1.bf16.msra.mxu0 %v5977_v36  ;;  %4385 = vmatpush1.bf16.msra.mxu1 %v5981_v40 }
 0x3c9   :  { %4355 = vmatprep.subr.bf16.mxu0 %v5985_v44  ;;  %4387 = vmatprep.subr.bf16.mxu1 %v5988_v48 }
 0x3cc   :  { %4357 = vmatpush1.bf16.msra.mxu0 %v5991_v54  ;;  %4389 = vmatpush1.bf16.msra.mxu1 %v5995_v58 }
 0x3cd   :  { %4359 = vmatprep.subr.bf16.mxu0 %v5999_v62  ;;  %4391 = vmatprep.subr.bf16.mxu1 %v6002_v4 }
 0x3d0   :  { %4361 = vmatpush1.bf16.msra.mxu0 %v6005_v9  ;;  %4393 = vmatpush1.bf16.msra.mxu1 %v6009_v14 }
 0x3d1   :  { %4363 = vmatprep.subr.bf16.mxu0 %v6013_v18  ;;  %4395 = vmatprep.subr.bf16.mxu1 %v6016_v22 }
 0x3d4   :  { %4365 = vmatpush1.bf16.msra.mxu0 %v6019_v25  ;;  %4397 = vmatpush1.bf16.msra.mxu1 %v6023_v27 }
 0x3d5   :  { %4399 = vmatprep.subr.bf16.mxu0 %v5920_v38  ;;  %4431 = vmatprep.subr.bf16.mxu1 %v5922_v41 }
 0x48a   :  { %v1137_v51 = vpop.f32.mrb[6].mxu0  ;;  %v1208_v17 = vpop.f32.mrb[6].mxu1 }
 0x48b   :  { %v5196_v20 = vadd.f32 %v1137_v51, %v6079_v35  ;;  %v1139_v21 = vpop.f32.mrb[7].mxu0  ;;  %v1210_v24 = vpop.f32.mrb[7].mxu1  ;;  %v5212_v45 = vadd.f32 %v1208_v17, %v6090_v55 }
 0x48c   :  { %v5197_v28 = vadd.f32 %v1139_v21, %v6083_v37  ;;  %v5213_v49 = vadd.f32 %v1210_v24, %v6096_v1 }
 0x48d   :  { %v3920_v39 = vmul.f32 -1.442695, %v5196_v20  ;;  %v3922_v52 = vmul.f32 -1.442695, %v5212_v45 }
 0x48e   :  { %v3921_v43 = vmul.f32 -1.442695, %v5197_v28 }
 0x48f   :  { %5380 = vpow2.f32 %v3920_v39 }
 0x490   :  { %5382 = vpow2.f32 %v3921_v43 }
 0x491   :  { %5384 = vtanh.f32 %v5213_v49 }
 0x492   :  { %5386 = vpow2.f32 %v3922_v52 }
 0x499   :  { %v5381_v57 = vpop.eup %5380 }
 0x49a   :  { %v1226_v61 = vadd.f32 1.0, %v5381_v57  ;;  %v5383_v33 = vpop.eup %5382 }
 0x49b   :  { %v1227_v7 = vadd.f32 1.0, %v5383_v33  ;;  %v5385_v8 = vpop.eup %5384 }
 0x49c   :  { %5388 = vrcp.f32 %v1226_v61  ;;  %v5387_v11 = vpop.eup %5386 }
 0x49d   :  { %5390 = vrcp.f32 %v1227_v7  ;;  %v1228_v21 = vadd.f32 1.0, %v5387_v11 }
 0x49f   :  { %5392 = vrcp.f32 %v1228_v21 }
 0x4a6   :  { %v5389_v12 = vpop.eup %5388 }
 0x4a7   :  { %v1237_v51 = vmul.f32 %v5389_v12, %v5385_v8  ;;  %v5391_v20 = vpop.eup %5390 }
 0x4a8   :  { %v1236_v28 = vmul.f32 %v5391_v20, %v6191_v5 }
 0x4a9   :  { %v5393_v24 = vpop.eup %5392 }
 0x4aa   :  { %v6237_v17 = vadd.f32 %v1237_v51, %v1236_v28 }
 0x4ac   :  { %5394 = vtanh.f32 %v6237_v17 }
 0x4b6   :  { %v5395_v39 = vpop.eup %5394 }
 0x4b7   :  { %v6240_v43 = vmul.f32 %v5395_v39, %v5393_v24 }
 0x4b9   :  { %1313 = vmatmul.mubr.f32.vlgmr.msra.gmra.mrb[8].mxu0 %v6240_v43  ;;  %1384 = vmatmul.mubr.f32.vlgmr.msra.gmra.mrb[8].mxu1 %v6240_v43 }
 0x4ba   :  { %4401 = vmatpush1.bf16.msra.mxu0 %v5924_v47  ;;  %4433 = vmatpush1.bf16.msra.mxu1 %v5927_v50 }
 0x4bb   :  { %4403 = vmatprep.subr.bf16.mxu0 %v5930_v53  ;;  %4435 = vmatprep.subr.bf16.mxu1 %v5932_v56 }
 0x4bc   :  { %1489 = vmatprep.mubr.f32.mxu0 %v5764_v0  ;;  %1560 = vmatprep.mubr.f32.mxu1 %v5764_v0 }
 0x4be   :  { %4405 = vmatpush1.bf16.msra.mxu0 %v5935_v60  ;;  %4437 = vmatpush1.bf16.msra.mxu1 %v5939_v63 }
 0x4bf   :  { %4407 = vmatprep.subr.bf16.mxu0 %v5943_v3  ;;  %4439 = vmatprep.subr.bf16.mxu1 %v5946_v6 }
 0x4c2   :  { %4409 = vmatpush1.bf16.msra.mxu0 %v5949_v10  ;;  %4441 = vmatpush1.bf16.msra.mxu1 %v5953_v13 }
 0x4c3   :  { %4411 = vmatprep.subr.bf16.mxu0 %v5957_v16  ;;  %4443 = vmatprep.subr.bf16.mxu1 %v5960_v19 }
 0x4c6   :  { %4413 = vmatpush1.bf16.msra.mxu0 %v5963_v23  ;;  %4445 = vmatpush1.bf16.msra.mxu1 %v5967_v26 }
 0x4c7   :  { %4415 = vmatprep.subr.bf16.mxu0 %v5971_v29  ;;  %4447 = vmatprep.subr.bf16.mxu1 %v5974_v32 }
 0x4ca   :  { %4417 = vmatpush1.bf16.msra.mxu0 %v5977_v36  ;;  %4449 = vmatpush1.bf16.msra.mxu1 %v5981_v40 }
 0x4cb   :  { %4419 = vmatprep.subr.bf16.mxu0 %v5985_v44  ;;  %4451 = vmatprep.subr.bf16.mxu1 %v5988_v48 }
 0x4ce   :  { %4421 = vmatpush1.bf16.msra.mxu0 %v5991_v54  ;;  %4453 = vmatpush1.bf16.msra.mxu1 %v5995_v58 }
 0x4cf   :  { %4423 = vmatprep.subr.bf16.mxu0 %v5999_v62  ;;  %4455 = vmatprep.subr.bf16.mxu1 %v6002_v4 }
 0x4d2   :  { %4425 = vmatpush1.bf16.msra.mxu0 %v6005_v9  ;;  %4457 = vmatpush1.bf16.msra.mxu1 %v6009_v14 }
 0x4d3   :  { %4427 = vmatprep.subr.bf16.mxu0 %v6013_v18  ;;  %4459 = vmatprep.subr.bf16.mxu1 %v6016_v22 }
 0x4d6   :  { %4429 = vmatpush1.bf16.msra.mxu0 %v6019_v25  ;;  %4461 = vmatpush1.bf16.msra.mxu1 %v6023_v27 }
 0x4d7   :  { %4463 = vmatprep.subr.bf16.mxu0 %v5920_v38  ;;  %4495 = vmatprep.subr.bf16.mxu1 %v5922_v41 }
 0x58c   :  { %v1314_v5 = vpop.f32.mrb[8].mxu0  ;;  %v1385_v45 = vpop.f32.mrb[8].mxu1 }
 0x58d   :  { %v5198_v49 = vadd.f32 %v1314_v5, %v6079_v35  ;;  %v1316_v52 = vpop.f32.mrb[9].mxu0  ;;  %v1387_v57 = vpop.f32.mrb[9].mxu1  ;;  %v5214_v8 = vadd.f32 %v1385_v45, %v6090_v55 }
 0x58e   :  { %v5199_v61 = vadd.f32 %v1316_v52, %v6083_v37  ;;  %v5215_v11 = vadd.f32 %v1387_v57, %v6096_v1 }
 0x58f   :  { %v3923_v33 = vmul.f32 -1.442695, %v5198_v49  ;;  %v3925_v12 = vmul.f32 -1.442695, %v5214_v8 }
 0x590   :  { %v3924_v7 = vmul.f32 -1.442695, %v5199_v61 }
 0x591   :  { %5396 = vpow2.f32 %v3923_v33 }
 0x592   :  { %5398 = vpow2.f32 %v3924_v7 }
 0x593   :  { %5400 = vtanh.f32 %v5215_v11 }
 0x594   :  { %5402 = vpow2.f32 %v3925_v12 }
 0x59b   :  { %v5397_v51 = vpop.eup %5396 }
 0x59c   :  { %v1403_v20 = vadd.f32 1.0, %v5397_v51  ;;  %v5399_v21 = vpop.eup %5398 }
 0x59d   :  { %v1404_v28 = vadd.f32 1.0, %v5399_v21  ;;  %v5401_v24 = vpop.eup %5400 }
 0x59e   :  { %5404 = vrcp.f32 %v1403_v20  ;;  %v5403_v39 = vpop.eup %5402 }
 0x59f   :  { %5406 = vrcp.f32 %v1404_v28  ;;  %v1405_v61 = vadd.f32 1.0, %v5403_v39 }
 0x5a1   :  { %5408 = vrcp.f32 %v1405_v61 }
 0x5a8   :  { %v5405_v5 = vpop.eup %5404 }
 0x5a9   :  { %v1414_v49 = vmul.f32 %v5405_v5, %v5401_v24  ;;  %v5407_v52 = vpop.eup %5406 }
 0x5aa   :  { %v1413_v33 = vmul.f32 %v5407_v52, %v6237_v17 }
 0x5ab   :  { %v5409_v57 = vpop.eup %5408 }
 0x5ac   :  { %v6283_v45 = vadd.f32 %v1414_v49, %v1413_v33 }
 0x5ae   :  { %5410 = vtanh.f32 %v6283_v45 }
 0x5b8   :  { %v5411_v7 = vpop.eup %5410 }
 0x5b9   :  { %v6286_v8 = vmul.f32 %v5411_v7, %v5409_v57 }
 0x5bb   :  { %1490 = vmatmul.mubr.f32.vlgmr.msra.gmra.mrb[10].mxu0 %v6286_v8  ;;  %1561 = vmatmul.mubr.f32.vlgmr.msra.gmra.mrb[10].mxu1 %v6286_v8 }
 0x5bc   :  { %4465 = vmatpush1.bf16.msra.mxu0 %v5924_v47  ;;  %4497 = vmatpush1.bf16.msra.mxu1 %v5927_v50 }
 0x5bd   :  { %4467 = vmatprep.subr.bf16.mxu0 %v5930_v53  ;;  %4499 = vmatprep.subr.bf16.mxu1 %v5932_v56 }
 0x5be   :  { %1666 = vmatprep.mubr.f32.mxu0 %v5764_v0  ;;  %1737 = vmatprep.mubr.f32.mxu1 %v5764_v0 }
 0x5c0   :  { %4469 = vmatpush1.bf16.msra.mxu0 %v5935_v60  ;;  %4501 = vmatpush1.bf16.msra.mxu1 %v5939_v63 }
 0x5c1   :  { %4471 = vmatprep.subr.bf16.mxu0 %v5943_v3  ;;  %4503 = vmatprep.subr.bf16.mxu1 %v5946_v6 }
 0x5c4   :  { %4473 = vmatpush1.bf16.msra.mxu0 %v5949_v10  ;;  %4505 = vmatpush1.bf16.msra.mxu1 %v5953_v13 }
 0x5c5   :  { %4475 = vmatprep.subr.bf16.mxu0 %v5957_v16  ;;  %4507 = vmatprep.subr.bf16.mxu1 %v5960_v19 }
 0x5c8   :  { %4477 = vmatpush1.bf16.msra.mxu0 %v5963_v23  ;;  %4509 = vmatpush1.bf16.msra.mxu1 %v5967_v26 }
 0x5c9   :  { %4479 = vmatprep.subr.bf16.mxu0 %v5971_v29  ;;  %4511 = vmatprep.subr.bf16.mxu1 %v5974_v32 }
 0x5cc   :  { %4481 = vmatpush1.bf16.msra.mxu0 %v5977_v36  ;;  %4513 = vmatpush1.bf16.msra.mxu1 %v5981_v40 }
 0x5cd   :  { %4483 = vmatprep.subr.bf16.mxu0 %v5985_v44  ;;  %4515 = vmatprep.subr.bf16.mxu1 %v5988_v48 }
 0x5d0   :  { %4485 = vmatpush1.bf16.msra.mxu0 %v5991_v54  ;;  %4517 = vmatpush1.bf16.msra.mxu1 %v5995_v58 }
 0x5d1   :  { %4487 = vmatprep.subr.bf16.mxu0 %v5999_v62  ;;  %4519 = vmatprep.subr.bf16.mxu1 %v6002_v4 }
 0x5d4   :  { %4489 = vmatpush1.bf16.msra.mxu0 %v6005_v9  ;;  %4521 = vmatpush1.bf16.msra.mxu1 %v6009_v14 }
 0x5d5   :  { %4491 = vmatprep.subr.bf16.mxu0 %v6013_v18  ;;  %4523 = vmatprep.subr.bf16.mxu1 %v6016_v22 }
 0x5d8   :  { %4493 = vmatpush1.bf16.msra.mxu0 %v6019_v25  ;;  %4525 = vmatpush1.bf16.msra.mxu1 %v6023_v27 }
 0x5d9   :  { %4527 = vmatprep.subr.bf16.mxu0 %v5920_v38  ;;  %4559 = vmatprep.subr.bf16.mxu1 %v5922_v41 }
 0x68e   :  { %v1491_v17 = vpop.f32.mrb[10].mxu0  ;;  %v1562_v11 = vpop.f32.mrb[10].mxu1 }
 0x68f   :  { %v5200_v12 = vadd.f32 %v1491_v17, %v6079_v35  ;;  %v1493_v51 = vpop.f32.mrb[11].mxu0  ;;  %v1564_v20 = vpop.f32.mrb[11].mxu1  ;;  %v5216_v39 = vadd.f32 %v1562_v11, %v6090_v55 }
 0x690   :  { %v5201_v21 = vadd.f32 %v1493_v51, %v6083_v37  ;;  %v5217_v5 = vadd.f32 %v1564_v20, %v6096_v1 }
 0x691   :  { %v3926_v28 = vmul.f32 -1.442695, %v5200_v12  ;;  %v3928_v49 = vmul.f32 -1.442695, %v5216_v39  ;;  %v1961_v39 = vld [vmem:[#allocation10 + $0x10] sm:$0xff] }
 0x692   :  { %v3927_v24 = vmul.f32 -1.442695, %v5201_v21 }
 0x693   :  { %5412 = vpow2.f32 %v3926_v28 }
 0x694   :  { %5414 = vpow2.f32 %v3927_v24 }
 0x695   :  { %5416 = vtanh.f32 %v5217_v5  ;;  %v1965_v5 = vld [vmem:[#allocation10 + $0x30] sm:$0xff] }
 0x696   :  { %5418 = vpow2.f32 %v3928_v49  ;;  %v1968_v49 = vld [vmem:[#allocation10 + $0x48] sm:$0xff] }
 0x69d   :  { %v5413_v38 = vpop.eup %5412 }
 0x69e   :  { %v1580_v52 = vadd.f32 1.0, %v5413_v38  ;;  %v5415_v41 = vpop.eup %5414  ;;  %v1972_v38 = vld [vmem:[#allocation10 + $0x68] sm:$0xff] }
 0x69f   :  { %v1581_v61 = vadd.f32 1.0, %v5415_v41  ;;  %v5417_v33 = vpop.eup %5416  ;;  %v1974_v41 = vld [vmem:[#allocation10 + $0x78] sm:$0xff] }
 0x6a0   :  { %5420 = vrcp.f32 %v1580_v52  ;;  %v5419_v57 = vpop.eup %5418  ;;  %v1970_v52 = vld [vmem:[#allocation10 + $0x58] sm:$0xff] }
 0x6a1   :  { %5422 = vrcp.f32 %v1581_v61  ;;  %v1582_v51 = vadd.f32 1.0, %v5419_v57 }
 0x6a3   :  { %5424 = vrcp.f32 %v1582_v51 }
 0x6aa   :  { %v5421_v7 = vpop.eup %5420 }
 0x6ab   :  { %v1591_v17 = vmul.f32 %v5421_v7, %v5417_v33  ;;  %v5423_v12 = vpop.eup %5422  ;;  %v4624_v7 = vpack.c.bf16 %v1965_v5, %v1961_v39  ;;  %v1991_v39 = vld [vmem:[#allocation10 + $0x100] sm:$0xff] }
 0x6ac   :  { %v1590_v21 = vmul.f32 %v5423_v12, %v6283_v45  ;;  %v1963_v45 = vld [vmem:[#allocation10 + $0x20] sm:$0xff] }
 0x6ad   :  { %v5425_v20 = vpop.eup %5424  ;;  %v1971_v12 = vld [vmem:[#allocation10 + $0x60] sm:$0xff] }
 0x6ae   :  { %v6329_v11 = vadd.f32 %v1591_v17, %v1590_v21  ;;  %v1967_v17 = vld [vmem:[#allocation10 + $0x40] sm:$0xff]  ;;  %v4594_v21 = vpack.c.bf16 %v1972_v38, %v1968_v49 }
 0x6af   :  { %v1995_v5 = vld [vmem:[#allocation10 + $0x120] sm:$0xff] }
 0x6b0   :  { %5426 = vtanh.f32 %v6329_v11 }
 0x6ba   :  { %v5427_v28 = vpop.eup %5426 }
 0x6bb   :  { %v6332_v24 = vmul.f32 %v5427_v28, %v5425_v20  ;;  %v1969_v20 = vld [vmem:[#allocation10 + $0x50] sm:$0xff] }
 0x6bc   :  { %v1973_v28 = vld [vmem:[#allocation10 + $0x70] sm:$0xff] }
 0x6bd   :  { %1667 = vmatmul.mubr.f32.vlgmr.msra.gmra.mrb[12].mxu0 %v6332_v24  ;;  %1738 = vmatmul.mubr.f32.vlgmr.msra.gmra.mrb[12].mxu1 %v6332_v24 }
 0x6be   :  { %4529 = vmatpush1.bf16.msra.mxu0 %v5924_v47  ;;  %4561 = vmatpush1.bf16.msra.mxu1 %v5927_v50  ;;  %v1960_v47 = vld [vmem:[#allocation10 + $0x8] sm:$0xff] }
 0x6bf   :  { %4531 = vmatprep.subr.bf16.mxu0 %v5930_v53  ;;  %4563 = vmatprep.subr.bf16.mxu1 %v5932_v56  ;;  %v1964_v50 = vld [vmem:[#allocation10 + $0x28] sm:$0xff]  ;;  %v1962_v53 = vld [vmem:[#allocation10 + $0x18] sm:$0xff] }
 0x6c0   :  { %1843 = vmatprep.mubr.f32.mxu0 %v5764_v0  ;;  %1914 = vmatprep.mubr.f32.mxu1 %v5764_v0  ;;  %v4590_v56 = vpack.c.bf16 %v1964_v50, %v1960_v47  ;;  %v1976_v47 = vld [vmem:[#allocation10 + $0x88] sm:$0xff] }
 0x6c1   :  { %v1980_v50 = vld [vmem:[#allocation10 + $0xa8] sm:$0xff] }
 0x6c2   :  { %4533 = vmatpush1.bf16.msra.mxu0 %v5935_v60  ;;  %4565 = vmatpush1.bf16.msra.mxu1 %v5939_v63  ;;  %v1966_v60 = vld [vmem:[#allocation10 + $0x38] sm:$0xff] }
 0x6c3   :  { %4535 = vmatprep.subr.bf16.mxu0 %v5943_v3  ;;  %4567 = vmatprep.subr.bf16.mxu1 %v5946_v6  ;;  %v4622_v63 = vpack.c.bf16 %v1966_v60, %v1962_v53  ;;  %v1978_v53 = vld [vmem:[#allocation10 + $0x98] sm:$0xff]  ;;  %v4596_v60 = vpack.c.bf16 %v1971_v12, %v1967_v17  ;;  %v4608_v17 = vpack.c.bf16 %v1995_v5, %v1991_v39  ;;  %v2305_v5 = vld [vmem:[#allocation12 + $0x10] sm:$0xff] }
 0x6c6   :  { %4537 = vmatpush1.bf16.msra.mxu0 %v5949_v10  ;;  %4569 = vmatpush1.bf16.msra.mxu1 %v5953_v13 }
 0x6c7   :  { %4539 = vmatprep.subr.bf16.mxu0 %v5957_v16  ;;  %4571 = vmatprep.subr.bf16.mxu1 %v5960_v19 }
 0x6ca   :  { %4541 = vmatpush1.bf16.msra.mxu0 %v5963_v23  ;;  %4573 = vmatpush1.bf16.msra.mxu1 %v5967_v26 }
 0x6cb   :  { %4543 = vmatprep.subr.bf16.mxu0 %v5971_v29  ;;  %4575 = vmatprep.subr.bf16.mxu1 %v5974_v32 }
 0x6ce   :  { %4545 = vmatpush1.bf16.msra.mxu0 %v5977_v36  ;;  %4577 = vmatpush1.bf16.msra.mxu1 %v5981_v40 }
 0x6cf   :  { %4547 = vmatprep.subr.bf16.mxu0 %v5985_v44  ;;  %4579 = vmatprep.subr.bf16.mxu1 %v5988_v48 }
 0x6d2   :  { %4549 = vmatpush1.bf16.msra.mxu0 %v5991_v54  ;;  %4581 = vmatpush1.bf16.msra.mxu1 %v5995_v58 }
 0x6d3   :  { %4551 = vmatprep.subr.bf16.mxu0 %v5999_v62  ;;  %4583 = vmatprep.subr.bf16.mxu1 %v6002_v4 }
 0x6d6   :  { %4553 = vmatpush1.bf16.msra.mxu0 %v6005_v9  ;;  %4585 = vmatpush1.bf16.msra.mxu1 %v6009_v14 }
 0x6d7   :  { %4555 = vmatprep.subr.bf16.mxu0 %v6013_v18  ;;  %4587 = vmatprep.subr.bf16.mxu1 %v6016_v22 }
 0x6da   :  { %4557 = vmatpush1.bf16.msra.mxu0 %v6019_v25  ;;  %4589 = vmatpush1.bf16.msra.mxu1 %v6023_v27  ;;  %v1959_v27 = vld [vmem:[#allocation10] sm:$0xff] }
 0x6db   :  { %4591 = vmatprep.subr.bf16.mxu0 %v4590_v56  ;;  %4623 = vmatprep.subr.bf16.mxu1 %v4622_v63  ;;  %v4592_v57 = vpack.c.bf16 %v1963_v45, %v1959_v27  ;;  %v1982_v56 = vld [vmem:[#allocation10 + $0xb8] sm:$0xff]  ;;  %v4628_v63 = vpack.c.bf16 %v1973_v28, %v1969_v20 }
 0x790   :  { %v1668_v3 = vpop.f32.mrb[12].mxu0  ;;  %v1739_v6 = vpop.f32.mrb[12].mxu1 }
 0x791   :  { %v5202_v10 = vadd.f32 %v1668_v3, %v6079_v35  ;;  %v1670_v13 = vpop.f32.mrb[13].mxu0  ;;  %v1741_v16 = vpop.f32.mrb[13].mxu1  ;;  %v5218_v29 = vadd.f32 %v1739_v6, %v6090_v55  ;;  %v1975_v3 = vld [vmem:[#allocation10 + $0x80] sm:$0xff] }
 0x792   :  { %v5203_v19 = vadd.f32 %v1670_v13, %v6083_v37  ;;  %v5219_v32 = vadd.f32 %v1741_v16, %v6096_v1  ;;  %v1979_v6 = vld [vmem:[#allocation10 + $0xa0] sm:$0xff]  ;;  %v4630_v13 = vpack.c.bf16 %v1982_v56, %v1978_v53  ;;  %v1977_v16 = vld [vmem:[#allocation10 + $0x90] sm:$0xff]  ;;  %v2008_v53 = vld [vmem:[#allocation10 + $0x188] sm:$0xff] }
 0x793   :  { %v3929_v23 = vmul.f32 -1.442695, %v5202_v10  ;;  %v3931_v36 = vmul.f32 -1.442695, %v5218_v29  ;;  %v4598_v10 = vpack.c.bf16 %v1980_v50, %v1976_v47  ;;  %v1986_v29 = vld [vmem:[#allocation10 + $0xd8] sm:$0xff]  ;;  %v2001_v47 = vld [vmem:[#allocation10 + $0x150] sm:$0xff] }
 0x794   :  { %v3930_v26 = vmul.f32 -1.442695, %v5203_v19  ;;  %v1981_v19 = vld [vmem:[#allocation10 + $0xb0] sm:$0xff]  ;;  %v2012_v56 = vld [vmem:[#allocation10 + $0x1a8] sm:$0xff] }
 0x795   :  { %5428 = vpow2.f32 %v3929_v23  ;;  %v1984_v23 = vld [vmem:[#allocation10 + $0xc8] sm:$0xff]  ;;  %v2005_v50 = vld [vmem:[#allocation10 + $0x170] sm:$0xff] }
 0x796   :  { %5430 = vpow2.f32 %v3930_v26  ;;  %v1988_v26 = vld [vmem:[#allocation10 + $0xe8] sm:$0xff] }
 0x797   :  { %5432 = vtanh.f32 %v5219_v32  ;;  %v1990_v32 = vld [vmem:[#allocation10 + $0xf8] sm:$0xff] }
 0x798   :  { %5434 = vpow2.f32 %v3931_v36  ;;  %v4600_v36 = vpack.c.bf16 %v1979_v6, %v1975_v3  ;;  %v4644_v6 = vpack.c.bf16 %v2005_v50, %v2001_v47  ;;  %v2324_v47 = vld [vmem:[#allocation12 + $0xa8] sm:$0xff]  ;;  %v2322_v50 = vld [vmem:[#allocation12 + $0x98] sm:$0xff] }
 0x79f   :  { %v5429_v40 = vpop.eup %5428 }
 0x7a0   :  { %v1757_v44 = vadd.f32 1.0, %v5429_v40  ;;  %v5431_v48 = vpop.eup %5430  ;;  %v4632_v40 = vpack.c.bf16 %v1981_v19, %v1977_v16  ;;  %v4614_v16 = vpack.c.bf16 %v2012_v56, %v2008_v53  ;;  %v2326_v56 = vld [vmem:[#allocation12 + $0xb8] sm:$0xff] }
 0x7a1   :  { %v1758_v54 = vadd.f32 1.0, %v5431_v48  ;;  %v5433_v58 = vpop.eup %5432  ;;  %v1987_v48 = vld [vmem:[#allocation10 + $0xe0] sm:$0xff] }
 0x7a2   :  { %5436 = vrcp.f32 %v1757_v44  ;;  %v5435_v62 = vpop.eup %5434  ;;  %v1983_v44 = vld [vmem:[#allocation10 + $0xc0] sm:$0xff] }
 0x7a3   :  { %5438 = vrcp.f32 %v1758_v54  ;;  %v1759_v18 = vadd.f32 1.0, %v5435_v62  ;;  %v4602_v54 = vpack.c.bf16 %v1988_v26, %v1984_v23  ;;  %v1985_v62 = vld [vmem:[#allocation10 + $0xd0] sm:$0xff]  ;;  %v4604_v27 = vpack.c.bf16 %v1987_v48, %v1983_v44 }
 0x7a4   :  { %v2009_v23 = vld [vmem:[#allocation10 + $0x190] sm:$0xff] }
 0x7a5   :  { %5440 = vrcp.f32 %v1759_v18  ;;  %v1994_v18 = vld [vmem:[#allocation10 + $0x118] sm:$0xff]  ;;  %v2013_v26 = vld [vmem:[#allocation10 + $0x1b0] sm:$0xff] }
 0x7a6   :  { %v4648_v48 = vpack.c.bf16 %v2013_v26, %v2009_v23  ;;  %v2332_v23 = vld [vmem:[#allocation12 + $0xe8] sm:$0xff]  ;;  %v2330_v26 = vld [vmem:[#allocation12 + $0xd8] sm:$0xff] }
 0x7ac   :  { %v5437_v4 = vpop.eup %5436 }
 0x7ad   :  { %v1768_v9 = vmul.f32 %v5437_v4, %v5433_v58  ;;  %v5439_v14 = vpop.eup %5438  ;;  %v4634_v58 = vpack.c.bf16 %v1990_v32, %v1986_v29  ;;  %v1989_v4 = vld [vmem:[#allocation10 + $0xf0] sm:$0xff]  ;;  %v2016_v29 = vld [vmem:[#allocation10 + $0x1c8] sm:$0xff] }
 0x7ae   :  { %v1767_v22 = vmul.f32 %v5439_v14, %v6329_v11  ;;  %v4626_v11 = vpack.c.bf16 %v1974_v41, %v1970_v52  ;;  %v1996_v14 = vld [vmem:[#allocation10 + $0x128] sm:$0xff]  ;;  %v4636_v45 = vpack.c.bf16 %v1989_v4, %v1985_v62  ;;  %v1993_v52 = vld [vmem:[#allocation10 + $0x110] sm:$0xff]  ;;  %v2019_v4 = vld [vmem:[#allocation10 + $0x1e0] sm:$0xff] }
 0x7af   :  { %v5441_v61 = vpop.eup %5440  ;;  %v1997_v41 = vld [vmem:[#allocation10 + $0x130] sm:$0xff]  ;;  %v2020_v32 = vld [vmem:[#allocation10 + $0x1e8] sm:$0xff] }
 0x7b0   :  { %v6373_v25 = vadd.f32 %v1768_v9, %v1767_v22  ;;  %v1992_v9 = vld [vmem:[#allocation10 + $0x108] sm:$0xff]  ;;  %v1998_v22 = vld [vmem:[#allocation10 + $0x138] sm:$0xff]  ;;  %v4640_v12 = vpack.c.bf16 %v1997_v41, %v1993_v52 }
 0x7b1   :  { %v4606_v49 = vpack.c.bf16 %v1996_v14, %v1992_v9  ;;  %v4638_v38 = vpack.c.bf16 %v1998_v22, %v1994_v18  ;;  %v2017_v9 = vld [vmem:[#allocation10 + $0x1d0] sm:$0xff]  ;;  %v2316_v52 = vld [vmem:[#allocation12 + $0x68] sm:$0xff]  ;;  %v2314_v41 = vld [vmem:[#allocation12 + $0x58] sm:$0xff] }
 0x7b2   :  { %5442 = vtanh.f32 %v6373_v25  ;;  %v2021_v14 = vld [vmem:[#allocation10 + $0x1f0] sm:$0xff] }
 0x7b3   :  { %v4652_v22 = vpack.c.bf16 %v2021_v14, %v2017_v9  ;;  %v2340_v9 = vld [vmem:[#allocation12 + $0x128] sm:$0xff]  ;;  %v2338_v14 = vld [vmem:[#allocation12 + $0x118] sm:$0xff] }
 0x7bc   :  { %v5443_v33 = vpop.eup %5442 }
 0x7bd   :  { %v6376_v51 = vmul.f32 %v5443_v33, %v5441_v61  ;;  %v2000_v61 = vld [vmem:[#allocation10 + $0x148] sm:$0xff] }
 0x7be   :  { %v2004_v33 = vld [vmem:[#allocation10 + $0x168] sm:$0xff] }
 0x7bf   :  { %1844 = vmatmul.mubr.f32.vlgmr.msra.gmra.mrb[14].mxu0 %v6376_v51  ;;  %1915 = vmatmul.mubr.f32.vlgmr.msra.gmra.mrb[14].mxu1 %v6376_v51  ;;  %v4610_v20 = vpack.c.bf16 %v2004_v33, %v2000_v61  ;;  %v2318_v33 = vld [vmem:[#allocation12 + $0x78] sm:$0xff] }
 0x7c0   :  { %4593 = vmatpush1.bf16.msra.mxu0 %v4592_v57  ;;  %4625 = vmatpush1.bf16.msra.mxu1 %v4624_v7  ;;  %v2002_v57 = vld [vmem:[#allocation10 + $0x158] sm:$0xff] }
 0x7c1   :  { %4595 = vmatprep.subr.bf16.mxu0 %v4594_v21  ;;  %4627 = vmatprep.subr.bf16.mxu1 %v4626_v11  ;;  %v2006_v7 = vld [vmem:[#allocation10 + $0x178] sm:$0xff]  ;;  %v1999_v21 = vld [vmem:[#allocation10 + $0x140] sm:$0xff] }
 0x7c2   :  { %2109 = vmatprep.mubr.f32.mxu0 %v5764_v0  ;;  %2222 = vmatprep.mubr.f32.mxu1 %v5764_v0  ;;  %v2003_v11 = vld [vmem:[#allocation10 + $0x160] sm:$0xff]  ;;  %v4642_v28 = vpack.c.bf16 %v2006_v7, %v2002_v57 }
 0x7c3   :  { %v4612_v3 = vpack.c.bf16 %v2003_v11, %v1999_v21  ;;  %v2311_v57 = vld [vmem:[#allocation12 + $0x40] sm:$0xff]  ;;  %v2313_v21 = vld [vmem:[#allocation12 + $0x50] sm:$0xff] }
 0x7c4   :  { %4597 = vmatpush1.bf16.msra.mxu0 %v4596_v60  ;;  %4629 = vmatpush1.bf16.msra.mxu1 %v4628_v63  ;;  %v2010_v60 = vld [vmem:[#allocation10 + $0x198] sm:$0xff]  ;;  %v2315_v7 = vld [vmem:[#allocation12 + $0x60] sm:$0xff]  ;;  %v2317_v11 = vld [vmem:[#allocation12 + $0x70] sm:$0xff] }
 0x7c5   :  { %4599 = vmatprep.subr.bf16.mxu0 %v4598_v10  ;;  %4631 = vmatprep.subr.bf16.mxu1 %v4630_v13  ;;  %v2014_v63 = vld [vmem:[#allocation10 + $0x1b8] sm:$0xff]  ;;  %v2007_v10 = vld [vmem:[#allocation10 + $0x180] sm:$0xff] }
 0x7c6   :  { %v2011_v13 = vld [vmem:[#allocation10 + $0x1a0] sm:$0xff]  ;;  %v4646_v19 = vpack.c.bf16 %v2014_v63, %v2010_v60 }
 0x7c7   :  { %v4616_v44 = vpack.c.bf16 %v2011_v13, %v2007_v10  ;;  %v2319_v60 = vld [vmem:[#allocation12 + $0x80] sm:$0xff]  ;;  %v2321_v10 = vld [vmem:[#allocation12 + $0x90] sm:$0xff] }
 0x7c8   :  { %4601 = vmatpush1.bf16.msra.mxu0 %v4600_v36  ;;  %4633 = vmatpush1.bf16.msra.mxu1 %v4632_v40  ;;  %v2018_v36 = vld [vmem:[#allocation10 + $0x1d8] sm:$0xff]  ;;  %v2323_v63 = vld [vmem:[#allocation12 + $0xa0] sm:$0xff]  ;;  %v2325_v13 = vld [vmem:[#allocation12 + $0xb0] sm:$0xff] }
 0x7c9   :  { %4603 = vmatprep.subr.bf16.mxu0 %v4602_v54  ;;  %4635 = vmatprep.subr.bf16.mxu1 %v4634_v58  ;;  %v2022_v40 = vld [vmem:[#allocation10 + $0x1f8] sm:$0xff]  ;;  %v2015_v54 = vld [vmem:[#allocation10 + $0x1c0] sm:$0xff]  ;;  %v4618_v58 = vpack.c.bf16 %v2020_v32, %v2016_v29 }
 0x7ca   :  { %v4650_v62 = vpack.c.bf16 %v2022_v40, %v2018_v36  ;;  %v4620_v18 = vpack.c.bf16 %v2019_v4, %v2015_v54  ;;  %v2334_v32 = vld [vmem:[#allocation12 + $0xf8] sm:$0xff]  ;;  %v2327_v36 = vld [vmem:[#allocation12 + $0xc0] sm:$0xff]  ;;  %v2329_v54 = vld [vmem:[#allocation12 + $0xd0] sm:$0xff] }
 0x7cb   :  { %v2331_v40 = vld [vmem:[#allocation12 + $0xe0] sm:$0xff]  ;;  %v2336_v4 = vld [vmem:[#allocation12 + $0x108] sm:$0xff] }
 0x7cc   :  { %4605 = vmatpush1.bf16.msra.mxu0 %v4604_v27  ;;  %4637 = vmatpush1.bf16.msra.mxu1 %v4636_v45  ;;  %v2303_v27 = vld [vmem:[#allocation12] sm:$0xff] }
 0x7cd   :  { %4607 = vmatprep.subr.bf16.mxu0 %v4606_v49  ;;  %4639 = vmatprep.subr.bf16.mxu1 %v4638_v38  ;;  %v2309_v49 = vld [vmem:[#allocation12 + $0x30] sm:$0xff]  ;;  %v2312_v38 = vld [vmem:[#allocation12 + $0x48] sm:$0xff] }
 0x7ce   :  { %v6422_v61 = vpack.c.bf16 %v2316_v52, %v2312_v38  ;;  %v2348_v38 = vld [vmem:[#allocation12 + $0x168] sm:$0xff]  ;;  %v2346_v52 = vld [vmem:[#allocation12 + $0x158] sm:$0xff] }
 0x7d0   :  { %4609 = vmatpush1.bf16.msra.mxu0 %v4608_v17  ;;  %4641 = vmatpush1.bf16.msra.mxu1 %v4640_v12  ;;  %v6424_v17 = vpack.c.bf16 %v2318_v33, %v2314_v41  ;;  %v6426_v12 = vpack.c.bf16 %v2315_v7, %v2311_v57  ;;  %v2350_v41 = vld [vmem:[#allocation12 + $0x178] sm:$0xff]  ;;  %v2343_v7 = vld [vmem:[#allocation12 + $0x140] sm:$0xff] }
 0x7d1   :  { %4611 = vmatprep.subr.bf16.mxu0 %v4610_v20  ;;  %4643 = vmatprep.subr.bf16.mxu1 %v4642_v28  ;;  %v6429_v20 = vpack.c.bf16 %v2317_v11, %v2313_v21  ;;  %v2320_v28 = vld [vmem:[#allocation12 + $0x88] sm:$0xff]  ;;  %v6471_v57 = vpack.c.bf16 %v2350_v41, %v2346_v52  ;;  %v2347_v21 = vld [vmem:[#allocation12 + $0x160] sm:$0xff]  ;;  %v2345_v11 = vld [vmem:[#allocation12 + $0x150] sm:$0xff] }
 0x7d2   :  { %v6434_v53 = vpack.c.bf16 %v2324_v47, %v2320_v28  ;;  %v6474_v28 = vpack.c.bf16 %v2347_v21, %v2343_v7  ;;  %v2349_v47 = vld [vmem:[#allocation12 + $0x170] sm:$0xff] }
 0x7d4   :  { %4613 = vmatpush1.bf16.msra.mxu0 %v4612_v3  ;;  %4645 = vmatpush1.bf16.msra.mxu1 %v4644_v6  ;;  %v6436_v3 = vpack.c.bf16 %v2326_v56, %v2322_v50  ;;  %v6438_v6 = vpack.c.bf16 %v2323_v63, %v2319_v60  ;;  %v2352_v50 = vld [vmem:[#allocation12 + $0x188] sm:$0xff]  ;;  %v6478_v60 = vpack.c.bf16 %v2349_v47, %v2345_v11 }
 0x7d5   :  { %4615 = vmatprep.subr.bf16.mxu0 %v4614_v16  ;;  %4647 = vmatprep.subr.bf16.mxu1 %v4646_v19  ;;  %v6441_v16 = vpack.c.bf16 %v2325_v13, %v2321_v10  ;;  %v2328_v19 = vld [vmem:[#allocation12 + $0xc8] sm:$0xff]  ;;  %v2354_v10 = vld [vmem:[#allocation12 + $0x198] sm:$0xff] }
 0x7d6   :  { %v6446_v29 = vpack.c.bf16 %v2332_v23, %v2328_v19  ;;  %v2356_v56 = vld [vmem:[#allocation12 + $0x1a8] sm:$0xff]  ;;  %v2358_v13 = vld [vmem:[#allocation12 + $0x1b8] sm:$0xff]  ;;  %v2351_v19 = vld [vmem:[#allocation12 + $0x180] sm:$0xff] }
 0x7d7   :  { %v6480_v63 = vpack.c.bf16 %v2356_v56, %v2352_v50  ;;  %v6482_v23 = vpack.c.bf16 %v2358_v13, %v2354_v10 }
 0x7d8   :  { %4617 = vmatpush1.bf16.msra.mxu0 %v4616_v44  ;;  %4649 = vmatpush1.bf16.msra.mxu1 %v4648_v48  ;;  %v6448_v44 = vpack.c.bf16 %v2334_v32, %v2330_v26  ;;  %v6450_v48 = vpack.c.bf16 %v2331_v40, %v2327_v36  ;;  %v2355_v26 = vld [vmem:[#allocation12 + $0x1a0] sm:$0xff]  ;;  %v2353_v32 = vld [vmem:[#allocation12 + $0x190] sm:$0xff] }
 0x7d9   :  { %4619 = vmatprep.subr.bf16.mxu0 %v4618_v58  ;;  %4651 = vmatprep.subr.bf16.mxu1 %v4650_v62  ;;  %v2333_v58 = vld [vmem:[#allocation12 + $0xf0] sm:$0xff]  ;;  %v6485_v40 = vpack.c.bf16 %v2355_v26, %v2351_v19 }
 0x7da   :  { %v6453_v62 = vpack.c.bf16 %v2333_v58, %v2329_v54  ;;  %v2357_v36 = vld [vmem:[#allocation12 + $0x1b0] sm:$0xff]  ;;  %v2360_v58 = vld [vmem:[#allocation12 + $0x1c8] sm:$0xff] }
 0x7db   :  { %v6489_v54 = vpack.c.bf16 %v2357_v36, %v2353_v32 }
 0x7dc   :  { %4621 = vmatpush1.bf16.msra.mxu0 %v4620_v18  ;;  %4653 = vmatpush1.bf16.msra.mxu1 %v4652_v22  ;;  %v6458_v18 = vpack.c.bf16 %v2340_v9, %v2336_v4  ;;  %v2342_v22 = vld [vmem:[#allocation12 + $0x138] sm:$0xff]  ;;  %v2364_v4 = vld [vmem:[#allocation12 + $0x1e8] sm:$0xff] }
 0x7dd   :  { %v2362_v9 = vld [vmem:[#allocation12 + $0x1d8] sm:$0xff] }
 0x7df   :  { %2110 = vmatmul.mubr.f32.vlgmr.msra.gmra.mrb[16].mxu0 %v6102_v46  ;;  %2223 = vmatmul.mubr.f32.vlgmr.msra.gmra.mrb[16].mxu1 %v6102_v46  ;;  %v2304_v46 = vld [vmem:[#allocation12 + $0x8] sm:$0xff] }
 0x7e0   :  { %2115 = vmatprep.mubr.f32.mxu0 %v5764_v0  ;;  %2228 = vmatprep.mubr.f32.mxu1 %v5764_v0 }
 0x7e3   :  { %2116 = vmatmul.mubr.f32.gmra.mrb[18].mxu0 %v6148_v2  ;;  %2229 = vmatmul.mubr.f32.gmra.mrb[18].mxu1 %v6148_v2  ;;  %v2308_v2 = vld [vmem:[#allocation12 + $0x28] sm:$0xff] }
 0x7e4   :  { %2121 = vmatprep.mubr.f32.mxu0 %v5764_v0  ;;  %2234 = vmatprep.mubr.f32.mxu1 %v5764_v0 }
 0x7e7   :  { %2122 = vmatmul.mubr.f32.gmra.mrb[20].mxu0 %v6194_v15  ;;  %2235 = vmatmul.mubr.f32.gmra.mrb[20].mxu1 %v6194_v15  ;;  %v2306_v15 = vld [vmem:[#allocation12 + $0x18] sm:$0xff] }
 0x7e8   :  { %2127 = vmatprep.mubr.f32.mxu0 %v5764_v0  ;;  %2240 = vmatprep.mubr.f32.mxu1 %v5764_v0 }
 0x7eb   :  { %2128 = vmatmul.mubr.f32.gmra.mrb[22].mxu0 %v6240_v43  ;;  %2241 = vmatmul.mubr.f32.gmra.mrb[22].mxu1 %v6240_v43  ;;  %v6410_v43 = vpack.c.bf16 %v2308_v2, %v2304_v46  ;;  %v2335_v46 = vld [vmem:[#allocation12 + $0x100] sm:$0xff] }
 0x7ec   :  { %2133 = vmatprep.mubr.f32.mxu0 %v5764_v0  ;;  %2246 = vmatprep.mubr.f32.mxu1 %v5764_v0  ;;  %v2339_v2 = vld [vmem:[#allocation12 + $0x120] sm:$0xff] }
 0x7ed   :  { %4655 = vmatprep.subr.bf16.mxu0 %v6410_v43 }
 0x7ef   :  { %2134 = vmatmul.mubr.f32.gmra.mrb[24].mxu0 %v6286_v8  ;;  %2247 = vmatmul.mubr.f32.gmra.mrb[24].mxu1 %v6286_v8  ;;  %v2310_v8 = vld [vmem:[#allocation12 + $0x38] sm:$0xff] }
 0x7f0   :  { %2139 = vmatprep.mubr.f32.mxu0 %v5764_v0  ;;  %2252 = vmatprep.mubr.f32.mxu1 %v5764_v0  ;;  %v6412_v45 = vpack.c.bf16 %v2310_v8, %v2306_v15  ;;  %v6460_v15 = vpack.c.bf16 %v2342_v22, %v2338_v14  ;;  %v6462_v8 = vpack.c.bf16 %v2339_v2, %v2335_v46  ;;  %v2366_v22 = vld [vmem:[#allocation12 + $0x1f8] sm:$0xff]  ;;  %v2359_v46 = vld [vmem:[#allocation12 + $0x1c0] sm:$0xff] }
 0x7f1   :  { %v6494_v14 = vpack.c.bf16 %v2364_v4, %v2360_v58  ;;  %v2363_v2 = vld [vmem:[#allocation12 + $0x1e0] sm:$0xff] }
 0x7f2   :  { %4687 = vmatprep.subr.bf16.mxu1 %v6412_v45 }
 0x7f3   :  { %2140 = vmatmul.mubr.f32.gmra.mrb[26].mxu0 %v6332_v24  ;;  %2253 = vmatmul.mubr.f32.gmra.mrb[26].mxu1 %v6332_v24  ;;  %v2307_v24 = vld [vmem:[#allocation12 + $0x20] sm:$0xff] }
 0x7f4   :  { %2145 = vmatprep.mubr.f32.mxu0 %v5764_v0  ;;  %2258 = vmatprep.mubr.f32.mxu1 %v5764_v0  ;;  %v6414_v39 = vpack.c.bf16 %v2307_v24, %v2303_v27  ;;  %v2337_v27 = vld [vmem:[#allocation12 + $0x110] sm:$0xff] }
 0x7f5   :  { %v2341_v24 = vld [vmem:[#allocation12 + $0x130] sm:$0xff] }
 0x7f6   :  { %4657 = vmatpush1.bf16.msra.mxu0 %v6414_v39 }
 0x7f7   :  { %2146 = vmatmul.mubr.f32.gmra.mrb[28].mxu0 %v6376_v51  ;;  %2259 = vmatmul.mubr.f32.gmra.mrb[28].mxu1 %v6376_v51  ;;  %v6417_v51 = vpack.c.bf16 %v2309_v49, %v2305_v5  ;;  %v2344_v5 = vld [vmem:[#allocation12 + $0x148] sm:$0xff]  ;;  %v6465_v49 = vpack.c.bf16 %v2341_v24, %v2337_v27  ;;  %v6496_v27 = vpack.c.bf16 %v2366_v22, %v2362_v9 }
 0x7f8   :  { %2151 = vmatprep.mubr.f32.mxu0 %v5764_v0  ;;  %2264 = vmatprep.mubr.f32.mxu1 %v5764_v0  ;;  %v6469_v33 = vpack.c.bf16 %v2348_v38, %v2344_v5  ;;  %v6498_v24 = vpack.c.bf16 %v2363_v2, %v2359_v46  ;;  %v2361_v5 = vld [vmem:[#allocation12 + $0x1d0] sm:$0xff] }
 0x7f9   :  { %4689 = vmatpush1.bf16.msra.mxu1 %v6417_v51  ;;  %4659 = vmatprep.subr.bf16.mxu0 %v6422_v61  ;;  %v2365_v38 = vld [vmem:[#allocation12 + $0x1f0] sm:$0xff] }
 0x7fa   :  { %4691 = vmatprep.subr.bf16.mxu1 %v6424_v17  ;;  %4661 = vmatpush1.bf16.msra.mxu0 %v6426_v12  ;;  %v6501_v52 = vpack.c.bf16 %v2365_v38, %v2361_v5 }
 0x7fb   :  { %4663 = vmatprep.subr.bf16.mxu0 %v6434_v53 }
 0x7fd   :  { %4693 = vmatpush1.bf16.msra.mxu1 %v6429_v20 }
 0x7fe   :  { %4695 = vmatprep.subr.bf16.mxu1 %v6436_v3  ;;  %4665 = vmatpush1.bf16.msra.mxu0 %v6438_v6 }
 0x7ff   :  { %4667 = vmatprep.subr.bf16.mxu0 %v6446_v29 }
 0x801   :  { %4697 = vmatpush1.bf16.msra.mxu1 %v6441_v16 }
 0x802   :  { %4699 = vmatprep.subr.bf16.mxu1 %v6448_v44  ;;  %4669 = vmatpush1.bf16.msra.mxu0 %v6450_v48 }
 0x803   :  { %4671 = vmatprep.subr.bf16.mxu0 %v6458_v18 }
 0x805   :  { %4701 = vmatpush1.bf16.msra.mxu1 %v6453_v62 }
 0x806   :  { %4703 = vmatprep.subr.bf16.mxu1 %v6460_v15  ;;  %4673 = vmatpush1.bf16.msra.mxu0 %v6462_v8 }
 0x807   :  { %4675 = vmatprep.subr.bf16.mxu0 %v6469_v33 }
 0x809   :  { %4705 = vmatpush1.bf16.msra.mxu1 %v6465_v49 }
 0x80a   :  { %4707 = vmatprep.subr.bf16.mxu1 %v6471_v57  ;;  %4677 = vmatpush1.bf16.msra.mxu0 %v6474_v28 }
 0x80b   :  { %4679 = vmatprep.subr.bf16.mxu0 %v6480_v63 }
 0x80d   :  { %4709 = vmatpush1.bf16.msra.mxu1 %v6478_v60 }
 0x80e   :  { %4711 = vmatprep.subr.bf16.mxu1 %v6482_v23  ;;  %4681 = vmatpush1.bf16.msra.mxu0 %v6485_v40 }
 0x80f   :  { %4683 = vmatprep.subr.bf16.mxu0 %v6494_v14 }
 0x811   :  { %4713 = vmatpush1.bf16.msra.mxu1 %v6489_v54 }
 0x812   :  { %4715 = vmatprep.subr.bf16.mxu1 %v6496_v27  ;;  %4685 = vmatpush1.bf16.msra.mxu0 %v6498_v24 }
 0x813   :  { %4719 = vmatprep.subr.bf16.mxu0 %v6410_v43 }
 0x815   :  { %4717 = vmatpush1.bf16.msra.mxu1 %v6501_v52 }
 0x816   :  { %4751 = vmatprep.subr.bf16.mxu1 %v6412_v45 }
 0x892   :  { %v1845_v41 = vpop.f32.mrb[14].mxu0  ;;  %v1916_v7 = vpop.f32.mrb[14].mxu1 }
 0x893   :  { %v5204_v21 = vadd.f32 %v1845_v41, %v6079_v35  ;;  %v1847_v11 = vpop.f32.mrb[15].mxu0  ;;  %v1918_v47 = vpop.f32.mrb[15].mxu1  ;;  %v5220_v13 = vadd.f32 %v1916_v7, %v6090_v55 }
 0x894   :  { %v5205_v50 = vadd.f32 %v1847_v11, %v6083_v37  ;;  %v5221_v19 = vadd.f32 %v1918_v47, %v6096_v1 }
 0x895   :  { %v3932_v56 = vmul.f32 -1.442695, %v5204_v21  ;;  %v3934_v26 = vmul.f32 -1.442695, %v5220_v13 }
 0x896   :  { %v3933_v10 = vmul.f32 -1.442695, %v5205_v50 }
 0x897   :  { %5444 = vpow2.f32 %v3932_v56 }
 0x898   :  { %5446 = vpow2.f32 %v3933_v10 }
 0x899   :  { %5448 = vtanh.f32 %v5221_v19 }
 0x89a   :  { %5450 = vpow2.f32 %v3934_v26 }
 0x8a1   :  { %v5445_v32 = vpop.eup %5444 }
 0x8a2   :  { %v1934_v36 = vadd.f32 1.0, %v5445_v32  ;;  %v5447_v58 = vpop.eup %5446 }
 0x8a3   :  { %v1935_v35 = vadd.f32 1.0, %v5447_v58  ;;  %v5449_v4 = vpop.eup %5448 }
 0x8a4   :  { %5452 = vrcp.f32 %v1934_v36  ;;  %v5451_v9 = vpop.eup %5450 }
 0x8a5   :  { %5454 = vrcp.f32 %v1935_v35  ;;  %v1936_v2 = vadd.f32 1.0, %v5451_v9 }
 0x8a7   :  { %5456 = vrcp.f32 %v1936_v2 }
 0x8ae   :  { %v5453_v37 = vpop.eup %5452 }
 0x8af   :  { %v1945_v22 = vmul.f32 %v5453_v37, %v5449_v4  ;;  %v5455_v46 = vpop.eup %5454 }
 0x8b0   :  { %v1944_v5 = vmul.f32 %v5455_v46, %v6373_v25  ;;  %v2023_v25 = vld [vmem:[%s6861_s6] sm:$0xf] }
 0x8b1   :  { %v5457_v1 = vpop.eup %5456  ;;  %v6556_v7 = vrot.slane %v2023_v25, %v197_v31  ;;  %v6560_v21 = vrot.slane %v2023_v25, %v201_v34  ;;  %v6566_v32 = vrot.slane %v2023_v25, %v205_v42  ;;  %v6570_v31 = vrot.slane %v2023_v25, %v209_v59 }
 0x8b2   :  { %v1946_v55 = vadd.f32 %v1945_v22, %v1944_v5 }
 0x8b4   :  { %5458 = vtanh.f32 %v1946_v55 }
 0x8be   :  { %v5459_v38 = vpop.eup %5458 }
 0x8bf   :  { %v1948_v41 = vmul.f32 %v5459_v38, %v5457_v1 }
 0x8c1   :  { %2152 = vmatmul.mubr.f32.gmra.mrb[30].mxu0 %v1948_v41  ;;  %2265 = vmatmul.mubr.f32.gmra.mrb[30].mxu1 %v1948_v41 }
 0x8c2   :  { %2435 = vmatprep.mubr.f32.mxu0 %v5764_v0  ;;  %2506 = vmatprep.mubr.f32.mxu1 %v5764_v0 }
 0x8c5   :  { %2436 = vmatmul.mubr.f32.vlgmr.msra.gmra.mrb[16].mxu0 %v5764_v0  ;;  %2507 = vmatmul.mubr.f32.vlgmr.msra.gmra.mrb[16].mxu1 %v5764_v0 }
 0x8c6   :  { %4721 = vmatpush1.bf16.msra.mxu0 %v6414_v39  ;;  %4753 = vmatpush1.bf16.msra.mxu1 %v6417_v51 }
 0x8c7   :  { %4723 = vmatprep.subr.bf16.mxu0 %v6422_v61  ;;  %4755 = vmatprep.subr.bf16.mxu1 %v6424_v17 }
 0x8c8   :  { %2609 = vmatprep.mubr.f32.mxu0 %v5764_v0  ;;  %2680 = vmatprep.mubr.f32.mxu1 %v5764_v0 }
 0x8ca   :  { %4725 = vmatpush1.bf16.msra.mxu0 %v6426_v12  ;;  %4757 = vmatpush1.bf16.msra.mxu1 %v6429_v20 }
 0x8cb   :  { %4727 = vmatprep.subr.bf16.mxu0 %v6434_v53  ;;  %4759 = vmatprep.subr.bf16.mxu1 %v6436_v3 }
 0x8ce   :  { %4729 = vmatpush1.bf16.msra.mxu0 %v6438_v6  ;;  %4761 = vmatpush1.bf16.msra.mxu1 %v6441_v16 }
 0x8cf   :  { %4731 = vmatprep.subr.bf16.mxu0 %v6446_v29  ;;  %4763 = vmatprep.subr.bf16.mxu1 %v6448_v44 }
 0x8d2   :  { %4733 = vmatpush1.bf16.msra.mxu0 %v6450_v48  ;;  %4765 = vmatpush1.bf16.msra.mxu1 %v6453_v62 }
 0x8d3   :  { %4735 = vmatprep.subr.bf16.mxu0 %v6458_v18  ;;  %4767 = vmatprep.subr.bf16.mxu1 %v6460_v15 }
 0x8d6   :  { %4737 = vmatpush1.bf16.msra.mxu0 %v6462_v8  ;;  %4769 = vmatpush1.bf16.msra.mxu1 %v6465_v49 }
 0x8d7   :  { %4739 = vmatprep.subr.bf16.mxu0 %v6469_v33  ;;  %4771 = vmatprep.subr.bf16.mxu1 %v6471_v57 }
 0x8da   :  { %4741 = vmatpush1.bf16.msra.mxu0 %v6474_v28  ;;  %4773 = vmatpush1.bf16.msra.mxu1 %v6478_v60 }
 0x8db   :  { %4743 = vmatprep.subr.bf16.mxu0 %v6480_v63  ;;  %4775 = vmatprep.subr.bf16.mxu1 %v6482_v23 }
 0x8de   :  { %4745 = vmatpush1.bf16.msra.mxu0 %v6485_v40  ;;  %4777 = vmatpush1.bf16.msra.mxu1 %v6489_v54 }
 0x8df   :  { %4747 = vmatprep.subr.bf16.mxu0 %v6494_v14  ;;  %4779 = vmatprep.subr.bf16.mxu1 %v6496_v27 }
 0x8e2   :  { %4749 = vmatpush1.bf16.msra.mxu0 %v6498_v24  ;;  %4781 = vmatpush1.bf16.msra.mxu1 %v6501_v52 }
 0x8e3   :  { %4783 = vmatprep.subr.bf16.mxu0 %v6410_v43  ;;  %4815 = vmatprep.subr.bf16.mxu1 %v6412_v45 }
 0x998   :  { %v2437_v11 = vpop.f32.mrb[16].mxu0  ;;  %v2508_v47 = vpop.f32.mrb[16].mxu1 }
 0x999   :  { %v5222_v50 = vadd.f32 %v2437_v11, %v6556_v7  ;;  %v2439_v56 = vpop.f32.mrb[17].mxu0  ;;  %v2510_v10 = vpop.f32.mrb[17].mxu1  ;;  %v5238_v34 = vadd.f32 %v2508_v47, %v6566_v32 }
 0x99a   :  { %v5223_v13 = vadd.f32 %v2439_v56, %v6560_v21  ;;  %v5239_v36 = vadd.f32 %v2510_v10, %v6570_v31 }
 0x99b   :  { %v3935_v19 = vmul.f32 -1.442695, %v5222_v50  ;;  %v3937_v58 = vmul.f32 -1.442695, %v5238_v34 }
 0x99c   :  { %v3936_v26 = vmul.f32 -1.442695, %v5223_v13 }
 0x99d   :  { %5460 = vpow2.f32 %v3935_v19 }
 0x99e   :  { %5462 = vpow2.f32 %v3936_v26 }
 0x99f   :  { %5464 = vtanh.f32 %v5239_v36 }
 0x9a0   :  { %5466 = vpow2.f32 %v3937_v58 }
 0x9a7   :  { %v5461_v35 = vpop.eup %5460 }
 0x9a8   :  { %v2526_v4 = vadd.f32 1.0, %v5461_v35  ;;  %v5463_v9 = vpop.eup %5462 }
 0x9a9   :  { %v2527_v37 = vadd.f32 1.0, %v5463_v9  ;;  %v5465_v42 = vpop.eup %5464 }
 0x9aa   :  { %5468 = vrcp.f32 %v2526_v4  ;;  %v5467_v22 = vpop.eup %5466 }
 0x9ab   :  { %5470 = vrcp.f32 %v2527_v37  ;;  %v2528_v59 = vadd.f32 1.0, %v5467_v22 }
 0x9ad   :  { %5472 = vrcp.f32 %v2528_v59 }
 0x9b4   :  { %v5469_v46 = vpop.eup %5468 }
 0x9b5   :  { %v2537_v2 = vmul.f32 %v5469_v46, %v5465_v42  ;;  %v5471_v5 = vpop.eup %5470 }
 0x9b6   :  { %v2536_v55 = vmul.f32 0.0, %v5471_v5 }
 0x9b7   :  { %v5473_v38 = vpop.eup %5472 }
 0x9b8   :  { %v6574_v1 = vadd.f32 %v2537_v2, %v2536_v55 }
 0x9ba   :  { %5474 = vtanh.f32 %v6574_v1 }
 0x9c4   :  { %v5475_v41 = vpop.eup %5474 }
 0x9c5   :  { %v2540_v25 = vmul.f32 %v5475_v41, %v5473_v38 }
 0x9c7   :  { %2610 = vmatmul.mubr.f32.vlgmr.msra.gmra.mrb[18].mxu0 %v2540_v25  ;;  %2681 = vmatmul.mubr.f32.vlgmr.msra.gmra.mrb[18].mxu1 %v2540_v25 }
 0x9c8   :  { %4785 = vmatpush1.bf16.msra.mxu0 %v6414_v39  ;;  %4817 = vmatpush1.bf16.msra.mxu1 %v6417_v51 }
 0x9c9   :  { %4787 = vmatprep.subr.bf16.mxu0 %v6422_v61  ;;  %4819 = vmatprep.subr.bf16.mxu1 %v6424_v17 }
 0x9ca   :  { %2783 = vmatprep.mubr.f32.mxu0 %v5764_v0  ;;  %2854 = vmatprep.mubr.f32.mxu1 %v5764_v0 }
 0x9cc   :  { %4789 = vmatpush1.bf16.msra.mxu0 %v6426_v12  ;;  %4821 = vmatpush1.bf16.msra.mxu1 %v6429_v20 }
 0x9cd   :  { %4791 = vmatprep.subr.bf16.mxu0 %v6434_v53  ;;  %4823 = vmatprep.subr.bf16.mxu1 %v6436_v3 }
 0x9d0   :  { %4793 = vmatpush1.bf16.msra.mxu0 %v6438_v6  ;;  %4825 = vmatpush1.bf16.msra.mxu1 %v6441_v16 }
 0x9d1   :  { %4795 = vmatprep.subr.bf16.mxu0 %v6446_v29  ;;  %4827 = vmatprep.subr.bf16.mxu1 %v6448_v44 }
 0x9d4   :  { %4797 = vmatpush1.bf16.msra.mxu0 %v6450_v48  ;;  %4829 = vmatpush1.bf16.msra.mxu1 %v6453_v62 }
 0x9d5   :  { %4799 = vmatprep.subr.bf16.mxu0 %v6458_v18  ;;  %4831 = vmatprep.subr.bf16.mxu1 %v6460_v15 }
 0x9d8   :  { %4801 = vmatpush1.bf16.msra.mxu0 %v6462_v8  ;;  %4833 = vmatpush1.bf16.msra.mxu1 %v6465_v49 }
 0x9d9   :  { %4803 = vmatprep.subr.bf16.mxu0 %v6469_v33  ;;  %4835 = vmatprep.subr.bf16.mxu1 %v6471_v57 }
 0x9dc   :  { %4805 = vmatpush1.bf16.msra.mxu0 %v6474_v28  ;;  %4837 = vmatpush1.bf16.msra.mxu1 %v6478_v60 }
 0x9dd   :  { %4807 = vmatprep.subr.bf16.mxu0 %v6480_v63  ;;  %4839 = vmatprep.subr.bf16.mxu1 %v6482_v23 }
 0x9e0   :  { %4809 = vmatpush1.bf16.msra.mxu0 %v6485_v40  ;;  %4841 = vmatpush1.bf16.msra.mxu1 %v6489_v54 }
 0x9e1   :  { %4811 = vmatprep.subr.bf16.mxu0 %v6494_v14  ;;  %4843 = vmatprep.subr.bf16.mxu1 %v6496_v27 }
 0x9e4   :  { %4813 = vmatpush1.bf16.msra.mxu0 %v6498_v24  ;;  %4845 = vmatpush1.bf16.msra.mxu1 %v6501_v52 }
 0x9e5   :  { %4847 = vmatprep.subr.bf16.mxu0 %v6410_v43  ;;  %4879 = vmatprep.subr.bf16.mxu1 %v6412_v45 }
 0xa9a   :  { %v2611_v11 = vpop.f32.mrb[18].mxu0  ;;  %v2682_v47 = vpop.f32.mrb[18].mxu1 }
 0xa9b   :  { %v5224_v50 = vadd.f32 %v2611_v11, %v6556_v7  ;;  %v2613_v56 = vpop.f32.mrb[19].mxu0  ;;  %v2684_v10 = vpop.f32.mrb[19].mxu1  ;;  %v5240_v34 = vadd.f32 %v2682_v47, %v6566_v32 }
 0xa9c   :  { %v5225_v13 = vadd.f32 %v2613_v56, %v6560_v21  ;;  %v5241_v36 = vadd.f32 %v2684_v10, %v6570_v31 }
 0xa9d   :  { %v3938_v19 = vmul.f32 -1.442695, %v5224_v50  ;;  %v3940_v58 = vmul.f32 -1.442695, %v5240_v34 }
 0xa9e   :  { %v3939_v26 = vmul.f32 -1.442695, %v5225_v13 }
 0xa9f   :  { %5476 = vpow2.f32 %v3938_v19 }
 0xaa0   :  { %5478 = vpow2.f32 %v3939_v26 }
 0xaa1   :  { %5480 = vtanh.f32 %v5241_v36 }
 0xaa2   :  { %5482 = vpow2.f32 %v3940_v58 }
 0xaa9   :  { %v5477_v35 = vpop.eup %5476 }
 0xaaa   :  { %v2700_v4 = vadd.f32 1.0, %v5477_v35  ;;  %v5479_v9 = vpop.eup %5478 }
 0xaab   :  { %v2701_v37 = vadd.f32 1.0, %v5479_v9  ;;  %v5481_v42 = vpop.eup %5480 }
 0xaac   :  { %5484 = vrcp.f32 %v2700_v4  ;;  %v5483_v22 = vpop.eup %5482 }
 0xaad   :  { %5486 = vrcp.f32 %v2701_v37  ;;  %v2702_v59 = vadd.f32 1.0, %v5483_v22 }
 0xaaf   :  { %5488 = vrcp.f32 %v2702_v59 }
 0xab6   :  { %v5485_v46 = vpop.eup %5484 }
 0xab7   :  { %v2711_v2 = vmul.f32 %v5485_v46, %v5481_v42  ;;  %v5487_v5 = vpop.eup %5486 }
 0xab8   :  { %v2710_v55 = vmul.f32 %v5487_v5, %v6574_v1 }
 0xab9   :  { %v5489_v41 = vpop.eup %5488 }
 0xaba   :  { %v6616_v38 = vadd.f32 %v2711_v2, %v2710_v55 }
 0xabc   :  { %5490 = vtanh.f32 %v6616_v38 }
 0xac6   :  { %v5491_v25 = vpop.eup %5490 }
 0xac7   :  { %v2714_v11 = vmul.f32 %v5491_v25, %v5489_v41 }
 0xac9   :  { %2784 = vmatmul.mubr.f32.vlgmr.msra.gmra.mrb[20].mxu0 %v2714_v11  ;;  %2855 = vmatmul.mubr.f32.vlgmr.msra.gmra.mrb[20].mxu1 %v2714_v11 }
 0xaca   :  { %4849 = vmatpush1.bf16.msra.mxu0 %v6414_v39  ;;  %4881 = vmatpush1.bf16.msra.mxu1 %v6417_v51 }
 0xacb   :  { %4851 = vmatprep.subr.bf16.mxu0 %v6422_v61  ;;  %4883 = vmatprep.subr.bf16.mxu1 %v6424_v17 }
 0xacc   :  { %2957 = vmatprep.mubr.f32.mxu0 %v5764_v0  ;;  %3028 = vmatprep.mubr.f32.mxu1 %v5764_v0 }
 0xace   :  { %4853 = vmatpush1.bf16.msra.mxu0 %v6426_v12  ;;  %4885 = vmatpush1.bf16.msra.mxu1 %v6429_v20 }
 0xacf   :  { %4855 = vmatprep.subr.bf16.mxu0 %v6434_v53  ;;  %4887 = vmatprep.subr.bf16.mxu1 %v6436_v3 }
 0xad2   :  { %4857 = vmatpush1.bf16.msra.mxu0 %v6438_v6  ;;  %4889 = vmatpush1.bf16.msra.mxu1 %v6441_v16 }
 0xad3   :  { %4859 = vmatprep.subr.bf16.mxu0 %v6446_v29  ;;  %4891 = vmatprep.subr.bf16.mxu1 %v6448_v44 }
 0xad6   :  { %4861 = vmatpush1.bf16.msra.mxu0 %v6450_v48  ;;  %4893 = vmatpush1.bf16.msra.mxu1 %v6453_v62 }
 0xad7   :  { %4863 = vmatprep.subr.bf16.mxu0 %v6458_v18  ;;  %4895 = vmatprep.subr.bf16.mxu1 %v6460_v15 }
 0xada   :  { %4865 = vmatpush1.bf16.msra.mxu0 %v6462_v8  ;;  %4897 = vmatpush1.bf16.msra.mxu1 %v6465_v49 }
 0xadb   :  { %4867 = vmatprep.subr.bf16.mxu0 %v6469_v33  ;;  %4899 = vmatprep.subr.bf16.mxu1 %v6471_v57 }
 0xade   :  { %4869 = vmatpush1.bf16.msra.mxu0 %v6474_v28  ;;  %4901 = vmatpush1.bf16.msra.mxu1 %v6478_v60 }
 0xadf   :  { %4871 = vmatprep.subr.bf16.mxu0 %v6480_v63  ;;  %4903 = vmatprep.subr.bf16.mxu1 %v6482_v23 }
 0xae2   :  { %4873 = vmatpush1.bf16.msra.mxu0 %v6485_v40  ;;  %4905 = vmatpush1.bf16.msra.mxu1 %v6489_v54 }
 0xae3   :  { %4875 = vmatprep.subr.bf16.mxu0 %v6494_v14  ;;  %4907 = vmatprep.subr.bf16.mxu1 %v6496_v27 }
 0xae6   :  { %4877 = vmatpush1.bf16.msra.mxu0 %v6498_v24  ;;  %4909 = vmatpush1.bf16.msra.mxu1 %v6501_v52 }
 0xae7   :  { %4911 = vmatprep.subr.bf16.mxu0 %v6410_v43  ;;  %4943 = vmatprep.subr.bf16.mxu1 %v6412_v45 }
 0xb9c   :  { %v2785_v1 = vpop.f32.mrb[20].mxu0  ;;  %v2856_v47 = vpop.f32.mrb[20].mxu1 }
 0xb9d   :  { %v5226_v50 = vadd.f32 %v2785_v1, %v6556_v7  ;;  %v2787_v56 = vpop.f32.mrb[21].mxu0  ;;  %v2858_v10 = vpop.f32.mrb[21].mxu1  ;;  %v5242_v34 = vadd.f32 %v2856_v47, %v6566_v32 }
 0xb9e   :  { %v5227_v13 = vadd.f32 %v2787_v56, %v6560_v21  ;;  %v5243_v36 = vadd.f32 %v2858_v10, %v6570_v31 }
 0xb9f   :  { %v3941_v19 = vmul.f32 -1.442695, %v5226_v50  ;;  %v3943_v58 = vmul.f32 -1.442695, %v5242_v34 }
 0xba0   :  { %v3942_v26 = vmul.f32 -1.442695, %v5227_v13 }
 0xba1   :  { %5492 = vpow2.f32 %v3941_v19 }
 0xba2   :  { %5494 = vpow2.f32 %v3942_v26 }
 0xba3   :  { %5496 = vtanh.f32 %v5243_v36 }
 0xba4   :  { %5498 = vpow2.f32 %v3943_v58 }
 0xbab   :  { %v5493_v35 = vpop.eup %5492 }
 0xbac   :  { %v2874_v4 = vadd.f32 1.0, %v5493_v35  ;;  %v5495_v9 = vpop.eup %5494 }
 0xbad   :  { %v2875_v37 = vadd.f32 1.0, %v5495_v9  ;;  %v5497_v42 = vpop.eup %5496 }
 0xbae   :  { %5500 = vrcp.f32 %v2874_v4  ;;  %v5499_v22 = vpop.eup %5498 }
 0xbaf   :  { %5502 = vrcp.f32 %v2875_v37  ;;  %v2876_v59 = vadd.f32 1.0, %v5499_v22 }
 0xbb1   :  { %5504 = vrcp.f32 %v2876_v59 }
 0xbb8   :  { %v5501_v46 = vpop.eup %5500 }
 0xbb9   :  { %v2885_v2 = vmul.f32 %v5501_v46, %v5497_v42  ;;  %v5503_v5 = vpop.eup %5502 }
 0xbba   :  { %v2884_v55 = vmul.f32 %v5503_v5, %v6616_v38 }
 0xbbb   :  { %v5505_v25 = vpop.eup %5504 }
 0xbbc   :  { %v6658_v41 = vadd.f32 %v2885_v2, %v2884_v55 }
 0xbbe   :  { %5506 = vtanh.f32 %v6658_v41 }
 0xbc8   :  { %v5507_v11 = vpop.eup %5506 }
 0xbc9   :  { %v2888_v1 = vmul.f32 %v5507_v11, %v5505_v25 }
 0xbcb   :  { %2958 = vmatmul.mubr.f32.vlgmr.msra.gmra.mrb[22].mxu0 %v2888_v1  ;;  %3029 = vmatmul.mubr.f32.vlgmr.msra.gmra.mrb[22].mxu1 %v2888_v1 }
 0xbcc   :  { %4913 = vmatpush1.bf16.msra.mxu0 %v6414_v39  ;;  %4945 = vmatpush1.bf16.msra.mxu1 %v6417_v51 }
 0xbcd   :  { %4915 = vmatprep.subr.bf16.mxu0 %v6422_v61  ;;  %4947 = vmatprep.subr.bf16.mxu1 %v6424_v17 }
 0xbce   :  { %3131 = vmatprep.mubr.f32.mxu0 %v5764_v0  ;;  %3202 = vmatprep.mubr.f32.mxu1 %v5764_v0 }
 0xbd0   :  { %4917 = vmatpush1.bf16.msra.mxu0 %v6426_v12  ;;  %4949 = vmatpush1.bf16.msra.mxu1 %v6429_v20 }
 0xbd1   :  { %4919 = vmatprep.subr.bf16.mxu0 %v6434_v53  ;;  %4951 = vmatprep.subr.bf16.mxu1 %v6436_v3 }
 0xbd4   :  { %4921 = vmatpush1.bf16.msra.mxu0 %v6438_v6  ;;  %4953 = vmatpush1.bf16.msra.mxu1 %v6441_v16 }
 0xbd5   :  { %4923 = vmatprep.subr.bf16.mxu0 %v6446_v29  ;;  %4955 = vmatprep.subr.bf16.mxu1 %v6448_v44 }
 0xbd8   :  { %4925 = vmatpush1.bf16.msra.mxu0 %v6450_v48  ;;  %4957 = vmatpush1.bf16.msra.mxu1 %v6453_v62 }
 0xbd9   :  { %4927 = vmatprep.subr.bf16.mxu0 %v6458_v18  ;;  %4959 = vmatprep.subr.bf16.mxu1 %v6460_v15 }
 0xbdc   :  { %4929 = vmatpush1.bf16.msra.mxu0 %v6462_v8  ;;  %4961 = vmatpush1.bf16.msra.mxu1 %v6465_v49 }
 0xbdd   :  { %4931 = vmatprep.subr.bf16.mxu0 %v6469_v33  ;;  %4963 = vmatprep.subr.bf16.mxu1 %v6471_v57 }
 0xbe0   :  { %4933 = vmatpush1.bf16.msra.mxu0 %v6474_v28  ;;  %4965 = vmatpush1.bf16.msra.mxu1 %v6478_v60 }
 0xbe1   :  { %4935 = vmatprep.subr.bf16.mxu0 %v6480_v63  ;;  %4967 = vmatprep.subr.bf16.mxu1 %v6482_v23 }
 0xbe4   :  { %4937 = vmatpush1.bf16.msra.mxu0 %v6485_v40  ;;  %4969 = vmatpush1.bf16.msra.mxu1 %v6489_v54 }
 0xbe5   :  { %4939 = vmatprep.subr.bf16.mxu0 %v6494_v14  ;;  %4971 = vmatprep.subr.bf16.mxu1 %v6496_v27 }
 0xbe8   :  { %4941 = vmatpush1.bf16.msra.mxu0 %v6498_v24  ;;  %4973 = vmatpush1.bf16.msra.mxu1 %v6501_v52 }
 0xbe9   :  { %4975 = vmatprep.subr.bf16.mxu0 %v6410_v43  ;;  %5007 = vmatprep.subr.bf16.mxu1 %v6412_v45 }
 0xc9e   :  { %v2959_v38 = vpop.f32.mrb[22].mxu0  ;;  %v3030_v47 = vpop.f32.mrb[22].mxu1 }
 0xc9f   :  { %v5228_v50 = vadd.f32 %v2959_v38, %v6556_v7  ;;  %v2961_v56 = vpop.f32.mrb[23].mxu0  ;;  %v3032_v10 = vpop.f32.mrb[23].mxu1  ;;  %v5244_v34 = vadd.f32 %v3030_v47, %v6566_v32 }
 0xca0   :  { %v5229_v13 = vadd.f32 %v2961_v56, %v6560_v21  ;;  %v5245_v36 = vadd.f32 %v3032_v10, %v6570_v31 }
 0xca1   :  { %v3944_v19 = vmul.f32 -1.442695, %v5228_v50  ;;  %v3946_v58 = vmul.f32 -1.442695, %v5244_v34 }
 0xca2   :  { %v3945_v26 = vmul.f32 -1.442695, %v5229_v13 }
 0xca3   :  { %5508 = vpow2.f32 %v3944_v19 }
 0xca4   :  { %5510 = vpow2.f32 %v3945_v26 }
 0xca5   :  { %5512 = vtanh.f32 %v5245_v36 }
 0xca6   :  { %5514 = vpow2.f32 %v3946_v58 }
 0xcad   :  { %v5509_v35 = vpop.eup %5508 }
 0xcae   :  { %v3048_v4 = vadd.f32 1.0, %v5509_v35  ;;  %v5511_v9 = vpop.eup %5510 }
 0xcaf   :  { %v3049_v37 = vadd.f32 1.0, %v5511_v9  ;;  %v5513_v42 = vpop.eup %5512 }
 0xcb0   :  { %5516 = vrcp.f32 %v3048_v4  ;;  %v5515_v22 = vpop.eup %5514 }
 0xcb1   :  { %5518 = vrcp.f32 %v3049_v37  ;;  %v3050_v59 = vadd.f32 1.0, %v5515_v22 }
 0xcb3   :  { %5520 = vrcp.f32 %v3050_v59 }
 0xcba   :  { %v5517_v46 = vpop.eup %5516 }
 0xcbb   :  { %v3059_v2 = vmul.f32 %v5517_v46, %v5513_v42  ;;  %v5519_v5 = vpop.eup %5518 }
 0xcbc   :  { %v3058_v55 = vmul.f32 %v5519_v5, %v6658_v41 }
 0xcbd   :  { %v5521_v11 = vpop.eup %5520 }
 0xcbe   :  { %v6700_v25 = vadd.f32 %v3059_v2, %v3058_v55 }
 0xcc0   :  { %5522 = vtanh.f32 %v6700_v25 }
 0xcca   :  { %v5523_v1 = vpop.eup %5522 }
 0xccb   :  { %v3062_v38 = vmul.f32 %v5523_v1, %v5521_v11 }
 0xccd   :  { %3132 = vmatmul.mubr.f32.vlgmr.msra.gmra.mrb[24].mxu0 %v3062_v38  ;;  %3203 = vmatmul.mubr.f32.vlgmr.msra.gmra.mrb[24].mxu1 %v3062_v38 }
 0xcce   :  { %4977 = vmatpush1.bf16.msra.mxu0 %v6414_v39  ;;  %5009 = vmatpush1.bf16.msra.mxu1 %v6417_v51 }
 0xccf   :  { %4979 = vmatprep.subr.bf16.mxu0 %v6422_v61  ;;  %5011 = vmatprep.subr.bf16.mxu1 %v6424_v17 }
 0xcd0   :  { %3305 = vmatprep.mubr.f32.mxu0 %v5764_v0  ;;  %3376 = vmatprep.mubr.f32.mxu1 %v5764_v0 }
 0xcd2   :  { %4981 = vmatpush1.bf16.msra.mxu0 %v6426_v12  ;;  %5013 = vmatpush1.bf16.msra.mxu1 %v6429_v20 }
 0xcd3   :  { %4983 = vmatprep.subr.bf16.mxu0 %v6434_v53  ;;  %5015 = vmatprep.subr.bf16.mxu1 %v6436_v3 }
 0xcd6   :  { %4985 = vmatpush1.bf16.msra.mxu0 %v6438_v6  ;;  %5017 = vmatpush1.bf16.msra.mxu1 %v6441_v16 }
 0xcd7   :  { %4987 = vmatprep.subr.bf16.mxu0 %v6446_v29  ;;  %5019 = vmatprep.subr.bf16.mxu1 %v6448_v44 }
 0xcda   :  { %4989 = vmatpush1.bf16.msra.mxu0 %v6450_v48  ;;  %5021 = vmatpush1.bf16.msra.mxu1 %v6453_v62 }
 0xcdb   :  { %4991 = vmatprep.subr.bf16.mxu0 %v6458_v18  ;;  %5023 = vmatprep.subr.bf16.mxu1 %v6460_v15 }
 0xcde   :  { %4993 = vmatpush1.bf16.msra.mxu0 %v6462_v8  ;;  %5025 = vmatpush1.bf16.msra.mxu1 %v6465_v49 }
 0xcdf   :  { %4995 = vmatprep.subr.bf16.mxu0 %v6469_v33  ;;  %5027 = vmatprep.subr.bf16.mxu1 %v6471_v57 }
 0xce2   :  { %4997 = vmatpush1.bf16.msra.mxu0 %v6474_v28  ;;  %5029 = vmatpush1.bf16.msra.mxu1 %v6478_v60 }
 0xce3   :  { %4999 = vmatprep.subr.bf16.mxu0 %v6480_v63  ;;  %5031 = vmatprep.subr.bf16.mxu1 %v6482_v23 }
 0xce6   :  { %5001 = vmatpush1.bf16.msra.mxu0 %v6485_v40  ;;  %5033 = vmatpush1.bf16.msra.mxu1 %v6489_v54 }
 0xce7   :  { %5003 = vmatprep.subr.bf16.mxu0 %v6494_v14  ;;  %5035 = vmatprep.subr.bf16.mxu1 %v6496_v27 }
 0xcea   :  { %5005 = vmatpush1.bf16.msra.mxu0 %v6498_v24  ;;  %5037 = vmatpush1.bf16.msra.mxu1 %v6501_v52 }
 0xceb   :  { %5039 = vmatprep.subr.bf16.mxu0 %v6410_v43  ;;  %5071 = vmatprep.subr.bf16.mxu1 %v6412_v45 }
 0xda0   :  { %v3133_v41 = vpop.f32.mrb[24].mxu0  ;;  %v3204_v47 = vpop.f32.mrb[24].mxu1 }
 0xda1   :  { %v5230_v50 = vadd.f32 %v3133_v41, %v6556_v7  ;;  %v3135_v56 = vpop.f32.mrb[25].mxu0  ;;  %v3206_v10 = vpop.f32.mrb[25].mxu1  ;;  %v5246_v34 = vadd.f32 %v3204_v47, %v6566_v32 }
 0xda2   :  { %v5231_v13 = vadd.f32 %v3135_v56, %v6560_v21  ;;  %v5247_v36 = vadd.f32 %v3206_v10, %v6570_v31 }
 0xda3   :  { %v3947_v19 = vmul.f32 -1.442695, %v5230_v50  ;;  %v3949_v58 = vmul.f32 -1.442695, %v5246_v34 }
 0xda4   :  { %v3948_v26 = vmul.f32 -1.442695, %v5231_v13 }
 0xda5   :  { %5524 = vpow2.f32 %v3947_v19 }
 0xda6   :  { %5526 = vpow2.f32 %v3948_v26 }
 0xda7   :  { %5528 = vtanh.f32 %v5247_v36 }
 0xda8   :  { %5530 = vpow2.f32 %v3949_v58 }
 0xdaf   :  { %v5525_v35 = vpop.eup %5524 }
 0xdb0   :  { %v3222_v4 = vadd.f32 1.0, %v5525_v35  ;;  %v5527_v9 = vpop.eup %5526 }
 0xdb1   :  { %v3223_v37 = vadd.f32 1.0, %v5527_v9  ;;  %v5529_v42 = vpop.eup %5528 }
 0xdb2   :  { %5532 = vrcp.f32 %v3222_v4  ;;  %v5531_v22 = vpop.eup %5530 }
 0xdb3   :  { %5534 = vrcp.f32 %v3223_v37  ;;  %v3224_v59 = vadd.f32 1.0, %v5531_v22 }
 0xdb5   :  { %5536 = vrcp.f32 %v3224_v59 }
 0xdbc   :  { %v5533_v46 = vpop.eup %5532 }
 0xdbd   :  { %v3233_v2 = vmul.f32 %v5533_v46, %v5529_v42  ;;  %v5535_v5 = vpop.eup %5534 }
 0xdbe   :  { %v3232_v55 = vmul.f32 %v5535_v5, %v6700_v25 }
 0xdbf   :  { %v5537_v1 = vpop.eup %5536 }
 0xdc0   :  { %v6742_v11 = vadd.f32 %v3233_v2, %v3232_v55 }
 0xdc2   :  { %5538 = vtanh.f32 %v6742_v11 }
 0xdcc   :  { %v5539_v38 = vpop.eup %5538 }
 0xdcd   :  { %v3236_v41 = vmul.f32 %v5539_v38, %v5537_v1 }
 0xdcf   :  { %3306 = vmatmul.mubr.f32.vlgmr.msra.gmra.mrb[26].mxu0 %v3236_v41  ;;  %3377 = vmatmul.mubr.f32.vlgmr.msra.gmra.mrb[26].mxu1 %v3236_v41  ;;  %v3802_v41 = vld [vmem:[#allocation13 + $0x18] sm:$0xff] }
 0xdd0   :  { %5041 = vmatpush1.bf16.msra.mxu0 %v6414_v39  ;;  %5073 = vmatpush1.bf16.msra.mxu1 %v6417_v51 }
 0xdd1   :  { %5043 = vmatprep.subr.bf16.mxu0 %v6422_v61  ;;  %5075 = vmatprep.subr.bf16.mxu1 %v6424_v17 }
 0xdd2   :  { %3479 = vmatprep.mubr.f32.mxu0 %v5764_v0  ;;  %3550 = vmatprep.mubr.f32.mxu1 %v5764_v0 }
 0xdd4   :  { %5045 = vmatpush1.bf16.msra.mxu0 %v6426_v12  ;;  %5077 = vmatpush1.bf16.msra.mxu1 %v6429_v20 }
 0xdd5   :  { %5047 = vmatprep.subr.bf16.mxu0 %v6434_v53  ;;  %5079 = vmatprep.subr.bf16.mxu1 %v6436_v3 }
 0xdd8   :  { %5049 = vmatpush1.bf16.msra.mxu0 %v6438_v6  ;;  %5081 = vmatpush1.bf16.msra.mxu1 %v6441_v16 }
 0xdd9   :  { %5051 = vmatprep.subr.bf16.mxu0 %v6446_v29  ;;  %5083 = vmatprep.subr.bf16.mxu1 %v6448_v44 }
 0xddc   :  { %5053 = vmatpush1.bf16.msra.mxu0 %v6450_v48  ;;  %5085 = vmatpush1.bf16.msra.mxu1 %v6453_v62 }
 0xddd   :  { %5055 = vmatprep.subr.bf16.mxu0 %v6458_v18  ;;  %5087 = vmatprep.subr.bf16.mxu1 %v6460_v15 }
 0xde0   :  { %5057 = vmatpush1.bf16.msra.mxu0 %v6462_v8  ;;  %5089 = vmatpush1.bf16.msra.mxu1 %v6465_v49 }
 0xde1   :  { %5059 = vmatprep.subr.bf16.mxu0 %v6469_v33  ;;  %5091 = vmatprep.subr.bf16.mxu1 %v6471_v57 }
 0xde4   :  { %5061 = vmatpush1.bf16.msra.mxu0 %v6474_v28  ;;  %5093 = vmatpush1.bf16.msra.mxu1 %v6478_v60 }
 0xde5   :  { %5063 = vmatprep.subr.bf16.mxu0 %v6480_v63  ;;  %5095 = vmatprep.subr.bf16.mxu1 %v6482_v23 }
 0xde8   :  { %5065 = vmatpush1.bf16.msra.mxu0 %v6485_v40  ;;  %5097 = vmatpush1.bf16.msra.mxu1 %v6489_v54 }
 0xde9   :  { %5067 = vmatprep.subr.bf16.mxu0 %v6494_v14  ;;  %5099 = vmatprep.subr.bf16.mxu1 %v6496_v27 }
 0xdec   :  { %5069 = vmatpush1.bf16.msra.mxu0 %v6498_v24  ;;  %5101 = vmatpush1.bf16.msra.mxu1 %v6501_v52 }
 0xded   :  { %5103 = vmatprep.subr.bf16.mxu0 %v6410_v43  ;;  %5135 = vmatprep.subr.bf16.mxu1 %v6412_v45 }
 0xea2   :  { %v3307_v25 = vpop.f32.mrb[26].mxu0  ;;  %v3378_v47 = vpop.f32.mrb[26].mxu1 }
 0xea3   :  { %v5232_v50 = vadd.f32 %v3307_v25, %v6556_v7  ;;  %v3309_v56 = vpop.f32.mrb[27].mxu0  ;;  %v3380_v10 = vpop.f32.mrb[27].mxu1  ;;  %v5248_v34 = vadd.f32 %v3378_v47, %v6566_v32  ;;  %v3803_v47 = vld [vmem:[#allocation13 + $0x20] sm:$0xff] }
 0xea4   :  { %v5233_v13 = vadd.f32 %v3309_v56, %v6560_v21  ;;  %v5249_v36 = vadd.f32 %v3380_v10, %v6570_v31  ;;  %v3805_v10 = vld [vmem:[#allocation13 + $0x30] sm:$0xff] }
 0xea5   :  { %v3950_v19 = vmul.f32 -1.442695, %v5232_v50  ;;  %v3952_v58 = vmul.f32 -1.442695, %v5248_v34  ;;  %v3804_v50 = vld [vmem:[#allocation13 + $0x28] sm:$0xff] }
 0xea6   :  { %v3951_v26 = vmul.f32 -1.442695, %v5233_v13  ;;  %v5173_v56 = vpack.c.bf16 %v3804_v50, %v3803_v47  ;;  %v3806_v13 = vld [vmem:[#allocation13 + $0x38] sm:$0xff]  ;;  %v3808_v34 = vld [vmem:[#allocation13 + $0x48] sm:$0xff]  ;;  %v3959_v47 = vld [vmem:[%s6862_s7] ss:$0 sm:$0xff] }
 0xea7   :  { %5540 = vpow2.f32 %v3950_v19  ;;  %v5176_v19 = vpack.c.bf16 %v3806_v13, %v3805_v10  ;;  %s5722_s7 = scalar_lea.vmem %s3900_s18, 128 }
 0xea8   :  { %5542 = vpow2.f32 %v3951_v26  ;;  %v3807_v26 = vld [vmem:[#allocation13 + $0x40] sm:$0xff]  ;;  %p5723_p6 = scmp.ne.s32.totalorder %s3900_s18, %s5722_s7  ;;  %p5728_p8 = scmp.lt.s32.totalorder %s5722_s7, %s5722_s7 }
 0xea9   :  { %5544 = vtanh.f32 %v5249_v36  ;;  %v5179_v36 = vpack.c.bf16 %v3808_v34, %v3807_v26 }
 0xeaa   :  { %5546 = vpow2.f32 %v3952_v58  ;;  %v3809_v58 = vld [vmem:[#allocation13 + $0x50] sm:$0xff]  ;;  %p5729_p9 = por %p5728_p8, %p5727_p7 }
 0xeac   :  { %p5730_p10 = pnand %p5729_p9, %p5723_p6 }
 0xeb1   :  { %v5541_v43 = vpop.eup %5540 }
 0xeb2   :  { %v3396_v35 = vadd.f32 1.0, %v5541_v43  ;;  %v5543_v45 = vpop.eup %5542 }
 0xeb3   :  { %v3397_v4 = vadd.f32 1.0, %v5543_v45  ;;  %v5545_v9 = vpop.eup %5544  ;;  %v3812_v45 = vld [vmem:[#allocation13 + $0x68] sm:$0xff] }
 0xeb4   :  { %5548 = vrcp.f32 %v3396_v35  ;;  %v5547_v37 = vpop.eup %5546  ;;  %v3811_v35 = vld [vmem:[#allocation13 + $0x60] sm:$0xff] }
 0xeb5   :  { %5550 = vrcp.f32 %v3397_v4  ;;  %v3398_v2 = vadd.f32 1.0, %v5547_v37  ;;  %v5185_v4 = vpack.c.bf16 %v3812_v45, %v3811_v35  ;;  %v3814_v37 = vld [vmem:[#allocation13 + $0x78] sm:$0xff] }
 0xeb7   :  { %5552 = vrcp.f32 %v3398_v2 }
 0xebe   :  { %v5549_v42 = vpop.eup %5548 }
 0xebf   :  { %v3407_v22 = vmul.f32 %v5549_v42, %v5545_v9  ;;  %v5551_v46 = vpop.eup %5550  ;;  %v3813_v9 = vld [vmem:[#allocation13 + $0x70] sm:$0xff] }
 0xec0   :  { %v3406_v5 = vmul.f32 %v5551_v46, %v6742_v11  ;;  %v5188_v42 = vpack.c.bf16 %v3814_v37, %v3813_v9 }
 0xec1   :  { %v5553_v55 = vpop.eup %5552 }
 0xec2   :  { %v6784_v59 = vadd.f32 %v3407_v22, %v3406_v5 }
 0xec4   :  { %5554 = vtanh.f32 %v6784_v59 }
 0xece   :  { %v5555_v1 = vpop.eup %5554 }
 0xecf   :  { %v3410_v38 = vmul.f32 %v5555_v1, %v5553_v55 }
 0xed1   :  { %3480 = vmatmul.mubr.f32.vlgmr.msra.gmra.mrb[28].mxu0 %v3410_v38  ;;  %3551 = vmatmul.mubr.f32.vlgmr.msra.gmra.mrb[28].mxu1 %v3410_v38 }
 0xed2   :  { %5105 = vmatpush1.bf16.msra.mxu0 %v6414_v39  ;;  %5137 = vmatpush1.bf16.msra.mxu1 %v6417_v51 }
 0xed3   :  { %5107 = vmatprep.subr.bf16.mxu0 %v6422_v61  ;;  %5139 = vmatprep.subr.bf16.mxu1 %v6424_v17 }
 0xed4   :  { %3653 = vmatprep.mubr.f32.mxu0 %v5764_v0  ;;  %3724 = vmatprep.mubr.f32.mxu1 %v5764_v0 }
 0xed6   :  { %5109 = vmatpush1.bf16.msra.mxu0 %v6426_v12  ;;  %5141 = vmatpush1.bf16.msra.mxu1 %v6429_v20 }
 0xed7   :  { %5111 = vmatprep.subr.bf16.mxu0 %v6434_v53  ;;  %5143 = vmatprep.subr.bf16.mxu1 %v6436_v3 }
 0xeda   :  { %5113 = vmatpush1.bf16.msra.mxu0 %v6438_v6  ;;  %5145 = vmatpush1.bf16.msra.mxu1 %v6441_v16 }
 0xedb   :  { %5115 = vmatprep.subr.bf16.mxu0 %v6446_v29  ;;  %5147 = vmatprep.subr.bf16.mxu1 %v6448_v44 }
 0xede   :  { %5117 = vmatpush1.bf16.msra.mxu0 %v6450_v48  ;;  %5149 = vmatpush1.bf16.msra.mxu1 %v6453_v62 }
 0xedf   :  { %5119 = vmatprep.subr.bf16.mxu0 %v6458_v18  ;;  %5151 = vmatprep.subr.bf16.mxu1 %v6460_v15 }
 0xee2   :  { %5121 = vmatpush1.bf16.msra.mxu0 %v6462_v8  ;;  %5153 = vmatpush1.bf16.msra.mxu1 %v6465_v49 }
 0xee3   :  { %5123 = vmatprep.subr.bf16.mxu0 %v6469_v33  ;;  %5155 = vmatprep.subr.bf16.mxu1 %v6471_v57 }
 0xee6   :  { %5125 = vmatpush1.bf16.msra.mxu0 %v6474_v28  ;;  %5157 = vmatpush1.bf16.msra.mxu1 %v6478_v60 }
 0xee7   :  { %5127 = vmatprep.subr.bf16.mxu0 %v6480_v63  ;;  %5159 = vmatprep.subr.bf16.mxu1 %v6482_v23 }
 0xeea   :  { %5129 = vmatpush1.bf16.msra.mxu0 %v6485_v40  ;;  %5161 = vmatpush1.bf16.msra.mxu1 %v6489_v54 }
 0xeeb   :  { %5131 = vmatprep.subr.bf16.mxu0 %v6494_v14  ;;  %5163 = vmatprep.subr.bf16.mxu1 %v6496_v27  ;;  %v3799_v14 = vld [vmem:[#allocation13] sm:$0xff]  ;;  %v3800_v27 = vld [vmem:[#allocation13 + $0x8] sm:$0xff] }
 0xeec   :  { %v5167_v11 = vpack.c.bf16 %v3800_v27, %v3799_v14 }
 0xeee   :  { %5133 = vmatpush1.bf16.msra.mxu0 %v6498_v24  ;;  %5165 = vmatpush1.bf16.msra.mxu1 %v6501_v52  ;;  %v3801_v24 = vld [vmem:[#allocation13 + $0x10] sm:$0xff]  ;;  %v5765_v52 = vmov 0.0|0.0  }
 0xeef   :  { %5166 = vmatprep.subr.bf16.mxu0 %v5765_v52  ;;  %v5170_v25 = vpack.c.bf16 %v3802_v41, %v3801_v24 }
 0xfa4   :  { %v3481_v39 = vpop.f32.mrb[28].mxu0  ;;  %v3552_v51 = vpop.f32.mrb[28].mxu1 }
 0xfa5   :  { %v5234_v61 = vadd.f32 %v3481_v39, %v6556_v7  ;;  %v3483_v17 = vpop.f32.mrb[29].mxu0  ;;  %v3554_v12 = vpop.f32.mrb[29].mxu1  ;;  %v5250_v6 = vadd.f32 %v3552_v51, %v6566_v32 }
 0xfa6   :  { %v5235_v20 = vadd.f32 %v3483_v17, %v6560_v21  ;;  %v5251_v16 = vadd.f32 %v3554_v12, %v6570_v31 }
 0xfa7   :  { %v3953_v53 = vmul.f32 -1.442695, %v5234_v61  ;;  %v3955_v29 = vmul.f32 -1.442695, %v5250_v6 }
 0xfa8   :  { %v3954_v3 = vmul.f32 -1.442695, %v5235_v20 }
 0xfa9   :  { %5556 = vpow2.f32 %v3953_v53 }
 0xfaa   :  { %5558 = vpow2.f32 %v3954_v3 }
 0xfab   :  { %5560 = vtanh.f32 %v5251_v16 }
 0xfac   :  { %5562 = vpow2.f32 %v3955_v29 }
 0xfb3   :  { %v5557_v44 = vpop.eup %5556 }
 0xfb4   :  { %v3570_v48 = vadd.f32 1.0, %v5557_v44  ;;  %v5559_v62 = vpop.eup %5558 }
 0xfb5   :  { %v3571_v18 = vadd.f32 1.0, %v5559_v62  ;;  %v5561_v15 = vpop.eup %5560 }
 0xfb6   :  { %5564 = vrcp.f32 %v3570_v48  ;;  %v5563_v8 = vpop.eup %5562 }
 0xfb7   :  { %5566 = vrcp.f32 %v3571_v18  ;;  %v3572_v28 = vadd.f32 1.0, %v5563_v8 }
 0xfb9   :  { %5568 = vrcp.f32 %v3572_v28 }
 0xfc0   :  { %v5565_v49 = vpop.eup %5564 }
 0xfc1   :  { %v3581_v33 = vmul.f32 %v5565_v49, %v5561_v15  ;;  %v5567_v57 = vpop.eup %5566 }
 0xfc2   :  { %v3580_v60 = vmul.f32 %v5567_v57, %v6784_v59 }
 0xfc3   :  { %v5569_v23 = vpop.eup %5568 }
 0xfc4   :  { %v6824_v63 = vadd.f32 %v3581_v33, %v3580_v60 }
 0xfc6   :  { %5570 = vtanh.f32 %v6824_v63 }
 0xfd0   :  { %v5571_v40 = vpop.eup %5570 }
 0xfd1   :  { %v3584_v54 = vmul.f32 %v5571_v40, %v5569_v23 }
 0xfd3   :  { %3654 = vmatmul.mubr.f32.vlgmr.msra.gmra.mrb[30].mxu0 %v3584_v54  ;;  %3725 = vmatmul.mubr.f32.vlgmr.msra.gmra.mrb[30].mxu1 %v3584_v54 }
 0xfd4   :  { %4011 = vmatprep.mubr.msk.f32.mxu0 %vm5766_vm0, %v5764_v0  ;;  %5168 = vmatpush3.bf16.msra.mxu0 %v5167_v11  ;;  %v3810_v0 = vld [vmem:[#allocation13 + $0x58] sm:$0xff] }
 0xfd5   :  { %5169 = vmatprep.subr.bf16.mxu0 %v5765_v52  ;;  %v5182_v43 = vpack.c.bf16 %v3810_v0, %v3809_v58 }
 0xfd8   :  { %5171 = vmatpush3.bf16.msra.mxu0 %v5170_v25 }
 0xfd9   :  { %5172 = vmatprep.subr.bf16.mxu0 %v5765_v52 }
 0xfdc   :  { %5174 = vmatpush3.bf16.msra.mxu0 %v5173_v56  ;;  %v3960_v56 = vld [vmem:[%s6863_s8] ss:$0 sm:$0xff] }
 0xfdd   :  { %5175 = vmatprep.subr.bf16.mxu0 %v5765_v52 }
 0xfe0   :  { %5177 = vmatpush3.bf16.msra.mxu0 %v5176_v19  ;;  %v3961_v19 = vld [vmem:[%s6865_s10] ss:$0 sm:$0xff] }
 0xfe1   :  { %5178 = vmatprep.subr.bf16.mxu0 %v5765_v52 }
 0xfe4   :  { %5180 = vmatpush3.bf16.msra.mxu0 %v5179_v36 }
 0xfe5   :  { %5181 = vmatprep.subr.bf16.mxu0 %v5765_v52 }
 0xfe8   :  { %5183 = vmatpush3.bf16.msra.mxu0 %v5182_v43 }
 0xfe9   :  { %5184 = vmatprep.subr.bf16.mxu0 %v5765_v52 }
 0xfec   :  { %5186 = vmatpush3.bf16.msra.mxu0 %v5185_v4 }
 0xfed   :  { %5187 = vmatprep.subr.bf16.mxu0 %v5765_v52 }
 0xff0   :  { %5189 = vmatpush3.bf16.msra.mxu0 %v5188_v42 }
0x10a6   :  { %v3655_v22 = vpop.f32.mrb[30].mxu0  ;;  %v3726_v46 = vpop.f32.mrb[30].mxu1 }
0x10a7   :  { %v5236_v2 = vadd.f32 %v3655_v22, %v6556_v7  ;;  %v3657_v5 = vpop.f32.mrb[31].mxu0  ;;  %v3728_v59 = vpop.f32.mrb[31].mxu1  ;;  %v5252_v39 = vadd.f32 %v3726_v46, %v6566_v32 }
0x10a8   :  { %v5237_v55 = vadd.f32 %v3657_v5, %v6560_v21  ;;  %v5253_v51 = vadd.f32 %v3728_v59, %v6570_v31 }
0x10a9   :  { %v3956_v1 = vmul.f32 -1.442695, %v5236_v2  ;;  %v3958_v61 = vmul.f32 -1.442695, %v5252_v39 }
0x10aa   :  { %v3957_v38 = vmul.f32 -1.442695, %v5237_v55 }
0x10ab   :  { %5572 = vpow2.f32 %v3956_v1 }
0x10ac   :  { %5574 = vpow2.f32 %v3957_v38 }
0x10ad   :  { %5576 = vtanh.f32 %v5253_v51 }
0x10ae   :  { %5578 = vpow2.f32 %v3958_v61 }
0x10b5   :  { %v5573_v17 = vpop.eup %5572 }
0x10b6   :  { %v3744_v12 = vadd.f32 1.0, %v5573_v17  ;;  %v5575_v20 = vpop.eup %5574 }
0x10b7   :  { %v3745_v7 = vadd.f32 1.0, %v5575_v20  ;;  %v5577_v53 = vpop.eup %5576 }
0x10b8   :  { %5580 = vrcp.f32 %v3744_v12  ;;  %v5579_v3 = vpop.eup %5578 }
0x10b9   :  { %5582 = vrcp.f32 %v3745_v7  ;;  %v3746_v29 = vadd.f32 1.0, %v5579_v3 }
0x10bb   :  { %5584 = vrcp.f32 %v3746_v29 }
0x10c2   :  { %v5581_v21 = vpop.eup %5580 }
0x10c3   :  { %v3755_v6 = vmul.f32 %v5581_v21, %v5577_v53  ;;  %v5583_v16 = vpop.eup %5582 }
0x10c4   :  { %v3754_v44 = vmul.f32 %v5583_v16, %v6824_v63 }
0x10c5   :  { %v5585_v31 = vpop.eup %5584 }
0x10c6   :  { %v3756_v32 = vadd.f32 %v3755_v6, %v3754_v44 }
0x10c8   :  { %5586 = vtanh.f32 %v3756_v32 }
0x10d2   :  { %v5587_v48 = vpop.eup %5586 }
0x10d3   :  { %v3758_v62 = vmul.f32 %v5587_v48, %v5585_v31 }
0x10d5   :  { %v3762_v18 = vsel %vm3761_vm1, %v3758_v62, 0.0 }
0x10d6   :  { %v3763_v15 = vrot.slane %v3762_v18, 4 }
0x10d8   :  { %v3764_v8 = vadd.f32 %v3763_v15, %v3762_v18 }
0x10da   :  { %v3765_v49 = vrot.slane %v3764_v8, 2 }
0x10dc   :  { %v3766_v33 = vadd.f32 %v3765_v49, %v3764_v8 }
0x10de   :  { %v3767_v57 = vrot.slane %v3766_v33, 1 }
0x10e0   :  { %v3768_v28 = vadd.f32 %v3767_v57, %v3766_v33 }
0x10e2   :  { %v3769_v60 = vmul.f32 0.25, %v3768_v28 }
0x10e4   :  { %v3770_v23 = vsub.f32 %v3758_v62, %v3769_v60 }
0x10e6   :  { %v3771_v40 = vsel %vm3761_vm1, %v3770_v23, 0.0 }
0x10e7   :  { %v3772_v54 = vmul.f32 %v3771_v40, %v3771_v40 }
0x10e9   :  { %v3773_v63 = vrot.slane %v3772_v54, 4 }
0x10eb   :  { %v3774_v14 = vadd.f32 %v3773_v63, %v3772_v54 }
0x10ed   :  { %v3775_v27 = vrot.slane %v3774_v14, 2 }
0x10ef   :  { %v3776_v24 = vadd.f32 %v3775_v27, %v3774_v14 }
0x10f1   :  { %v3777_v52 = vrot.slane %v3776_v24, 1 }
0x10f3   :  { %v3778_v11 = vadd.f32 %v3777_v52, %v3776_v24 }
0x10f5   :  { %v3779_v41 = vmul.f32 0.25, %v3778_v11 }
0x10f7   :  { %v3780_v30 = vadd.f32 1e-05, %v3779_v41 }
0x10f9   :  { %5588 = vrsqrt.f32 %v3780_v30 }
0x1103   :  { %v5589_v25 = vpop.eup %5588 }
0x1104   :  { %v3782_v50 = vmul.f32 %v5589_v25, %v3770_v23 }
0x1106   :  { %v3790_v10 = vmul.f32 %v3959_v47, %v3782_v50 }
0x1108   :  { %v3798_v13 = vadd.f32 %v3960_v56, %v3790_v10 }
0x110a   :  { %4012 = vmatmul.mubr.f32.vlgmr.msra.gmra.mrb[32].mxu0 %v3798_v13 }
0x11dd   :  { %v3888_v26 = vpop.f32.mrb[32].mxu0 }
0x11de   :  { %v3889_v34 = vadd.f32 %v3961_v19, %v3888_v26  ;;  %v4013_v36 = vpop.f32.mrb[33].mxu0 }
0x11e0   :  { %3892 = vst [vmem:[#allocation15] sm:$0xff] %v3889_v34 }
0x11e1   :  { %5733 = shalt.err (!%p5730_p10)
}
0x11e2   :  { %s5734_s2 = scalar_lea.hbm %s6866_s11, 128 }
0x11e3   :  { %p5735_p11 = scmp.ne.s32.totalorder %s6866_s11, %s5734_s2  ;;  %p5738_p12 = scmp.lt.u32.totalorder %s5734_s2, %s6866_s11 }
0x11e5   :  { %p5740_p13 = pnand %p5738_p12, %p5735_p11 }
0x11e7   :  { %5743 = shalt.err (!%p5740_p13)
}
0x11e8   :  { %3902 = dma.vmem_to_hbm [thread:$0]  %s3900_s18, 128, %s6866_s11, [#allocation6]  }
0x11e9   :  { %5752 = dma.done.wait [#allocation6], 128  }
0x11ea   :  { %5753 = vsyncadd [#allocation6], 4294967168 }
0x11eb   :  { %3906 = vsyncpa [#allocation5], 1 }
0x11ec   :  { %3907 = vsyncpa [#allocation8], 1 }
0x11ed   :  { %3908 = vsyncpa [#allocation11], 1 }
0x11ee   :  { %3909 = vsyncpa [#allocation14], 1 }
0x11ef   :  { %3910 = vsyncpa [#allocation6], 1 }

</bundles_post_ra>
